<compile_context>
chip_gen: v5e
topology: v5e:2x2
jax: 0.10.0
libtpu: 0.0.40
codegen_flags: <defaults>
</compile_context>

<pallas_src>
import math

import jax
import jax.numpy as jnp
from jax import lax
from jax.experimental import pallas as pl
from jax.experimental.pallas import tpu as pltpu

BN_EPS = 1e-5
LANE = 128
SUBLANE = 8


def _round_up(v, m):
    return (v + m - 1) // m * m


def _make_mlp_kernel(num_layers, tile_n, n_true, layer_dims_pad, bn_width_pad,
                     matmul_dtype):
    """Build the fused multi-pass kernel body (static unroll over passes)."""
    num_bn = len(bn_width_pad)          # == num_layers (input BN + hidden BNs)
    num_passes = num_layers + 1
    inv_n = 1.0 / float(n_true)
    f_in_pad = layer_dims_pad[0][0]
    rows_per_tile = tile_n // SUBLANE

    def kernel(*refs):
        x_ref = refs[0]
        w_refs = refs[1:1 + num_layers]
        b_ref = refs[1 + num_layers]          # (1, f_vec) final-layer bias only
        g_ref = refs[2 + num_layers]          # (num_bn, f_vec) packed BN gammas
        beta_ref = refs[3 + num_layers]       # (num_bn, f_vec) packed BN betas
        out_ref = refs[4 + num_layers]
        sum_ref, sq_ref, scale_ref, shift_ref = refs[5 + num_layers:]

        p = pl.program_id(0)                  # pass index   (sequential)
        t = pl.program_id(1)                  # batch tile   (stats reduction)

        # valid-row mask (batch is zero-padded up to a tile multiple)
        rows = t * tile_n + lax.broadcasted_iota(jnp.int32, (tile_n, 1), 0)
        valid = (rows < n_true).astype(jnp.float32)

        x = x_ref[...]                        # (tile_n, f_in_pad)  bf16 stream

        def affine(h, j, width):
            # precomputed BN affine:  h * scale_j + shift_j   (f32)
            return h * scale_ref[j:j + 1, 0:width] + shift_ref[j:j + 1, 0:width]

        def linear(h, j, add_bias=False):     # layer j is 1-based
            dout = layer_dims_pad[j - 1][1]
            z = jnp.dot(h.astype(matmul_dtype), w_refs[j - 1][...],
                        preferred_element_type=jnp.float32)
            if add_bias:                      # only the final linear keeps it:
                z = z + b_ref[0:1, 0:dout]    # BN cancels hidden-layer biases.
            return z

        def forward_to(k):
            """h_{k-1}: input-BN affine + fully-normalized hidden layers 1..k-1."""
            h = affine(x, 0, f_in_pad)
            for j in range(1, k):
                h = jnp.maximum(
                    affine(linear(h, j), j, layer_dims_pad[j - 1][1]), 0.0)
            return h

        def accumulate(z, width):
            # per-sublane f32 partial sums; cross-sublane reduce is deferred to
            # the once-per-pass finalize step.
            zf = z.astype(jnp.float32)
            zm = zf * valid
            sum_ref[:, 0:width] += jnp.sum(
                zm.reshape(rows_per_tile, SUBLANE, width), axis=0)
            sq_ref[:, 0:width] += jnp.sum(
                (zm * zf).reshape(rows_per_tile, SUBLANE, width), axis=0)

        for k in range(num_passes):
            # -- once per pass (first tile): finalize previous BN stats, reset --
            @pl.when(jnp.logical_and(p == k, t == 0))
            def _(k=k):
                if k > 0:
                    w = bn_width_pad[k - 1]
                    mean = jnp.sum(sum_ref[:, 0:w], axis=0,
                                   keepdims=True) * inv_n
                    ex2 = jnp.sum(sq_ref[:, 0:w], axis=0,
                                  keepdims=True) * inv_n
                    var = jnp.maximum(ex2 - mean * mean, 0.0)   # clamp cancellation
                    sc = g_ref[k - 1:k, 0:w] * lax.rsqrt(var + BN_EPS)
                    scale_ref[k - 1:k, 0:w] = sc
                    shift_ref[k - 1:k, 0:w] = beta_ref[k - 1:k, 0:w] - mean * sc
                if k < num_passes - 1:        # last pass needs no fresh stats
                    sum_ref[...] = jnp.zeros_like(sum_ref)
                    sq_ref[...] = jnp.zeros_like(sq_ref)

            # -- per-tile work for pass k ---------------------------------------
            @pl.when(p == k)
            def _(k=k):
                if k == 0:
                    accumulate(x, f_in_pad)                       # input-BN stats
                elif k < num_layers:
                    accumulate(linear(forward_to(k), k), bn_width_pad[k])
                else:
                    out = linear(forward_to(num_layers), num_layers,
                                 add_bias=True)
                    out_ref[...] = out.astype(out_ref.dtype)      # final linear

    return kernel


def init_mlp_params(key, num_layers, input_dim, hidden_dim, output_dim):
    """Deterministic parameter init (shapes / init match the PyTorch module)."""
    params = {"bn0_gamma": jnp.ones((input_dim,), jnp.float32),
              "bn0_beta": jnp.zeros((input_dim,), jnp.float32),
              "layers": []}
    if num_layers == 1:
        dims = [(input_dim, output_dim)]
    else:
        dims = [(input_dim, hidden_dim)]
        dims += [(hidden_dim, hidden_dim)] * (num_layers - 2)
        dims += [(hidden_dim, output_dim)]
    for li, (din, dout) in enumerate(dims):
        key, kw, kb = jax.random.split(key, 3)
        bound = 1.0 / math.sqrt(din)
        wT = jax.random.uniform(kw, (din, dout), jnp.float32, -bound, bound)
        b = jax.random.uniform(kb, (dout,), jnp.float32, -bound, bound)
        layer = {"wT": wT, "b": b}
        if num_layers > 1 and li < num_layers - 1:
            layer["gamma"] = jnp.ones((dout,), jnp.float32)
            layer["beta"] = jnp.zeros((dout,), jnp.float32)
        params["layers"].append(layer)
    return params


def mlp_forward_pallas(x, params, num_layers, *, tile_n=512,
                       matmul_dtype=jnp.bfloat16, stream_dtype=jnp.bfloat16):
    """Fused MLP forward (training-mode BN) in one multi-pass pallas_call."""
    if num_layers < 1:
        raise ValueError("number of layers should be positive!")
    n, input_dim = x.shape
    layers = params["layers"]
    assert len(layers) == num_layers

    # real / padded dims
    dims = [(l["wT"].shape[0], l["wT"].shape[1]) for l in layers]
    dims_pad = [(_round_up(di, LANE), _round_up(do, LANE)) for di, do in dims]
    f_in_pad = dims_pad[0][0]
    f_out_pad = dims_pad[-1][1]
    bn_width = [input_dim] + [dims[i][1] for i in range(num_layers - 1)]
    bn_width_pad = [_round_up(w, LANE) for w in bn_width]
    num_bn = len(bn_width_pad)
    f_vec = max([f_in_pad, f_out_pad] + [dp[1] for dp in dims_pad])

    tile_n = max(16, _round_up(tile_n, 16))     # bf16 sublane-pack friendly
    n_pad = _round_up(max(n, tile_n), tile_n)
    num_tiles = n_pad // tile_n
    num_passes = num_layers + 1
    last_pass = num_passes - 1

    # ---- pad & pack parameters (zero padding keeps semantics exact) ----------
    x_pad = jnp.zeros((n_pad, f_in_pad), stream_dtype)
    x_pad = x_pad.at[:n, :input_dim].set(x.astype(stream_dtype))

    w_pads = []
    for (din, dout), (dip, dop), l in zip(dims, dims_pad, layers):
        w = jnp.zeros((dip, dop), jnp.float32).at[:din, :dout].set(l["wT"])
        w_pads.append(w.astype(matmul_dtype))

    # Only the final linear's bias survives (BN cancels all hidden biases).
    b_packed = jnp.zeros((1, f_vec), jnp.float32)
    b_packed = b_packed.at[0, :dims[-1][1]].set(layers[-1]["b"])

    g_packed = jnp.zeros((num_bn, f_vec), jnp.float32)
    be_packed = jnp.zeros((num_bn, f_vec), jnp.float32)
    g_packed = g_packed.at[0, :input_dim].set(params["bn0_gamma"])
    be_packed = be_packed.at[0, :input_dim].set(params["bn0_beta"])
    for j in range(1, num_bn):
        l = layers[j - 1]
        g_packed = g_packed.at[j, :l["gamma"].shape[0]].set(l["gamma"])
        be_packed = be_packed.at[j, :l["beta"].shape[0]].set(l["beta"])

    flat_inputs = [x_pad] + w_pads + [b_packed, g_packed, be_packed]

    # ---- specs / scratch ------------------------------------------------------
    const_map = lambda p, t: (0, 0)                  # resident params
    x_spec = pl.BlockSpec((tile_n, f_in_pad), lambda p, t: (t, 0))
    # Pass-aware output map: constant block on non-final passes so Pallas does
    # not write garbage output tiles back to HBM there; only the final pass
    # walks the batch tiles (each block is flushed exactly once, with real data).
    out_spec = pl.BlockSpec((tile_n, f_out_pad),
                            lambda p, t: (jnp.where(p == last_pass, t, 0), 0))

    scratch_shapes = [
        pltpu.VMEM((SUBLANE, f_vec), jnp.float32),    # per-sublane sum partials
        pltpu.VMEM((SUBLANE, f_vec), jnp.float32),    # per-sublane sumsq partials
        pltpu.VMEM((num_bn, f_vec), jnp.float32),     # per-BN scale
        pltpu.VMEM((num_bn, f_vec), jnp.float32),     # per-BN shift
    ]

    kernel = _make_mlp_kernel(num_layers, tile_n, n, dims_pad, bn_width_pad,
                              matmul_dtype)

    # VMEM capacity (v7x has 64 MiB/TC; v5e/v6e 128 MiB).
    try:
        vmem_cap = int(pltpu.get_tpu_info().vmem_capacity_bytes)
    except Exception:
        vmem_cap = 64 << 20

    param_bytes = sum(int(a.size) * a.dtype.itemsize for a in flat_inputs[1:])
    scratch_bytes = (2 * SUBLANE + 2 * _round_up(num_bn, SUBLANE)) * f_vec * 4

    def build(param_buffers):
        """param_buffers=1 single-buffers the constant-index resident params."""
        if param_buffers == 1:
            def const_spec(shape):
                return pl.BlockSpec(shape, const_map,
                                    pipeline_mode=pl.Buffered(1))
        else:
            def const_spec(shape):
                return pl.BlockSpec(shape, const_map)

        in_specs = [x_spec]
        in_specs += [const_spec(w.shape) for w in w_pads]
        in_specs += [const_spec(b_packed.shape),
                     const_spec(g_packed.shape),
                     const_spec(be_packed.shape)]

        est = (param_buffers * param_bytes
               + 2 * tile_n * f_in_pad * x_pad.dtype.itemsize   # streamed x
               + 2 * tile_n * f_out_pad * 4                     # output block
               + scratch_bytes)
        vmem_limit = int(min(int(0.9 * vmem_cap),
                             max(32 << 20, est + (8 << 20))))

        return pl.pallas_call(
            kernel,
            out_shape=jax.ShapeDtypeStruct((n_pad, f_out_pad), jnp.float32),
            grid_spec=pltpu.PrefetchScalarGridSpec(
                num_scalar_prefetch=0,
                grid=(num_passes, num_tiles),
                in_specs=in_specs,
                out_specs=out_spec,
                scratch_shapes=scratch_shapes),
            compiler_params=pltpu.CompilerParams(
                # Both axes 'arbitrary': the pass axis is sequential and the
                # tile axis accumulates whole-batch BN statistics into VMEM
                # scratch; a 'parallel' tile axis would corrupt the stats.
                dimension_semantics=("arbitrary", "arbitrary"),
                vmem_limit_bytes=vmem_limit),
        )

    # Prefer single-buffered resident params; fall back to the default
    # double-buffered specs if this JAX build rejects pipeline_mode/Buffered(1).
    out_pad = None
    if hasattr(pl, "Buffered"):
        try:
            out_pad = build(1)(*flat_inputs)
        except Exception:
            out_pad = None
    if out_pad is None:
        out_pad = build(2)(*flat_inputs)

    output_dim = dims[-1][1]
    return out_pad[:n, :output_dim]


def mlp_forward_ref(x, params, num_layers, matmul_dtype=jnp.float32,
                    stream_dtype=jnp.float32):
    """Pure-JAX reference (mirrors the PyTorch forward, training-mode BN)."""
    def bn(h, g, b):
        mean = jnp.mean(h, axis=0, keepdims=True)
        var = jnp.mean(jnp.square(h - mean), axis=0, keepdims=True)
        return (h - mean) * lax.rsqrt(var + BN_EPS) * g + b

    def mm(h, wT):
        return jnp.dot(h.astype(matmul_dtype), wT.astype(matmul_dtype),
                       preferred_element_type=jnp.float32)

    h = bn(x.astype(stream_dtype).astype(jnp.float32),
           params["bn0_gamma"], params["bn0_beta"])
    if num_layers == 1:
        l0 = params["layers"][0]
        return mm(h, l0["wT"]) + l0["b"]
    for li in range(num_layers - 1):
        l = params["layers"][li]
        z = mm(h, l["wT"]) + l["b"]
        h = jnp.maximum(bn(z, l["gamma"], l["beta"]), 0.0)
    last = params["layers"][-1]
    return mm(h, last["wT"]) + last["b"]


if __name__ == "__main__":
    # Small shapes consistent with the module; batch is NOT a tile multiple so
    # the valid-row masking of the BN statistics is exercised.
    num_layers = 3
    batch, input_dim, hidden_dim, output_dim = 300, 16, 32, 8

    key = jax.random.PRNGKey(0)
    key, kx, kp, kp1 = jax.random.split(key, 4)
    x = jax.random.normal(kx, (batch, input_dim), jnp.float32)
    params = init_mlp_params(kp, num_layers, input_dim, hidden_dim, output_dim)

    out = mlp_forward_pallas(x, params, num_layers, tile_n=128)
    out = jax.block_until_ready(out)
    assert out.shape == (batch, output_dim)

    # Tight check vs a reference mirroring the bf16 stream / bf16 matmuls.
    ref_bf16 = mlp_forward_ref(x, params, num_layers,
                               matmul_dtype=jnp.bfloat16,
                               stream_dtype=jnp.bfloat16)
    err = float(jnp.max(jnp.abs(out - ref_bf16)))
    assert jnp.allclose(out, ref_bf16, atol=2e-2, rtol=2e-2), (
        f"mismatch vs bf16 reference: max abs err {err}")

    # Loose semantic check vs the full-f32 (PyTorch-exact) reference.
    ref_f32 = mlp_forward_ref(x, params, num_layers)
    err32 = float(jnp.max(jnp.abs(out - ref_f32)))
    assert jnp.allclose(out, ref_f32, atol=1e-1, rtol=1e-1), (
        f"mismatch vs f32 reference: max abs err {err32}")

    # num_layers == 1 path (single Linear after the input BN).
    params1 = init_mlp_params(kp1, 1, input_dim, hidden_dim, output_dim)
    out1 = jax.block_until_ready(mlp_forward_pallas(x, params1, 1, tile_n=128))
    ref1 = mlp_forward_ref(x, params1, 1, matmul_dtype=jnp.bfloat16,
                           stream_dtype=jnp.bfloat16)
    err1 = float(jnp.max(jnp.abs(out1 - ref1)))
    assert jnp.allclose(out1, ref1, atol=2e-2, rtol=2e-2), (
        f"num_layers=1 mismatch: max abs err {err1}")

    print("KERNEL_OK")
</pallas_src>

<mosaic_0001>
module attributes {stable_mosaic.version = 11 : i64} {
  func.func @kernel(%arg0: i32, %arg1: i32, %arg2: memref<128x128xbf16, #tpu.memory_space<vmem>>, %arg3: memref<128x128xbf16, #tpu.memory_space<vmem>>, %arg4: memref<128x128xbf16, #tpu.memory_space<vmem>>, %arg5: memref<128x128xbf16, #tpu.memory_space<vmem>>, %arg6: memref<1x128xf32, #tpu.memory_space<vmem>>, %arg7: memref<3x128xf32, #tpu.memory_space<vmem>>, %arg8: memref<3x128xf32, #tpu.memory_space<vmem>>, %arg9: memref<128x128xf32, #tpu.memory_space<vmem>>, %arg10: memref<8x128xf32, #tpu.memory_space<vmem>>, %arg11: memref<8x128xf32, #tpu.memory_space<vmem>>, %arg12: memref<3x128xf32, #tpu.memory_space<vmem>>, %arg13: memref<3x128xf32, #tpu.memory_space<vmem>>) attributes {dimension_semantics = [#tpu.dimension_semantics<arbitrary>, #tpu.dimension_semantics<arbitrary>], iteration_bounds = array<i64: 4, 3>, scalar_prefetch = 0 : i64, scratch_operands = 4 : i64, tpu.core_type = #tpu.core_type<tc>, window_params = [{transform_indices = @transform_0, window_bounds = array<i64: 128, 128>}, {pipeline_mode = #tpu.pipeline_mode<synchronous>, transform_indices = @transform_1, window_bounds = array<i64: 128, 128>}, {pipeline_mode = #tpu.pipeline_mode<synchronous>, transform_indices = @transform_2, window_bounds = array<i64: 128, 128>}, {pipeline_mode = #tpu.pipeline_mode<synchronous>, transform_indices = @transform_3, window_bounds = array<i64: 128, 128>}, {pipeline_mode = #tpu.pipeline_mode<synchronous>, transform_indices = @transform_4, window_bounds = array<i64: 1, 128>}, {pipeline_mode = #tpu.pipeline_mode<synchronous>, transform_indices = @transform_5, window_bounds = array<i64: 3, 128>}, {pipeline_mode = #tpu.pipeline_mode<synchronous>, transform_indices = @transform_6, window_bounds = array<i64: 3, 128>}, {transform_indices = @transform_7, window_bounds = array<i64: 128, 128>}]} {
    %c128_i32 = arith.constant 128 : i32
    %0 = arith.muli %arg1, %c128_i32 : i32
    %1 = tpu.iota {dimensions = array<i32: 0>} : vector<128x1xi32>
    %2 = vector.broadcast %0 : i32 to vector<128x1xi32>
    %3 = arith.addi %2, %1 : vector<128x1xi32>
    %c300_i32 = arith.constant 300 : i32
    %4 = vector.broadcast %c300_i32 : i32 to vector<128x1xi32>
    %5 = arith.cmpi slt, %3, %4 : vector<128x1xi32>
    %6 = arith.extui %5 : vector<128x1xi1> to vector<128x1xi32>
    %7 = arith.sitofp %6 : vector<128x1xi32> to vector<128x1xf32>
    %c0 = arith.constant 0 : index
    %c0_0 = arith.constant 0 : index
    %8 = vector.load %arg2[%c0, %c0_0] : memref<128x128xbf16, #tpu.memory_space<vmem>>, vector<128x128xbf16>
    %c0_i32 = arith.constant 0 : i32
    %9 = arith.cmpi eq, %arg0, %c0_i32 : i32
    %c0_i32_1 = arith.constant 0 : i32
    %10 = arith.cmpi eq, %arg1, %c0_i32_1 : i32
    %11 = arith.andi %9, %10 : i1
    %12 = arith.extui %11 : i1 to i32
    %c0_i32_2 = arith.constant 0 : i32
    %13 = arith.cmpi ne, %12, %c0_i32_2 : i32
    scf.if %13 {
      %cst = arith.constant 0.000000e+00 : f32
      %41 = vector.broadcast %cst : f32 to vector<8x128xf32>
      %c0_17 = arith.constant 0 : index
      %c0_18 = arith.constant 0 : index
      %42 = vector.load %arg10[%c0_17, %c0_18] : memref<8x128xf32, #tpu.memory_space<vmem>>, vector<8x128xf32>
      tpu.vector_store %arg10[%c0_17, %c0_18], %41 {strides = array<i32>} : memref<8x128xf32, #tpu.memory_space<vmem>>, vector<8x128xf32>,
      %cst_19 = arith.constant 0.000000e+00 : f32
      %43 = vector.broadcast %cst_19 : f32 to vector<8x128xf32>
      %c0_20 = arith.constant 0 : index
      %c0_21 = arith.constant 0 : index
      %44 = vector.load %arg11[%c0_20, %c0_21] : memref<8x128xf32, #tpu.memory_space<vmem>>, vector<8x128xf32>
      tpu.vector_store %arg11[%c0_20, %c0_21], %43 {strides = array<i32>} : memref<8x128xf32, #tpu.memory_space<vmem>>, vector<8x128xf32>,
    } else {
    }
    %c0_i32_3 = arith.constant 0 : i32
    %14 = arith.cmpi eq, %arg0, %c0_i32_3 : i32
    %15 = arith.extui %14 : i1 to i32
    %c0_i32_4 = arith.constant 0 : i32
    %16 = arith.cmpi ne, %15, %c0_i32_4 : i32
    scf.if %16 {
      %41 = arith.extf %8 : vector<128x128xbf16> to vector<128x128xf32>
      %42 = vector.broadcast %7 : vector<128x1xf32> to vector<128x128xf32>
      %43 = arith.mulf %41, %42 : vector<128x128xf32>
      %c0_17 = arith.constant 0 : index
      %c0_18 = arith.constant 0 : index
      %44 = vector.load %arg10[%c0_17, %c0_18] : memref<8x128xf32, #tpu.memory_space<vmem>>, vector<8x128xf32>
      %45 = vector.shape_cast %43 : vector<128x128xf32> to vector<16x8x128xf32>
      %cst = arith.constant dense<0.000000e+00> : vector<8x128xf32>
      %46 = vector.multi_reduction <add>, %45, %cst [0] : vector<16x8x128xf32> to vector<8x128xf32>
      %47 = arith.addf %44, %46 : vector<8x128xf32>
      %c0_19 = arith.constant 0 : index
      %c0_20 = arith.constant 0 : index
      %48 = vector.load %arg10[%c0_19, %c0_20] : memref<8x128xf32, #tpu.memory_space<vmem>>, vector<8x128xf32>
      tpu.vector_store %arg10[%c0_19, %c0_20], %47 {strides = array<i32>} : memref<8x128xf32, #tpu.memory_space<vmem>>, vector<8x128xf32>,
      %c0_21 = arith.constant 0 : index
      %c0_22 = arith.constant 0 : index
      %49 = vector.load %arg11[%c0_21, %c0_22] : memref<8x128xf32, #tpu.memory_space<vmem>>, vector<8x128xf32>
      %50 = arith.mulf %43, %41 : vector<128x128xf32>
      %51 = vector.shape_cast %50 : vector<128x128xf32> to vector<16x8x128xf32>
      %cst_23 = arith.constant dense<0.000000e+00> : vector<8x128xf32>
      %52 = vector.multi_reduction <add>, %51, %cst_23 [0] : vector<16x8x128xf32> to vector<8x128xf32>
      %53 = arith.addf %49, %52 : vector<8x128xf32>
      %c0_24 = arith.constant 0 : index
      %c0_25 = arith.constant 0 : index
      %54 = vector.load %arg11[%c0_24, %c0_25] : memref<8x128xf32, #tpu.memory_space<vmem>>, vector<8x128xf32>
      tpu.vector_store %arg11[%c0_24, %c0_25], %53 {strides = array<i32>} : memref<8x128xf32, #tpu.memory_space<vmem>>, vector<8x128xf32>,
    } else {
    }
    %c1_i32 = arith.constant 1 : i32
    %17 = arith.cmpi eq, %arg0, %c1_i32 : i32
    %c0_i32_5 = arith.constant 0 : i32
    %18 = arith.cmpi eq, %arg1, %c0_i32_5 : i32
    %19 = arith.andi %17, %18 : i1
    %20 = arith.extui %19 : i1 to i32
    %c0_i32_6 = arith.constant 0 : i32
    %21 = arith.cmpi ne, %20, %c0_i32_6 : i32
    scf.if %21 {
      %c0_17 = arith.constant 0 : index
      %c0_18 = arith.constant 0 : index
      %41 = vector.load %arg10[%c0_17, %c0_18] : memref<8x128xf32, #tpu.memory_space<vmem>>, vector<8x128xf32>
      %cst = arith.constant dense<0.000000e+00> : vector<128xf32>
      %42 = vector.multi_reduction <add>, %41, %cst [0] : vector<8x128xf32> to vector<128xf32>
      %43 = vector.shape_cast %42 : vector<128xf32> to vector<1x128xf32>
      %cst_19 = arith.constant 0.00333333341 : f32
      %44 = vector.broadcast %cst_19 : f32 to vector<1x128xf32>
      %45 = arith.mulf %43, %44 : vector<1x128xf32>
      %c0_20 = arith.constant 0 : index
      %c0_21 = arith.constant 0 : index
      %46 = vector.load %arg11[%c0_20, %c0_21] : memref<8x128xf32, #tpu.memory_space<vmem>>, vector<8x128xf32>
      %cst_22 = arith.constant dense<0.000000e+00> : vector<128xf32>
      %47 = vector.multi_reduction <add>, %46, %cst_22 [0] : vector<8x128xf32> to vector<128xf32>
      %48 = vector.shape_cast %47 : vector<128xf32> to vector<1x128xf32>
      %cst_23 = arith.constant 0.00333333341 : f32
      %49 = vector.broadcast %cst_23 : f32 to vector<1x128xf32>
      %50 = arith.mulf %48, %49 : vector<1x128xf32>
      %51 = arith.mulf %45, %45 : vector<1x128xf32>
      %52 = arith.subf %50, %51 : vector<1x128xf32>
      %cst_24 = arith.constant 0.000000e+00 : f32
      %53 = vector.broadcast %cst_24 : f32 to vector<1x128xf32>
      %54 = arith.maximumf %52, %53 : vector<1x128xf32>
      %c0_25 = arith.constant 0 : index
      %c0_26 = arith.constant 0 : index
      %55 = vector.load %arg7[%c0_25, %c0_26] : memref<3x128xf32, #tpu.memory_space<vmem>>, vector<1x128xf32>
      %cst_27 = arith.constant 9.99999974E-6 : f32
      %56 = vector.broadcast %cst_27 : f32 to vector<1x128xf32>
      %57 = arith.addf %54, %56 : vector<1x128xf32>
      %58 = math.rsqrt %57 : vector<1x128xf32>
      %59 = arith.mulf %55, %58 : vector<1x128xf32>
      %c0_28 = arith.constant 0 : index
      %c0_29 = arith.constant 0 : index
      %60 = vector.load %arg12[%c0_28, %c0_29] : memref<3x128xf32, #tpu.memory_space<vmem>>, vector<1x128xf32>
      tpu.vector_store %arg12[%c0_28, %c0_29], %59 {strides = array<i32>} : memref<3x128xf32, #tpu.memory_space<vmem>>, vector<1x128xf32>,
      %c0_30 = arith.constant 0 : index
      %c0_31 = arith.constant 0 : index
      %61 = vector.load %arg8[%c0_30, %c0_31] : memref<3x128xf32, #tpu.memory_space<vmem>>, vector<1x128xf32>
      %62 = arith.mulf %45, %59 : vector<1x128xf32>
      %63 = arith.subf %61, %62 : vector<1x128xf32>
      %c0_32 = arith.constant 0 : index
      %c0_33 = arith.constant 0 : index
      %64 = vector.load %arg13[%c0_32, %c0_33] : memref<3x128xf32, #tpu.memory_space<vmem>>, vector<1x128xf32>
      tpu.vector_store %arg13[%c0_32, %c0_33], %63 {strides = array<i32>} : memref<3x128xf32, #tpu.memory_space<vmem>>, vector<1x128xf32>,
      %cst_34 = arith.constant 0.000000e+00 : f32
      %65 = vector.broadcast %cst_34 : f32 to vector<8x128xf32>
      %c0_35 = arith.constant 0 : index
      %c0_36 = arith.constant 0 : index
      %66 = vector.load %arg10[%c0_35, %c0_36] : memref<8x128xf32, #tpu.memory_space<vmem>>, vector<8x128xf32>
      tpu.vector_store %arg10[%c0_35, %c0_36], %65 {strides = array<i32>} : memref<8x128xf32, #tpu.memory_space<vmem>>, vector<8x128xf32>,
      %cst_37 = arith.constant 0.000000e+00 : f32
      %67 = vector.broadcast %cst_37 : f32 to vector<8x128xf32>
      %c0_38 = arith.constant 0 : index
      %c0_39 = arith.constant 0 : index
      %68 = vector.load %arg11[%c0_38, %c0_39] : memref<8x128xf32, #tpu.memory_space<vmem>>, vector<8x128xf32>
      tpu.vector_store %arg11[%c0_38, %c0_39], %67 {strides = array<i32>} : memref<8x128xf32, #tpu.memory_space<vmem>>, vector<8x128xf32>,
    } else {
    }
    %c1_i32_7 = arith.constant 1 : i32
    %22 = arith.cmpi eq, %arg0, %c1_i32_7 : i32
    %23 = arith.extui %22 : i1 to i32
    %c0_i32_8 = arith.constant 0 : i32
    %24 = arith.cmpi ne, %23, %c0_i32_8 : i32
    scf.if %24 {
      %c0_17 = arith.constant 0 : index
      %c0_18 = arith.constant 0 : index
      %41 = vector.load %arg12[%c0_17, %c0_18] : memref<3x128xf32, #tpu.memory_space<vmem>>, vector<1x128xf32>
      %42 = arith.extf %8 : vector<128x128xbf16> to vector<128x128xf32>
      %43 = vector.broadcast %41 : vector<1x128xf32> to vector<128x128xf32>
      %44 = arith.mulf %42, %43 : vector<128x128xf32>
      %c0_19 = arith.constant 0 : index
      %c0_20 = arith.constant 0 : index
      %45 = vector.load %arg13[%c0_19, %c0_20] : memref<3x128xf32, #tpu.memory_space<vmem>>, vector<1x128xf32>
      %46 = vector.broadcast %45 : vector<1x128xf32> to vector<128x128xf32>
      %47 = arith.addf %44, %46 : vector<128x128xf32>
      %48 = arith.truncf %47 : vector<128x128xf32> to vector<128x128xbf16>
      %c0_21 = arith.constant 0 : index
      %c0_22 = arith.constant 0 : index
      %49 = vector.load %arg3[%c0_21, %c0_22] : memref<128x128xbf16, #tpu.memory_space<vmem>>, vector<128x128xbf16>
      %cst = arith.constant dense<0.000000e+00> : vector<128x128xf32>
      %50 = tpu.matmul %48, %49, %cst {dimension_numbers = #tpu.dot_dimension_numbers<[1], [0], [0], [1], [0, 0, 1, 1], [], []>} : vector<128x128xbf16>, vector<128x128xbf16>, vector<128x128xf32> -> vector<128x128xf32>
      %51 = vector.broadcast %7 : vector<128x1xf32> to vector<128x128xf32>
      %52 = arith.mulf %50, %51 : vector<128x128xf32>
      %c0_23 = arith.constant 0 : index
      %c0_24 = arith.constant 0 : index
      %53 = vector.load %arg10[%c0_23, %c0_24] : memref<8x128xf32, #tpu.memory_space<vmem>>, vector<8x128xf32>
      %54 = vector.shape_cast %52 : vector<128x128xf32> to vector<16x8x128xf32>
      %cst_25 = arith.constant dense<0.000000e+00> : vector<8x128xf32>
      %55 = vector.multi_reduction <add>, %54, %cst_25 [0] : vector<16x8x128xf32> to vector<8x128xf32>
      %56 = arith.addf %53, %55 : vector<8x128xf32>
      %c0_26 = arith.constant 0 : index
      %c0_27 = arith.constant 0 : index
      %57 = vector.load %arg10[%c0_26, %c0_27] : memref<8x128xf32, #tpu.memory_space<vmem>>, vector<8x128xf32>
      tpu.vector_store %arg10[%c0_26, %c0_27], %56 {strides = array<i32>} : memref<8x128xf32, #tpu.memory_space<vmem>>, vector<8x128xf32>,
      %c0_28 = arith.constant 0 : index
      %c0_29 = arith.constant 0 : index
      %58 = vector.load %arg11[%c0_28, %c0_29] : memref<8x128xf32, #tpu.memory_space<vmem>>, vector<8x128xf32>
      %59 = arith.mulf %52, %50 : vector<128x128xf32>
      %60 = vector.shape_cast %59 : vector<128x128xf32> to vector<16x8x128xf32>
      %cst_30 = arith.constant dense<0.000000e+00> : vector<8x128xf32>
      %61 = vector.multi_reduction <add>, %60, %cst_30 [0] : vector<16x8x128xf32> to vector<8x128xf32>
      %62 = arith.addf %58, %61 : vector<8x128xf32>
      %c0_31 = arith.constant 0 : index
      %c0_32 = arith.constant 0 : index
      %63 = vector.load %arg11[%c0_31, %c0_32] : memref<8x128xf32, #tpu.memory_space<vmem>>, vector<8x128xf32>
      tpu.vector_store %arg11[%c0_31, %c0_32], %62 {strides = array<i32>} : memref<8x128xf32, #tpu.memory_space<vmem>>, vector<8x128xf32>,
    } else {
    }
    %c2_i32 = arith.constant 2 : i32
    %25 = arith.cmpi eq, %arg0, %c2_i32 : i32
    %c0_i32_9 = arith.constant 0 : i32
    %26 = arith.cmpi eq, %arg1, %c0_i32_9 : i32
    %27 = arith.andi %25, %26 : i1
    %28 = arith.extui %27 : i1 to i32
    %c0_i32_10 = arith.constant 0 : i32
    %29 = arith.cmpi ne, %28, %c0_i32_10 : i32
    scf.if %29 {
      %c0_17 = arith.constant 0 : index
      %c0_18 = arith.constant 0 : index
      %41 = vector.load %arg10[%c0_17, %c0_18] : memref<8x128xf32, #tpu.memory_space<vmem>>, vector<8x128xf32>
      %cst = arith.constant dense<0.000000e+00> : vector<128xf32>
      %42 = vector.multi_reduction <add>, %41, %cst [0] : vector<8x128xf32> to vector<128xf32>
      %43 = vector.shape_cast %42 : vector<128xf32> to vector<1x128xf32>
      %cst_19 = arith.constant 0.00333333341 : f32
      %44 = vector.broadcast %cst_19 : f32 to vector<1x128xf32>
      %45 = arith.mulf %43, %44 : vector<1x128xf32>
      %c0_20 = arith.constant 0 : index
      %c0_21 = arith.constant 0 : index
      %46 = vector.load %arg11[%c0_20, %c0_21] : memref<8x128xf32, #tpu.memory_space<vmem>>, vector<8x128xf32>
      %cst_22 = arith.constant dense<0.000000e+00> : vector<128xf32>
      %47 = vector.multi_reduction <add>, %46, %cst_22 [0] : vector<8x128xf32> to vector<128xf32>
      %48 = vector.shape_cast %47 : vector<128xf32> to vector<1x128xf32>
      %cst_23 = arith.constant 0.00333333341 : f32
      %49 = vector.broadcast %cst_23 : f32 to vector<1x128xf32>
      %50 = arith.mulf %48, %49 : vector<1x128xf32>
      %51 = arith.mulf %45, %45 : vector<1x128xf32>
      %52 = arith.subf %50, %51 : vector<1x128xf32>
      %cst_24 = arith.constant 0.000000e+00 : f32
      %53 = vector.broadcast %cst_24 : f32 to vector<1x128xf32>
      %54 = arith.maximumf %52, %53 : vector<1x128xf32>
      %c1 = arith.constant 1 : index
      %c0_25 = arith.constant 0 : index
      %55 = vector.load %arg7[%c1, %c0_25] : memref<3x128xf32, #tpu.memory_space<vmem>>, vector<1x128xf32>
      %cst_26 = arith.constant 9.99999974E-6 : f32
      %56 = vector.broadcast %cst_26 : f32 to vector<1x128xf32>
      %57 = arith.addf %54, %56 : vector<1x128xf32>
      %58 = math.rsqrt %57 : vector<1x128xf32>
      %59 = arith.mulf %55, %58 : vector<1x128xf32>
      %c1_27 = arith.constant 1 : index
      %c0_28 = arith.constant 0 : index
      %60 = vector.load %arg12[%c1_27, %c0_28] : memref<3x128xf32, #tpu.memory_space<vmem>>, vector<1x128xf32>
      tpu.vector_store %arg12[%c1_27, %c0_28], %59 {strides = array<i32>} : memref<3x128xf32, #tpu.memory_space<vmem>>, vector<1x128xf32>,
      %c1_29 = arith.constant 1 : index
      %c0_30 = arith.constant 0 : index
      %61 = vector.load %arg8[%c1_29, %c0_30] : memref<3x128xf32, #tpu.memory_space<vmem>>, vector<1x128xf32>
      %62 = arith.mulf %45, %59 : vector<1x128xf32>
      %63 = arith.subf %61, %62 : vector<1x128xf32>
      %c1_31 = arith.constant 1 : index
      %c0_32 = arith.constant 0 : index
      %64 = vector.load %arg13[%c1_31, %c0_32] : memref<3x128xf32, #tpu.memory_space<vmem>>, vector<1x128xf32>
      tpu.vector_store %arg13[%c1_31, %c0_32], %63 {strides = array<i32>} : memref<3x128xf32, #tpu.memory_space<vmem>>, vector<1x128xf32>,
      %cst_33 = arith.constant 0.000000e+00 : f32
      %65 = vector.broadcast %cst_33 : f32 to vector<8x128xf32>
      %c0_34 = arith.constant 0 : index
      %c0_35 = arith.constant 0 : index
      %66 = vector.load %arg10[%c0_34, %c0_35] : memref<8x128xf32, #tpu.memory_space<vmem>>, vector<8x128xf32>
      tpu.vector_store %arg10[%c0_34, %c0_35], %65 {strides = array<i32>} : memref<8x128xf32, #tpu.memory_space<vmem>>, vector<8x128xf32>,
      %cst_36 = arith.constant 0.000000e+00 : f32
      %67 = vector.broadcast %cst_36 : f32 to vector<8x128xf32>
      %c0_37 = arith.constant 0 : index
      %c0_38 = arith.constant 0 : index
      %68 = vector.load %arg11[%c0_37, %c0_38] : memref<8x128xf32, #tpu.memory_space<vmem>>, vector<8x128xf32>
      tpu.vector_store %arg11[%c0_37, %c0_38], %67 {strides = array<i32>} : memref<8x128xf32, #tpu.memory_space<vmem>>, vector<8x128xf32>,
    } else {
    }
    %c2_i32_11 = arith.constant 2 : i32
    %30 = arith.cmpi eq, %arg0, %c2_i32_11 : i32
    %31 = arith.extui %30 : i1 to i32
    %c0_i32_12 = arith.constant 0 : i32
    %32 = arith.cmpi ne, %31, %c0_i32_12 : i32
    scf.if %32 {
      %c0_17 = arith.constant 0 : index
      %c0_18 = arith.constant 0 : index
      %41 = vector.load %arg12[%c0_17, %c0_18] : memref<3x128xf32, #tpu.memory_space<vmem>>, vector<1x128xf32>
      %42 = arith.extf %8 : vector<128x128xbf16> to vector<128x128xf32>
      %43 = vector.broadcast %41 : vector<1x128xf32> to vector<128x128xf32>
      %44 = arith.mulf %42, %43 : vector<128x128xf32>
      %c0_19 = arith.constant 0 : index
      %c0_20 = arith.constant 0 : index
      %45 = vector.load %arg13[%c0_19, %c0_20] : memref<3x128xf32, #tpu.memory_space<vmem>>, vector<1x128xf32>
      %46 = vector.broadcast %45 : vector<1x128xf32> to vector<128x128xf32>
      %47 = arith.addf %44, %46 : vector<128x128xf32>
      %48 = arith.truncf %47 : vector<128x128xf32> to vector<128x128xbf16>
      %c0_21 = arith.constant 0 : index
      %c0_22 = arith.constant 0 : index
      %49 = vector.load %arg3[%c0_21, %c0_22] : memref<128x128xbf16, #tpu.memory_space<vmem>>, vector<128x128xbf16>
      %cst = arith.constant dense<0.000000e+00> : vector<128x128xf32>
      %50 = tpu.matmul %48, %49, %cst {dimension_numbers = #tpu.dot_dimension_numbers<[1], [0], [0], [1], [0, 0, 1, 1], [], []>} : vector<128x128xbf16>, vector<128x128xbf16>, vector<128x128xf32> -> vector<128x128xf32>
      %c1 = arith.constant 1 : index
      %c0_23 = arith.constant 0 : index
      %51 = vector.load %arg12[%c1, %c0_23] : memref<3x128xf32, #tpu.memory_space<vmem>>, vector<1x128xf32>
      %52 = vector.broadcast %51 : vector<1x128xf32> to vector<128x128xf32>
      %53 = arith.mulf %50, %52 : vector<128x128xf32>
      %c1_24 = arith.constant 1 : index
      %c0_25 = arith.constant 0 : index
      %54 = vector.load %arg13[%c1_24, %c0_25] : memref<3x128xf32, #tpu.memory_space<vmem>>, vector<1x128xf32>
      %55 = vector.broadcast %54 : vector<1x128xf32> to vector<128x128xf32>
      %56 = arith.addf %53, %55 : vector<128x128xf32>
      %cst_26 = arith.constant 0.000000e+00 : f32
      %57 = vector.broadcast %cst_26 : f32 to vector<128x128xf32>
      %58 = arith.maximumf %56, %57 : vector<128x128xf32>
      %59 = arith.truncf %58 : vector<128x128xf32> to vector<128x128xbf16>
      %c0_27 = arith.constant 0 : index
      %c0_28 = arith.constant 0 : index
      %60 = vector.load %arg4[%c0_27, %c0_28] : memref<128x128xbf16, #tpu.memory_space<vmem>>, vector<128x128xbf16>
      %cst_29 = arith.constant dense<0.000000e+00> : vector<128x128xf32>
      %61 = tpu.matmul %59, %60, %cst_29 {dimension_numbers = #tpu.dot_dimension_numbers<[1], [0], [0], [1], [0, 0, 1, 1], [], []>} : vector<128x128xbf16>, vector<128x128xbf16>, vector<128x128xf32> -> vector<128x128xf32>
      %62 = vector.broadcast %7 : vector<128x1xf32> to vector<128x128xf32>
      %63 = arith.mulf %61, %62 : vector<128x128xf32>
      %c0_30 = arith.constant 0 : index
      %c0_31 = arith.constant 0 : index
      %64 = vector.load %arg10[%c0_30, %c0_31] : memref<8x128xf32, #tpu.memory_space<vmem>>, vector<8x128xf32>
      %65 = vector.shape_cast %63 : vector<128x128xf32> to vector<16x8x128xf32>
      %cst_32 = arith.constant dense<0.000000e+00> : vector<8x128xf32>
      %66 = vector.multi_reduction <add>, %65, %cst_32 [0] : vector<16x8x128xf32> to vector<8x128xf32>
      %67 = arith.addf %64, %66 : vector<8x128xf32>
      %c0_33 = arith.constant 0 : index
      %c0_34 = arith.constant 0 : index
      %68 = vector.load %arg10[%c0_33, %c0_34] : memref<8x128xf32, #tpu.memory_space<vmem>>, vector<8x128xf32>
      tpu.vector_store %arg10[%c0_33, %c0_34], %67 {strides = array<i32>} : memref<8x128xf32, #tpu.memory_space<vmem>>, vector<8x128xf32>,
      %c0_35 = arith.constant 0 : index
      %c0_36 = arith.constant 0 : index
      %69 = vector.load %arg11[%c0_35, %c0_36] : memref<8x128xf32, #tpu.memory_space<vmem>>, vector<8x128xf32>
      %70 = arith.mulf %63, %61 : vector<128x128xf32>
      %71 = vector.shape_cast %70 : vector<128x128xf32> to vector<16x8x128xf32>
      %cst_37 = arith.constant dense<0.000000e+00> : vector<8x128xf32>
      %72 = vector.multi_reduction <add>, %71, %cst_37 [0] : vector<16x8x128xf32> to vector<8x128xf32>
      %73 = arith.addf %69, %72 : vector<8x128xf32>
      %c0_38 = arith.constant 0 : index
      %c0_39 = arith.constant 0 : index
      %74 = vector.load %arg11[%c0_38, %c0_39] : memref<8x128xf32, #tpu.memory_space<vmem>>, vector<8x128xf32>
      tpu.vector_store %arg11[%c0_38, %c0_39], %73 {strides = array<i32>} : memref<8x128xf32, #tpu.memory_space<vmem>>, vector<8x128xf32>,
    } else {
    }
    %c3_i32 = arith.constant 3 : i32
    %33 = arith.cmpi eq, %arg0, %c3_i32 : i32
    %c0_i32_13 = arith.constant 0 : i32
    %34 = arith.cmpi eq, %arg1, %c0_i32_13 : i32
    %35 = arith.andi %33, %34 : i1
    %36 = arith.extui %35 : i1 to i32
    %c0_i32_14 = arith.constant 0 : i32
    %37 = arith.cmpi ne, %36, %c0_i32_14 : i32
    scf.if %37 {
      %c0_17 = arith.constant 0 : index
      %c0_18 = arith.constant 0 : index
      %41 = vector.load %arg10[%c0_17, %c0_18] : memref<8x128xf32, #tpu.memory_space<vmem>>, vector<8x128xf32>
      %cst = arith.constant dense<0.000000e+00> : vector<128xf32>
      %42 = vector.multi_reduction <add>, %41, %cst [0] : vector<8x128xf32> to vector<128xf32>
      %43 = vector.shape_cast %42 : vector<128xf32> to vector<1x128xf32>
      %cst_19 = arith.constant 0.00333333341 : f32
      %44 = vector.broadcast %cst_19 : f32 to vector<1x128xf32>
      %45 = arith.mulf %43, %44 : vector<1x128xf32>
      %c0_20 = arith.constant 0 : index
      %c0_21 = arith.constant 0 : index
      %46 = vector.load %arg11[%c0_20, %c0_21] : memref<8x128xf32, #tpu.memory_space<vmem>>, vector<8x128xf32>
      %cst_22 = arith.constant dense<0.000000e+00> : vector<128xf32>
      %47 = vector.multi_reduction <add>, %46, %cst_22 [0] : vector<8x128xf32> to vector<128xf32>
      %48 = vector.shape_cast %47 : vector<128xf32> to vector<1x128xf32>
      %cst_23 = arith.constant 0.00333333341 : f32
      %49 = vector.broadcast %cst_23 : f32 to vector<1x128xf32>
      %50 = arith.mulf %48, %49 : vector<1x128xf32>
      %51 = arith.mulf %45, %45 : vector<1x128xf32>
      %52 = arith.subf %50, %51 : vector<1x128xf32>
      %cst_24 = arith.constant 0.000000e+00 : f32
      %53 = vector.broadcast %cst_24 : f32 to vector<1x128xf32>
      %54 = arith.maximumf %52, %53 : vector<1x128xf32>
      %c2 = arith.constant 2 : index
      %c0_25 = arith.constant 0 : index
      %55 = vector.load %arg7[%c2, %c0_25] : memref<3x128xf32, #tpu.memory_space<vmem>>, vector<1x128xf32>
      %cst_26 = arith.constant 9.99999974E-6 : f32
      %56 = vector.broadcast %cst_26 : f32 to vector<1x128xf32>
      %57 = arith.addf %54, %56 : vector<1x128xf32>
      %58 = math.rsqrt %57 : vector<1x128xf32>
      %59 = arith.mulf %55, %58 : vector<1x128xf32>
      %c2_27 = arith.constant 2 : index
      %c0_28 = arith.constant 0 : index
      %60 = vector.load %arg12[%c2_27, %c0_28] : memref<3x128xf32, #tpu.memory_space<vmem>>, vector<1x128xf32>
      tpu.vector_store %arg12[%c2_27, %c0_28], %59 {strides = array<i32>} : memref<3x128xf32, #tpu.memory_space<vmem>>, vector<1x128xf32>,
      %c2_29 = arith.constant 2 : index
      %c0_30 = arith.constant 0 : index
      %61 = vector.load %arg8[%c2_29, %c0_30] : memref<3x128xf32, #tpu.memory_space<vmem>>, vector<1x128xf32>
      %62 = arith.mulf %45, %59 : vector<1x128xf32>
      %63 = arith.subf %61, %62 : vector<1x128xf32>
      %c2_31 = arith.constant 2 : index
      %c0_32 = arith.constant 0 : index
      %64 = vector.load %arg13[%c2_31, %c0_32] : memref<3x128xf32, #tpu.memory_space<vmem>>, vector<1x128xf32>
      tpu.vector_store %arg13[%c2_31, %c0_32], %63 {strides = array<i32>} : memref<3x128xf32, #tpu.memory_space<vmem>>, vector<1x128xf32>,
    } else {
    }
    %c3_i32_15 = arith.constant 3 : i32
    %38 = arith.cmpi eq, %arg0, %c3_i32_15 : i32
    %39 = arith.extui %38 : i1 to i32
    %c0_i32_16 = arith.constant 0 : i32
    %40 = arith.cmpi ne, %39, %c0_i32_16 : i32
    scf.if %40 {
      %c0_17 = arith.constant 0 : index
      %c0_18 = arith.constant 0 : index
      %41 = vector.load %arg12[%c0_17, %c0_18] : memref<3x128xf32, #tpu.memory_space<vmem>>, vector<1x128xf32>
      %42 = arith.extf %8 : vector<128x128xbf16> to vector<128x128xf32>
      %43 = vector.broadcast %41 : vector<1x128xf32> to vector<128x128xf32>
      %44 = arith.mulf %42, %43 : vector<128x128xf32>
      %c0_19 = arith.constant 0 : index
      %c0_20 = arith.constant 0 : index
      %45 = vector.load %arg13[%c0_19, %c0_20] : memref<3x128xf32, #tpu.memory_space<vmem>>, vector<1x128xf32>
      %46 = vector.broadcast %45 : vector<1x128xf32> to vector<128x128xf32>
      %47 = arith.addf %44, %46 : vector<128x128xf32>
      %48 = arith.truncf %47 : vector<128x128xf32> to vector<128x128xbf16>
      %c0_21 = arith.constant 0 : index
      %c0_22 = arith.constant 0 : index
      %49 = vector.load %arg3[%c0_21, %c0_22] : memref<128x128xbf16, #tpu.memory_space<vmem>>, vector<128x128xbf16>
      %cst = arith.constant dense<0.000000e+00> : vector<128x128xf32>
      %50 = tpu.matmul %48, %49, %cst {dimension_numbers = #tpu.dot_dimension_numbers<[1], [0], [0], [1], [0, 0, 1, 1], [], []>} : vector<128x128xbf16>, vector<128x128xbf16>, vector<128x128xf32> -> vector<128x128xf32>
      %c1 = arith.constant 1 : index
      %c0_23 = arith.constant 0 : index
      %51 = vector.load %arg12[%c1, %c0_23] : memref<3x128xf32, #tpu.memory_space<vmem>>, vector<1x128xf32>
      %52 = vector.broadcast %51 : vector<1x128xf32> to vector<128x128xf32>
      %53 = arith.mulf %50, %52 : vector<128x128xf32>
      %c1_24 = arith.constant 1 : index
      %c0_25 = arith.constant 0 : index
      %54 = vector.load %arg13[%c1_24, %c0_25] : memref<3x128xf32, #tpu.memory_space<vmem>>, vector<1x128xf32>
      %55 = vector.broadcast %54 : vector<1x128xf32> to vector<128x128xf32>
      %56 = arith.addf %53, %55 : vector<128x128xf32>
      %cst_26 = arith.constant 0.000000e+00 : f32
      %57 = vector.broadcast %cst_26 : f32 to vector<128x128xf32>
      %58 = arith.maximumf %56, %57 : vector<128x128xf32>
      %59 = arith.truncf %58 : vector<128x128xf32> to vector<128x128xbf16>
      %c0_27 = arith.constant 0 : index
      %c0_28 = arith.constant 0 : index
      %60 = vector.load %arg4[%c0_27, %c0_28] : memref<128x128xbf16, #tpu.memory_space<vmem>>, vector<128x128xbf16>
      %cst_29 = arith.constant dense<0.000000e+00> : vector<128x128xf32>
      %61 = tpu.matmul %59, %60, %cst_29 {dimension_numbers = #tpu.dot_dimension_numbers<[1], [0], [0], [1], [0, 0, 1, 1], [], []>} : vector<128x128xbf16>, vector<128x128xbf16>, vector<128x128xf32> -> vector<128x128xf32>
      %c2 = arith.constant 2 : index
      %c0_30 = arith.constant 0 : index
      %62 = vector.load %arg12[%c2, %c0_30] : memref<3x128xf32, #tpu.memory_space<vmem>>, vector<1x128xf32>
      %63 = vector.broadcast %62 : vector<1x128xf32> to vector<128x128xf32>
      %64 = arith.mulf %61, %63 : vector<128x128xf32>
      %c2_31 = arith.constant 2 : index
      %c0_32 = arith.constant 0 : index
      %65 = vector.load %arg13[%c2_31, %c0_32] : memref<3x128xf32, #tpu.memory_space<vmem>>, vector<1x128xf32>
      %66 = vector.broadcast %65 : vector<1x128xf32> to vector<128x128xf32>
      %67 = arith.addf %64, %66 : vector<128x128xf32>
      %cst_33 = arith.constant 0.000000e+00 : f32
      %68 = vector.broadcast %cst_33 : f32 to vector<128x128xf32>
      %69 = arith.maximumf %67, %68 : vector<128x128xf32>
      %70 = arith.truncf %69 : vector<128x128xf32> to vector<128x128xbf16>
      %c0_34 = arith.constant 0 : index
      %c0_35 = arith.constant 0 : index
      %71 = vector.load %arg5[%c0_34, %c0_35] : memref<128x128xbf16, #tpu.memory_space<vmem>>, vector<128x128xbf16>
      %cst_36 = arith.constant dense<0.000000e+00> : vector<128x128xf32>
      %72 = tpu.matmul %70, %71, %cst_36 {dimension_numbers = #tpu.dot_dimension_numbers<[1], [0], [0], [1], [0, 0, 1, 1], [], []>} : vector<128x128xbf16>, vector<128x128xbf16>, vector<128x128xf32> -> vector<128x128xf32>
      %c0_37 = arith.constant 0 : index
      %c0_38 = arith.constant 0 : index
      %73 = vector.load %arg6[%c0_37, %c0_38] : memref<1x128xf32, #tpu.memory_space<vmem>>, vector<1x128xf32>
      %74 = vector.broadcast %73 : vector<1x128xf32> to vector<128x128xf32>
      %75 = arith.addf %72, %74 : vector<128x128xf32>
      %c0_39 = arith.constant 0 : index
      %c0_40 = arith.constant 0 : index
      %76 = vector.load %arg9[%c0_39, %c0_40] : memref<128x128xf32, #tpu.memory_space<vmem>>, vector<128x128xf32>
      tpu.vector_store %arg9[%c0_39, %c0_40], %75 {strides = array<i32>} : memref<128x128xf32, #tpu.memory_space<vmem>>, vector<128x128xf32>,
    } else {
    }
    return
  }
  func.func @transform_0(%arg0: i32, %arg1: i32) -> (i32, i32) {
    %c0_i32 = arith.constant 0 : i32
    %c0_i32_0 = arith.constant 0 : i32
    return %arg1, %c0_i32 : i32, i32
  }
  func.func @transform_1(%arg0: i32, %arg1: i32) -> (i32, i32) {
    %c0_i32 = arith.constant 0 : i32
    %c0_i32_0 = arith.constant 0 : i32
    %c0_i32_1 = arith.constant 0 : i32
    return %c0_i32, %c0_i32_0 : i32, i32
  }
  func.func @transform_2(%arg0: i32, %arg1: i32) -> (i32, i32) {
    %c0_i32 = arith.constant 0 : i32
    %c0_i32_0 = arith.constant 0 : i32
    %c0_i32_1 = arith.constant 0 : i32
    return %c0_i32, %c0_i32_0 : i32, i32
  }
  func.func @transform_3(%arg0: i32, %arg1: i32) -> (i32, i32) {
    %c0_i32 = arith.constant 0 : i32
    %c0_i32_0 = arith.constant 0 : i32
    %c0_i32_1 = arith.constant 0 : i32
    return %c0_i32, %c0_i32_0 : i32, i32
  }
  func.func @transform_4(%arg0: i32, %arg1: i32) -> (i32, i32) {
    %c0_i32 = arith.constant 0 : i32
    %c0_i32_0 = arith.constant 0 : i32
    %c0_i32_1 = arith.constant 0 : i32
    return %c0_i32, %c0_i32_0 : i32, i32
  }
  func.func @transform_5(%arg0: i32, %arg1: i32) -> (i32, i32) {
    %c0_i32 = arith.constant 0 : i32
    %c0_i32_0 = arith.constant 0 : i32
    %c0_i32_1 = arith.constant 0 : i32
    return %c0_i32, %c0_i32_0 : i32, i32
  }
  func.func @transform_6(%arg0: i32, %arg1: i32) -> (i32, i32) {
    %c0_i32 = arith.constant 0 : i32
    %c0_i32_0 = arith.constant 0 : i32
    %c0_i32_1 = arith.constant 0 : i32
    return %c0_i32, %c0_i32_0 : i32, i32
  }
  func.func @transform_7(%arg0: i32, %arg1: i32) -> (i32, i32) {
    %c3_i32 = arith.constant 3 : i32
    %0 = arith.cmpi eq, %arg0, %c3_i32 : i32
    %c0_i32 = arith.constant 0 : i32
    %1 = arith.select %0, %arg1, %c0_i32 : i32
    %c0_i32_0 = arith.constant 0 : i32
    %c0_i32_1 = arith.constant 0 : i32
    return %1, %c0_i32_0 : i32, i32
  }
}

module attributes {stable_mosaic.version = 11 : i64} {
  func.func @kernel(%arg0: i32, %arg1: i32, %arg2: memref<128x128xbf16, #tpu.memory_space<vmem>>, %arg3: memref<128x128xbf16, #tpu.memory_space<vmem>>, %arg4: memref<128x128xbf16, #tpu.memory_space<vmem>>, %arg5: memref<128x128xbf16, #tpu.memory_space<vmem>>, %arg6: memref<1x128xf32, #tpu.memory_space<vmem>>, %arg7: memref<3x128xf32, #tpu.memory_space<vmem>>, %arg8: memref<3x128xf32, #tpu.memory_space<vmem>>, %arg9: memref<128x128xf32, #tpu.memory_space<vmem>>, %arg10: memref<8x128xf32, #tpu.memory_space<vmem>>, %arg11: memref<8x128xf32, #tpu.memory_space<vmem>>, %arg12: memref<3x128xf32, #tpu.memory_space<vmem>>, %arg13: memref<3x128xf32, #tpu.memory_space<vmem>>) attributes {dimension_semantics = [#tpu.dimension_semantics<arbitrary>, #tpu.dimension_semantics<arbitrary>], iteration_bounds = array<i64: 4, 3>, scalar_prefetch = 0 : i64, scratch_operands = 4 : i64, tpu.core_type = #tpu.core_type<tc>, window_params = [{transform_indices = @transform_0, window_bounds = array<i64: 128, 128>}, {pipeline_mode = #tpu.pipeline_mode<synchronous>, transform_indices = @transform_1, window_bounds = array<i64: 128, 128>}, {pipeline_mode = #tpu.pipeline_mode<synchronous>, transform_indices = @transform_2, window_bounds = array<i64: 128, 128>}, {pipeline_mode = #tpu.pipeline_mode<synchronous>, transform_indices = @transform_3, window_bounds = array<i64: 128, 128>}, {pipeline_mode = #tpu.pipeline_mode<synchronous>, transform_indices = @transform_4, window_bounds = array<i64: 1, 128>}, {pipeline_mode = #tpu.pipeline_mode<synchronous>, transform_indices = @transform_5, window_bounds = array<i64: 3, 128>}, {pipeline_mode = #tpu.pipeline_mode<synchronous>, transform_indices = @transform_6, window_bounds = array<i64: 3, 128>}, {transform_indices = @transform_7, window_bounds = array<i64: 128, 128>}]} {
    %c128_i32 = arith.constant 128 : i32
    %0 = arith.muli %arg1, %c128_i32 : i32
    %1 = tpu.iota {dimensions = array<i32: 0>} : vector<128x1xi32>
    %2 = vector.broadcast %0 : i32 to vector<128x1xi32>
    %3 = arith.addi %2, %1 : vector<128x1xi32>
    %c300_i32 = arith.constant 300 : i32
    %4 = vector.broadcast %c300_i32 : i32 to vector<128x1xi32>
    %5 = arith.cmpi slt, %3, %4 : vector<128x1xi32>
    %6 = arith.extui %5 : vector<128x1xi1> to vector<128x1xi32>
    %7 = arith.sitofp %6 : vector<128x1xi32> to vector<128x1xf32>
    %c0 = arith.constant 0 : index
    %c0_0 = arith.constant 0 : index
    %8 = vector.load %arg2[%c0, %c0_0] : memref<128x128xbf16, #tpu.memory_space<vmem>>, vector<128x128xbf16>
    %c0_i32 = arith.constant 0 : i32
    %9 = arith.cmpi eq, %arg0, %c0_i32 : i32
    %c0_i32_1 = arith.constant 0 : i32
    %10 = arith.cmpi eq, %arg1, %c0_i32_1 : i32
    %11 = arith.andi %9, %10 : i1
    %12 = arith.extui %11 : i1 to i32
    %c0_i32_2 = arith.constant 0 : i32
    %13 = arith.cmpi ne, %12, %c0_i32_2 : i32
    scf.if %13 {
      %cst = arith.constant 0.000000e+00 : f32
      %41 = vector.broadcast %cst : f32 to vector<8x128xf32>
      %c0_17 = arith.constant 0 : index
      %c0_18 = arith.constant 0 : index
      %42 = vector.load %arg10[%c0_17, %c0_18] : memref<8x128xf32, #tpu.memory_space<vmem>>, vector<8x128xf32>
      tpu.vector_store %arg10[%c0_17, %c0_18], %41 {strides = array<i32>} : memref<8x128xf32, #tpu.memory_space<vmem>>, vector<8x128xf32>,
      %cst_19 = arith.constant 0.000000e+00 : f32
      %43 = vector.broadcast %cst_19 : f32 to vector<8x128xf32>
      %c0_20 = arith.constant 0 : index
      %c0_21 = arith.constant 0 : index
      %44 = vector.load %arg11[%c0_20, %c0_21] : memref<8x128xf32, #tpu.memory_space<vmem>>, vector<8x128xf32>
      tpu.vector_store %arg11[%c0_20, %c0_21], %43 {strides = array<i32>} : memref<8x128xf32, #tpu.memory_space<vmem>>, vector<8x128xf32>,
    } else {
    }
    %c0_i32_3 = arith.constant 0 : i32
    %14 = arith.cmpi eq, %arg0, %c0_i32_3 : i32
    %15 = arith.extui %14 : i1 to i32
    %c0_i32_4 = arith.constant 0 : i32
    %16 = arith.cmpi ne, %15, %c0_i32_4 : i32
    scf.if %16 {
      %41 = arith.extf %8 : vector<128x128xbf16> to vector<128x128xf32>
      %42 = vector.broadcast %7 : vector<128x1xf32> to vector<128x128xf32>
      %43 = arith.mulf %41, %42 : vector<128x128xf32>
      %c0_17 = arith.constant 0 : index
      %c0_18 = arith.constant 0 : index
      %44 = vector.load %arg10[%c0_17, %c0_18] : memref<8x128xf32, #tpu.memory_space<vmem>>, vector<8x128xf32>
      %45 = vector.shape_cast %43 : vector<128x128xf32> to vector<16x8x128xf32>
      %cst = arith.constant dense<0.000000e+00> : vector<8x128xf32>
      %46 = vector.multi_reduction <add>, %45, %cst [0] : vector<16x8x128xf32> to vector<8x128xf32>
      %47 = arith.addf %44, %46 : vector<8x128xf32>
      %c0_19 = arith.constant 0 : index
      %c0_20 = arith.constant 0 : index
      %48 = vector.load %arg10[%c0_19, %c0_20] : memref<8x128xf32, #tpu.memory_space<vmem>>, vector<8x128xf32>
      tpu.vector_store %arg10[%c0_19, %c0_20], %47 {strides = array<i32>} : memref<8x128xf32, #tpu.memory_space<vmem>>, vector<8x128xf32>,
      %c0_21 = arith.constant 0 : index
      %c0_22 = arith.constant 0 : index
      %49 = vector.load %arg11[%c0_21, %c0_22] : memref<8x128xf32, #tpu.memory_space<vmem>>, vector<8x128xf32>
      %50 = arith.mulf %43, %41 : vector<128x128xf32>
      %51 = vector.shape_cast %50 : vector<128x128xf32> to vector<16x8x128xf32>
      %cst_23 = arith.constant dense<0.000000e+00> : vector<8x128xf32>
      %52 = vector.multi_reduction <add>, %51, %cst_23 [0] : vector<16x8x128xf32> to vector<8x128xf32>
      %53 = arith.addf %49, %52 : vector<8x128xf32>
      %c0_24 = arith.constant 0 : index
      %c0_25 = arith.constant 0 : index
      %54 = vector.load %arg11[%c0_24, %c0_25] : memref<8x128xf32, #tpu.memory_space<vmem>>, vector<8x128xf32>
      tpu.vector_store %arg11[%c0_24, %c0_25], %53 {strides = array<i32>} : memref<8x128xf32, #tpu.memory_space<vmem>>, vector<8x128xf32>,
    } else {
    }
    %c1_i32 = arith.constant 1 : i32
    %17 = arith.cmpi eq, %arg0, %c1_i32 : i32
    %c0_i32_5 = arith.constant 0 : i32
    %18 = arith.cmpi eq, %arg1, %c0_i32_5 : i32
    %19 = arith.andi %17, %18 : i1
    %20 = arith.extui %19 : i1 to i32
    %c0_i32_6 = arith.constant 0 : i32
    %21 = arith.cmpi ne, %20, %c0_i32_6 : i32
    scf.if %21 {
      %c0_17 = arith.constant 0 : index
      %c0_18 = arith.constant 0 : index
      %41 = vector.load %arg10[%c0_17, %c0_18] : memref<8x128xf32, #tpu.memory_space<vmem>>, vector<8x128xf32>
      %cst = arith.constant dense<0.000000e+00> : vector<128xf32>
      %42 = vector.multi_reduction <add>, %41, %cst [0] : vector<8x128xf32> to vector<128xf32>
      %43 = vector.shape_cast %42 : vector<128xf32> to vector<1x128xf32>
      %cst_19 = arith.constant 0.00333333341 : f32
      %44 = vector.broadcast %cst_19 : f32 to vector<1x128xf32>
      %45 = arith.mulf %43, %44 : vector<1x128xf32>
      %c0_20 = arith.constant 0 : index
      %c0_21 = arith.constant 0 : index
      %46 = vector.load %arg11[%c0_20, %c0_21] : memref<8x128xf32, #tpu.memory_space<vmem>>, vector<8x128xf32>
      %cst_22 = arith.constant dense<0.000000e+00> : vector<128xf32>
      %47 = vector.multi_reduction <add>, %46, %cst_22 [0] : vector<8x128xf32> to vector<128xf32>
      %48 = vector.shape_cast %47 : vector<128xf32> to vector<1x128xf32>
      %cst_23 = arith.constant 0.00333333341 : f32
      %49 = vector.broadcast %cst_23 : f32 to vector<1x128xf32>
      %50 = arith.mulf %48, %49 : vector<1x128xf32>
      %51 = arith.mulf %45, %45 : vector<1x128xf32>
      %52 = arith.subf %50, %51 : vector<1x128xf32>
      %cst_24 = arith.constant 0.000000e+00 : f32
      %53 = vector.broadcast %cst_24 : f32 to vector<1x128xf32>
      %54 = arith.maximumf %52, %53 : vector<1x128xf32>
      %c0_25 = arith.constant 0 : index
      %c0_26 = arith.constant 0 : index
      %55 = vector.load %arg7[%c0_25, %c0_26] : memref<3x128xf32, #tpu.memory_space<vmem>>, vector<1x128xf32>
      %cst_27 = arith.constant 9.99999974E-6 : f32
      %56 = vector.broadcast %cst_27 : f32 to vector<1x128xf32>
      %57 = arith.addf %54, %56 : vector<1x128xf32>
      %58 = math.rsqrt %57 : vector<1x128xf32>
      %59 = arith.mulf %55, %58 : vector<1x128xf32>
      %c0_28 = arith.constant 0 : index
      %c0_29 = arith.constant 0 : index
      %60 = vector.load %arg12[%c0_28, %c0_29] : memref<3x128xf32, #tpu.memory_space<vmem>>, vector<1x128xf32>
      tpu.vector_store %arg12[%c0_28, %c0_29], %59 {strides = array<i32>} : memref<3x128xf32, #tpu.memory_space<vmem>>, vector<1x128xf32>,
      %c0_30 = arith.constant 0 : index
      %c0_31 = arith.constant 0 : index
      %61 = vector.load %arg8[%c0_30, %c0_31] : memref<3x128xf32, #tpu.memory_space<vmem>>, vector<1x128xf32>
      %62 = arith.mulf %45, %59 : vector<1x128xf32>
      %63 = arith.subf %61, %62 : vector<1x128xf32>
      %c0_32 = arith.constant 0 : index
      %c0_33 = arith.constant 0 : index
      %64 = vector.load %arg13[%c0_32, %c0_33] : memref<3x128xf32, #tpu.memory_space<vmem>>, vector<1x128xf32>
      tpu.vector_store %arg13[%c0_32, %c0_33], %63 {strides = array<i32>} : memref<3x128xf32, #tpu.memory_space<vmem>>, vector<1x128xf32>,
      %cst_34 = arith.constant 0.000000e+00 : f32
      %65 = vector.broadcast %cst_34 : f32 to vector<8x128xf32>
      %c0_35 = arith.constant 0 : index
      %c0_36 = arith.constant 0 : index
      %66 = vector.load %arg10[%c0_35, %c0_36] : memref<8x128xf32, #tpu.memory_space<vmem>>, vector<8x128xf32>
      tpu.vector_store %arg10[%c0_35, %c0_36], %65 {strides = array<i32>} : memref<8x128xf32, #tpu.memory_space<vmem>>, vector<8x128xf32>,
      %cst_37 = arith.constant 0.000000e+00 : f32
      %67 = vector.broadcast %cst_37 : f32 to vector<8x128xf32>
      %c0_38 = arith.constant 0 : index
      %c0_39 = arith.constant 0 : index
      %68 = vector.load %arg11[%c0_38, %c0_39] : memref<8x128xf32, #tpu.memory_space<vmem>>, vector<8x128xf32>
      tpu.vector_store %arg11[%c0_38, %c0_39], %67 {strides = array<i32>} : memref<8x128xf32, #tpu.memory_space<vmem>>, vector<8x128xf32>,
    } else {
    }
    %c1_i32_7 = arith.constant 1 : i32
    %22 = arith.cmpi eq, %arg0, %c1_i32_7 : i32
    %23 = arith.extui %22 : i1 to i32
    %c0_i32_8 = arith.constant 0 : i32
    %24 = arith.cmpi ne, %23, %c0_i32_8 : i32
    scf.if %24 {
      %c0_17 = arith.constant 0 : index
      %c0_18 = arith.constant 0 : index
      %41 = vector.load %arg12[%c0_17, %c0_18] : memref<3x128xf32, #tpu.memory_space<vmem>>, vector<1x128xf32>
      %42 = arith.extf %8 : vector<128x128xbf16> to vector<128x128xf32>
      %43 = vector.broadcast %41 : vector<1x128xf32> to vector<128x128xf32>
      %44 = arith.mulf %42, %43 : vector<128x128xf32>
      %c0_19 = arith.constant 0 : index
      %c0_20 = arith.constant 0 : index
      %45 = vector.load %arg13[%c0_19, %c0_20] : memref<3x128xf32, #tpu.memory_space<vmem>>, vector<1x128xf32>
      %46 = vector.broadcast %45 : vector<1x128xf32> to vector<128x128xf32>
      %47 = arith.addf %44, %46 : vector<128x128xf32>
      %48 = arith.truncf %47 : vector<128x128xf32> to vector<128x128xbf16>
      %c0_21 = arith.constant 0 : index
      %c0_22 = arith.constant 0 : index
      %49 = vector.load %arg3[%c0_21, %c0_22] : memref<128x128xbf16, #tpu.memory_space<vmem>>, vector<128x128xbf16>
      %cst = arith.constant dense<0.000000e+00> : vector<128x128xf32>
      %50 = tpu.matmul %48, %49, %cst {dimension_numbers = #tpu.dot_dimension_numbers<[1], [0], [0], [1], [0, 0, 1, 1], [], []>} : vector<128x128xbf16>, vector<128x128xbf16>, vector<128x128xf32> -> vector<128x128xf32>
      %51 = vector.broadcast %7 : vector<128x1xf32> to vector<128x128xf32>
      %52 = arith.mulf %50, %51 : vector<128x128xf32>
      %c0_23 = arith.constant 0 : index
      %c0_24 = arith.constant 0 : index
      %53 = vector.load %arg10[%c0_23, %c0_24] : memref<8x128xf32, #tpu.memory_space<vmem>>, vector<8x128xf32>
      %54 = vector.shape_cast %52 : vector<128x128xf32> to vector<16x8x128xf32>
      %cst_25 = arith.constant dense<0.000000e+00> : vector<8x128xf32>
      %55 = vector.multi_reduction <add>, %54, %cst_25 [0] : vector<16x8x128xf32> to vector<8x128xf32>
      %56 = arith.addf %53, %55 : vector<8x128xf32>
      %c0_26 = arith.constant 0 : index
      %c0_27 = arith.constant 0 : index
      %57 = vector.load %arg10[%c0_26, %c0_27] : memref<8x128xf32, #tpu.memory_space<vmem>>, vector<8x128xf32>
      tpu.vector_store %arg10[%c0_26, %c0_27], %56 {strides = array<i32>} : memref<8x128xf32, #tpu.memory_space<vmem>>, vector<8x128xf32>,
      %c0_28 = arith.constant 0 : index
      %c0_29 = arith.constant 0 : index
      %58 = vector.load %arg11[%c0_28, %c0_29] : memref<8x128xf32, #tpu.memory_space<vmem>>, vector<8x128xf32>
      %59 = arith.mulf %52, %50 : vector<128x128xf32>
      %60 = vector.shape_cast %59 : vector<128x128xf32> to vector<16x8x128xf32>
      %cst_30 = arith.constant dense<0.000000e+00> : vector<8x128xf32>
      %61 = vector.multi_reduction <add>, %60, %cst_30 [0] : vector<16x8x128xf32> to vector<8x128xf32>
      %62 = arith.addf %58, %61 : vector<8x128xf32>
      %c0_31 = arith.constant 0 : index
      %c0_32 = arith.constant 0 : index
      %63 = vector.load %arg11[%c0_31, %c0_32] : memref<8x128xf32, #tpu.memory_space<vmem>>, vector<8x128xf32>
      tpu.vector_store %arg11[%c0_31, %c0_32], %62 {strides = array<i32>} : memref<8x128xf32, #tpu.memory_space<vmem>>, vector<8x128xf32>,
    } else {
    }
    %c2_i32 = arith.constant 2 : i32
    %25 = arith.cmpi eq, %arg0, %c2_i32 : i32
    %c0_i32_9 = arith.constant 0 : i32
    %26 = arith.cmpi eq, %arg1, %c0_i32_9 : i32
    %27 = arith.andi %25, %26 : i1
    %28 = arith.extui %27 : i1 to i32
    %c0_i32_10 = arith.constant 0 : i32
    %29 = arith.cmpi ne, %28, %c0_i32_10 : i32
    scf.if %29 {
      %c0_17 = arith.constant 0 : index
      %c0_18 = arith.constant 0 : index
      %41 = vector.load %arg10[%c0_17, %c0_18] : memref<8x128xf32, #tpu.memory_space<vmem>>, vector<8x128xf32>
      %cst = arith.constant dense<0.000000e+00> : vector<128xf32>
      %42 = vector.multi_reduction <add>, %41, %cst [0] : vector<8x128xf32> to vector<128xf32>
      %43 = vector.shape_cast %42 : vector<128xf32> to vector<1x128xf32>
      %cst_19 = arith.constant 0.00333333341 : f32
      %44 = vector.broadcast %cst_19 : f32 to vector<1x128xf32>
      %45 = arith.mulf %43, %44 : vector<1x128xf32>
      %c0_20 = arith.constant 0 : index
      %c0_21 = arith.constant 0 : index
      %46 = vector.load %arg11[%c0_20, %c0_21] : memref<8x128xf32, #tpu.memory_space<vmem>>, vector<8x128xf32>
      %cst_22 = arith.constant dense<0.000000e+00> : vector<128xf32>
      %47 = vector.multi_reduction <add>, %46, %cst_22 [0] : vector<8x128xf32> to vector<128xf32>
      %48 = vector.shape_cast %47 : vector<128xf32> to vector<1x128xf32>
      %cst_23 = arith.constant 0.00333333341 : f32
      %49 = vector.broadcast %cst_23 : f32 to vector<1x128xf32>
      %50 = arith.mulf %48, %49 : vector<1x128xf32>
      %51 = arith.mulf %45, %45 : vector<1x128xf32>
      %52 = arith.subf %50, %51 : vector<1x128xf32>
      %cst_24 = arith.constant 0.000000e+00 : f32
      %53 = vector.broadcast %cst_24 : f32 to vector<1x128xf32>
      %54 = arith.maximumf %52, %53 : vector<1x128xf32>
      %c1 = arith.constant 1 : index
      %c0_25 = arith.constant 0 : index
      %55 = vector.load %arg7[%c1, %c0_25] : memref<3x128xf32, #tpu.memory_space<vmem>>, vector<1x128xf32>
      %cst_26 = arith.constant 9.99999974E-6 : f32
      %56 = vector.broadcast %cst_26 : f32 to vector<1x128xf32>
      %57 = arith.addf %54, %56 : vector<1x128xf32>
      %58 = math.rsqrt %57 : vector<1x128xf32>
      %59 = arith.mulf %55, %58 : vector<1x128xf32>
      %c1_27 = arith.constant 1 : index
      %c0_28 = arith.constant 0 : index
      %60 = vector.load %arg12[%c1_27, %c0_28] : memref<3x128xf32, #tpu.memory_space<vmem>>, vector<1x128xf32>
      tpu.vector_store %arg12[%c1_27, %c0_28], %59 {strides = array<i32>} : memref<3x128xf32, #tpu.memory_space<vmem>>, vector<1x128xf32>,
      %c1_29 = arith.constant 1 : index
      %c0_30 = arith.constant 0 : index
      %61 = vector.load %arg8[%c1_29, %c0_30] : memref<3x128xf32, #tpu.memory_space<vmem>>, vector<1x128xf32>
      %62 = arith.mulf %45, %59 : vector<1x128xf32>
      %63 = arith.subf %61, %62 : vector<1x128xf32>
      %c1_31 = arith.constant 1 : index
      %c0_32 = arith.constant 0 : index
      %64 = vector.load %arg13[%c1_31, %c0_32] : memref<3x128xf32, #tpu.memory_space<vmem>>, vector<1x128xf32>
      tpu.vector_store %arg13[%c1_31, %c0_32], %63 {strides = array<i32>} : memref<3x128xf32, #tpu.memory_space<vmem>>, vector<1x128xf32>,
      %cst_33 = arith.constant 0.000000e+00 : f32
      %65 = vector.broadcast %cst_33 : f32 to vector<8x128xf32>
      %c0_34 = arith.constant 0 : index
      %c0_35 = arith.constant 0 : index
      %66 = vector.load %arg10[%c0_34, %c0_35] : memref<8x128xf32, #tpu.memory_space<vmem>>, vector<8x128xf32>
      tpu.vector_store %arg10[%c0_34, %c0_35], %65 {strides = array<i32>} : memref<8x128xf32, #tpu.memory_space<vmem>>, vector<8x128xf32>,
      %cst_36 = arith.constant 0.000000e+00 : f32
      %67 = vector.broadcast %cst_36 : f32 to vector<8x128xf32>
      %c0_37 = arith.constant 0 : index
      %c0_38 = arith.constant 0 : index
      %68 = vector.load %arg11[%c0_37, %c0_38] : memref<8x128xf32, #tpu.memory_space<vmem>>, vector<8x128xf32>
      tpu.vector_store %arg11[%c0_37, %c0_38], %67 {strides = array<i32>} : memref<8x128xf32, #tpu.memory_space<vmem>>, vector<8x128xf32>,
    } else {
    }
    %c2_i32_11 = arith.constant 2 : i32
    %30 = arith.cmpi eq, %arg0, %c2_i32_11 : i32
    %31 = arith.extui %30 : i1 to i32
    %c0_i32_12 = arith.constant 0 : i32
    %32 = arith.cmpi ne, %31, %c0_i32_12 : i32
    scf.if %32 {
      %c0_17 = arith.constant 0 : index
      %c0_18 = arith.constant 0 : index
      %41 = vector.load %arg12[%c0_17, %c0_18] : memref<3x128xf32, #tpu.memory_space<vmem>>, vector<1x128xf32>
      %42 = arith.extf %8 : vector<128x128xbf16> to vector<128x128xf32>
      %43 = vector.broadcast %41 : vector<1x128xf32> to vector<128x128xf32>
      %44 = arith.mulf %42, %43 : vector<128x128xf32>
      %c0_19 = arith.constant 0 : index
      %c0_20 = arith.constant 0 : index
      %45 = vector.load %arg13[%c0_19, %c0_20] : memref<3x128xf32, #tpu.memory_space<vmem>>, vector<1x128xf32>
      %46 = vector.broadcast %45 : vector<1x128xf32> to vector<128x128xf32>
      %47 = arith.addf %44, %46 : vector<128x128xf32>
      %48 = arith.truncf %47 : vector<128x128xf32> to vector<128x128xbf16>
      %c0_21 = arith.constant 0 : index
      %c0_22 = arith.constant 0 : index
      %49 = vector.load %arg3[%c0_21, %c0_22] : memref<128x128xbf16, #tpu.memory_space<vmem>>, vector<128x128xbf16>
      %cst = arith.constant dense<0.000000e+00> : vector<128x128xf32>
      %50 = tpu.matmul %48, %49, %cst {dimension_numbers = #tpu.dot_dimension_numbers<[1], [0], [0], [1], [0, 0, 1, 1], [], []>} : vector<128x128xbf16>, vector<128x128xbf16>, vector<128x128xf32> -> vector<128x128xf32>
      %c1 = arith.constant 1 : index
      %c0_23 = arith.constant 0 : index
      %51 = vector.load %arg12[%c1, %c0_23] : memref<3x128xf32, #tpu.memory_space<vmem>>, vector<1x128xf32>
      %52 = vector.broadcast %51 : vector<1x128xf32> to vector<128x128xf32>
      %53 = arith.mulf %50, %52 : vector<128x128xf32>
      %c1_24 = arith.constant 1 : index
      %c0_25 = arith.constant 0 : index
      %54 = vector.load %arg13[%c1_24, %c0_25] : memref<3x128xf32, #tpu.memory_space<vmem>>, vector<1x128xf32>
      %55 = vector.broadcast %54 : vector<1x128xf32> to vector<128x128xf32>
      %56 = arith.addf %53, %55 : vector<128x128xf32>
      %cst_26 = arith.constant 0.000000e+00 : f32
      %57 = vector.broadcast %cst_26 : f32 to vector<128x128xf32>
      %58 = arith.maximumf %56, %57 : vector<128x128xf32>
      %59 = arith.truncf %58 : vector<128x128xf32> to vector<128x128xbf16>
      %c0_27 = arith.constant 0 : index
      %c0_28 = arith.constant 0 : index
      %60 = vector.load %arg4[%c0_27, %c0_28] : memref<128x128xbf16, #tpu.memory_space<vmem>>, vector<128x128xbf16>
      %cst_29 = arith.constant dense<0.000000e+00> : vector<128x128xf32>
      %61 = tpu.matmul %59, %60, %cst_29 {dimension_numbers = #tpu.dot_dimension_numbers<[1], [0], [0], [1], [0, 0, 1, 1], [], []>} : vector<128x128xbf16>, vector<128x128xbf16>, vector<128x128xf32> -> vector<128x128xf32>
      %62 = vector.broadcast %7 : vector<128x1xf32> to vector<128x128xf32>
      %63 = arith.mulf %61, %62 : vector<128x128xf32>
      %c0_30 = arith.constant 0 : index
      %c0_31 = arith.constant 0 : index
      %64 = vector.load %arg10[%c0_30, %c0_31] : memref<8x128xf32, #tpu.memory_space<vmem>>, vector<8x128xf32>
      %65 = vector.shape_cast %63 : vector<128x128xf32> to vector<16x8x128xf32>
      %cst_32 = arith.constant dense<0.000000e+00> : vector<8x128xf32>
      %66 = vector.multi_reduction <add>, %65, %cst_32 [0] : vector<16x8x128xf32> to vector<8x128xf32>
      %67 = arith.addf %64, %66 : vector<8x128xf32>
      %c0_33 = arith.constant 0 : index
      %c0_34 = arith.constant 0 : index
      %68 = vector.load %arg10[%c0_33, %c0_34] : memref<8x128xf32, #tpu.memory_space<vmem>>, vector<8x128xf32>
      tpu.vector_store %arg10[%c0_33, %c0_34], %67 {strides = array<i32>} : memref<8x128xf32, #tpu.memory_space<vmem>>, vector<8x128xf32>,
      %c0_35 = arith.constant 0 : index
      %c0_36 = arith.constant 0 : index
      %69 = vector.load %arg11[%c0_35, %c0_36] : memref<8x128xf32, #tpu.memory_space<vmem>>, vector<8x128xf32>
      %70 = arith.mulf %63, %61 : vector<128x128xf32>
      %71 = vector.shape_cast %70 : vector<128x128xf32> to vector<16x8x128xf32>
      %cst_37 = arith.constant dense<0.000000e+00> : vector<8x128xf32>
      %72 = vector.multi_reduction <add>, %71, %cst_37 [0] : vector<16x8x128xf32> to vector<8x128xf32>
      %73 = arith.addf %69, %72 : vector<8x128xf32>
      %c0_38 = arith.constant 0 : index
      %c0_39 = arith.constant 0 : index
      %74 = vector.load %arg11[%c0_38, %c0_39] : memref<8x128xf32, #tpu.memory_space<vmem>>, vector<8x128xf32>
      tpu.vector_store %arg11[%c0_38, %c0_39], %73 {strides = array<i32>} : memref<8x128xf32, #tpu.memory_space<vmem>>, vector<8x128xf32>,
    } else {
    }
    %c3_i32 = arith.constant 3 : i32
    %33 = arith.cmpi eq, %arg0, %c3_i32 : i32
    %c0_i32_13 = arith.constant 0 : i32
    %34 = arith.cmpi eq, %arg1, %c0_i32_13 : i32
    %35 = arith.andi %33, %34 : i1
    %36 = arith.extui %35 : i1 to i32
    %c0_i32_14 = arith.constant 0 : i32
    %37 = arith.cmpi ne, %36, %c0_i32_14 : i32
    scf.if %37 {
      %c0_17 = arith.constant 0 : index
      %c0_18 = arith.constant 0 : index
      %41 = vector.load %arg10[%c0_17, %c0_18] : memref<8x128xf32, #tpu.memory_space<vmem>>, vector<8x128xf32>
      %cst = arith.constant dense<0.000000e+00> : vector<128xf32>
      %42 = vector.multi_reduction <add>, %41, %cst [0] : vector<8x128xf32> to vector<128xf32>
      %43 = vector.shape_cast %42 : vector<128xf32> to vector<1x128xf32>
      %cst_19 = arith.constant 0.00333333341 : f32
      %44 = vector.broadcast %cst_19 : f32 to vector<1x128xf32>
      %45 = arith.mulf %43, %44 : vector<1x128xf32>
      %c0_20 = arith.constant 0 : index
      %c0_21 = arith.constant 0 : index
      %46 = vector.load %arg11[%c0_20, %c0_21] : memref<8x128xf32, #tpu.memory_space<vmem>>, vector<8x128xf32>
      %cst_22 = arith.constant dense<0.000000e+00> : vector<128xf32>
      %47 = vector.multi_reduction <add>, %46, %cst_22 [0] : vector<8x128xf32> to vector<128xf32>
      %48 = vector.shape_cast %47 : vector<128xf32> to vector<1x128xf32>
      %cst_23 = arith.constant 0.00333333341 : f32
      %49 = vector.broadcast %cst_23 : f32 to vector<1x128xf32>
      %50 = arith.mulf %48, %49 : vector<1x128xf32>
      %51 = arith.mulf %45, %45 : vector<1x128xf32>
      %52 = arith.subf %50, %51 : vector<1x128xf32>
      %cst_24 = arith.constant 0.000000e+00 : f32
      %53 = vector.broadcast %cst_24 : f32 to vector<1x128xf32>
      %54 = arith.maximumf %52, %53 : vector<1x128xf32>
      %c2 = arith.constant 2 : index
      %c0_25 = arith.constant 0 : index
      %55 = vector.load %arg7[%c2, %c0_25] : memref<3x128xf32, #tpu.memory_space<vmem>>, vector<1x128xf32>
      %cst_26 = arith.constant 9.99999974E-6 : f32
      %56 = vector.broadcast %cst_26 : f32 to vector<1x128xf32>
      %57 = arith.addf %54, %56 : vector<1x128xf32>
      %58 = math.rsqrt %57 : vector<1x128xf32>
      %59 = arith.mulf %55, %58 : vector<1x128xf32>
      %c2_27 = arith.constant 2 : index
      %c0_28 = arith.constant 0 : index
      %60 = vector.load %arg12[%c2_27, %c0_28] : memref<3x128xf32, #tpu.memory_space<vmem>>, vector<1x128xf32>
      tpu.vector_store %arg12[%c2_27, %c0_28], %59 {strides = array<i32>} : memref<3x128xf32, #tpu.memory_space<vmem>>, vector<1x128xf32>,
      %c2_29 = arith.constant 2 : index
      %c0_30 = arith.constant 0 : index
      %61 = vector.load %arg8[%c2_29, %c0_30] : memref<3x128xf32, #tpu.memory_space<vmem>>, vector<1x128xf32>
      %62 = arith.mulf %45, %59 : vector<1x128xf32>
      %63 = arith.subf %61, %62 : vector<1x128xf32>
      %c2_31 = arith.constant 2 : index
      %c0_32 = arith.constant 0 : index
      %64 = vector.load %arg13[%c2_31, %c0_32] : memref<3x128xf32, #tpu.memory_space<vmem>>, vector<1x128xf32>
      tpu.vector_store %arg13[%c2_31, %c0_32], %63 {strides = array<i32>} : memref<3x128xf32, #tpu.memory_space<vmem>>, vector<1x128xf32>,
    } else {
    }
    %c3_i32_15 = arith.constant 3 : i32
    %38 = arith.cmpi eq, %arg0, %c3_i32_15 : i32
    %39 = arith.extui %38 : i1 to i32
    %c0_i32_16 = arith.constant 0 : i32
    %40 = arith.cmpi ne, %39, %c0_i32_16 : i32
    scf.if %40 {
      %c0_17 = arith.constant 0 : index
      %c0_18 = arith.constant 0 : index
      %41 = vector.load %arg12[%c0_17, %c0_18] : memref<3x128xf32, #tpu.memory_space<vmem>>, vector<1x128xf32>
      %42 = arith.extf %8 : vector<128x128xbf16> to vector<128x128xf32>
      %43 = vector.broadcast %41 : vector<1x128xf32> to vector<128x128xf32>
      %44 = arith.mulf %42, %43 : vector<128x128xf32>
      %c0_19 = arith.constant 0 : index
      %c0_20 = arith.constant 0 : index
      %45 = vector.load %arg13[%c0_19, %c0_20] : memref<3x128xf32, #tpu.memory_space<vmem>>, vector<1x128xf32>
      %46 = vector.broadcast %45 : vector<1x128xf32> to vector<128x128xf32>
      %47 = arith.addf %44, %46 : vector<128x128xf32>
      %48 = arith.truncf %47 : vector<128x128xf32> to vector<128x128xbf16>
      %c0_21 = arith.constant 0 : index
      %c0_22 = arith.constant 0 : index
      %49 = vector.load %arg3[%c0_21, %c0_22] : memref<128x128xbf16, #tpu.memory_space<vmem>>, vector<128x128xbf16>
      %cst = arith.constant dense<0.000000e+00> : vector<128x128xf32>
      %50 = tpu.matmul %48, %49, %cst {dimension_numbers = #tpu.dot_dimension_numbers<[1], [0], [0], [1], [0, 0, 1, 1], [], []>} : vector<128x128xbf16>, vector<128x128xbf16>, vector<128x128xf32> -> vector<128x128xf32>
      %c1 = arith.constant 1 : index
      %c0_23 = arith.constant 0 : index
      %51 = vector.load %arg12[%c1, %c0_23] : memref<3x128xf32, #tpu.memory_space<vmem>>, vector<1x128xf32>
      %52 = vector.broadcast %51 : vector<1x128xf32> to vector<128x128xf32>
      %53 = arith.mulf %50, %52 : vector<128x128xf32>
      %c1_24 = arith.constant 1 : index
      %c0_25 = arith.constant 0 : index
      %54 = vector.load %arg13[%c1_24, %c0_25] : memref<3x128xf32, #tpu.memory_space<vmem>>, vector<1x128xf32>
      %55 = vector.broadcast %54 : vector<1x128xf32> to vector<128x128xf32>
      %56 = arith.addf %53, %55 : vector<128x128xf32>
      %cst_26 = arith.constant 0.000000e+00 : f32
      %57 = vector.broadcast %cst_26 : f32 to vector<128x128xf32>
      %58 = arith.maximumf %56, %57 : vector<128x128xf32>
      %59 = arith.truncf %58 : vector<128x128xf32> to vector<128x128xbf16>
      %c0_27 = arith.constant 0 : index
      %c0_28 = arith.constant 0 : index
      %60 = vector.load %arg4[%c0_27, %c0_28] : memref<128x128xbf16, #tpu.memory_space<vmem>>, vector<128x128xbf16>
      %cst_29 = arith.constant dense<0.000000e+00> : vector<128x128xf32>
      %61 = tpu.matmul %59, %60, %cst_29 {dimension_numbers = #tpu.dot_dimension_numbers<[1], [0], [0], [1], [0, 0, 1, 1], [], []>} : vector<128x128xbf16>, vector<128x128xbf16>, vector<128x128xf32> -> vector<128x128xf32>
      %c2 = arith.constant 2 : index
      %c0_30 = arith.constant 0 : index
      %62 = vector.load %arg12[%c2, %c0_30] : memref<3x128xf32, #tpu.memory_space<vmem>>, vector<1x128xf32>
      %63 = vector.broadcast %62 : vector<1x128xf32> to vector<128x128xf32>
      %64 = arith.mulf %61, %63 : vector<128x128xf32>
      %c2_31 = arith.constant 2 : index
      %c0_32 = arith.constant 0 : index
      %65 = vector.load %arg13[%c2_31, %c0_32] : memref<3x128xf32, #tpu.memory_space<vmem>>, vector<1x128xf32>
      %66 = vector.broadcast %65 : vector<1x128xf32> to vector<128x128xf32>
      %67 = arith.addf %64, %66 : vector<128x128xf32>
      %cst_33 = arith.constant 0.000000e+00 : f32
      %68 = vector.broadcast %cst_33 : f32 to vector<128x128xf32>
      %69 = arith.maximumf %67, %68 : vector<128x128xf32>
      %70 = arith.truncf %69 : vector<128x128xf32> to vector<128x128xbf16>
      %c0_34 = arith.constant 0 : index
      %c0_35 = arith.constant 0 : index
      %71 = vector.load %arg5[%c0_34, %c0_35] : memref<128x128xbf16, #tpu.memory_space<vmem>>, vector<128x128xbf16>
      %cst_36 = arith.constant dense<0.000000e+00> : vector<128x128xf32>
      %72 = tpu.matmul %70, %71, %cst_36 {dimension_numbers = #tpu.dot_dimension_numbers<[1], [0], [0], [1], [0, 0, 1, 1], [], []>} : vector<128x128xbf16>, vector<128x128xbf16>, vector<128x128xf32> -> vector<128x128xf32>
      %c0_37 = arith.constant 0 : index
      %c0_38 = arith.constant 0 : index
      %73 = vector.load %arg6[%c0_37, %c0_38] : memref<1x128xf32, #tpu.memory_space<vmem>>, vector<1x128xf32>
      %74 = vector.broadcast %73 : vector<1x128xf32> to vector<128x128xf32>
      %75 = arith.addf %72, %74 : vector<128x128xf32>
      %c0_39 = arith.constant 0 : index
      %c0_40 = arith.constant 0 : index
      %76 = vector.load %arg9[%c0_39, %c0_40] : memref<128x128xf32, #tpu.memory_space<vmem>>, vector<128x128xf32>
      tpu.vector_store %arg9[%c0_39, %c0_40], %75 {strides = array<i32>} : memref<128x128xf32, #tpu.memory_space<vmem>>, vector<128x128xf32>,
    } else {
    }
    return
  }
  func.func @transform_0(%arg0: i32, %arg1: i32) -> (i32, i32) {
    %c0_i32 = arith.constant 0 : i32
    %c0_i32_0 = arith.constant 0 : i32
    return %arg1, %c0_i32 : i32, i32
  }
  func.func @transform_1(%arg0: i32, %arg1: i32) -> (i32, i32) {
    %c0_i32 = arith.constant 0 : i32
    %c0_i32_0 = arith.constant 0 : i32
    %c0_i32_1 = arith.constant 0 : i32
    return %c0_i32, %c0_i32_0 : i32, i32
  }
  func.func @transform_2(%arg0: i32, %arg1: i32) -> (i32, i32) {
    %c0_i32 = arith.constant 0 : i32
    %c0_i32_0 = arith.constant 0 : i32
    %c0_i32_1 = arith.constant 0 : i32
    return %c0_i32, %c0_i32_0 : i32, i32
  }
  func.func @transform_3(%arg0: i32, %arg1: i32) -> (i32, i32) {
    %c0_i32 = arith.constant 0 : i32
    %c0_i32_0 = arith.constant 0 : i32
    %c0_i32_1 = arith.constant 0 : i32
    return %c0_i32, %c0_i32_0 : i32, i32
  }
  func.func @transform_4(%arg0: i32, %arg1: i32) -> (i32, i32) {
    %c0_i32 = arith.constant 0 : i32
    %c0_i32_0 = arith.constant 0 : i32
    %c0_i32_1 = arith.constant 0 : i32
    return %c0_i32, %c0_i32_0 : i32, i32
  }
  func.func @transform_5(%arg0: i32, %arg1: i32) -> (i32, i32) {
    %c0_i32 = arith.constant 0 : i32
    %c0_i32_0 = arith.constant 0 : i32
    %c0_i32_1 = arith.constant 0 : i32
    return %c0_i32, %c0_i32_0 : i32, i32
  }
  func.func @transform_6(%arg0: i32, %arg1: i32) -> (i32, i32) {
    %c0_i32 = arith.constant 0 : i32
    %c0_i32_0 = arith.constant 0 : i32
    %c0_i32_1 = arith.constant 0 : i32
    return %c0_i32, %c0_i32_0 : i32, i32
  }
  func.func @transform_7(%arg0: i32, %arg1: i32) -> (i32, i32) {
    %c3_i32 = arith.constant 3 : i32
    %0 = arith.cmpi eq, %arg0, %c3_i32 : i32
    %c0_i32 = arith.constant 0 : i32
    %1 = arith.select %0, %arg1, %c0_i32 : i32
    %c0_i32_0 = arith.constant 0 : i32
    %c0_i32_1 = arith.constant 0 : i32
    return %1, %c0_i32_0 : i32, i32
  }
}

</mosaic_0001>

<bundles_post_ra>
// kernel: tpu_custom_call.1
= control target key start
LH: loop header
LB: loop body
LE: loop exit
PB: predicated region body
PF: predicated region fallthrough
CT: control target
= control target key end

     0   :  { %s3664_s0 = inlined_call_operand.hbm [shape: bf16[384,128], index: 0, kind: input, shape index: {}]   ;;  %s3665_s1 = inlined_call_operand.hbm [shape: bf16[128,128], index: 1, kind: input, shape index: {}]   ;;  %s3666_s2 = inlined_call_operand.hbm [shape: bf16[128,128], index: 2, kind: input, shape index: {}]   ;;  %s3667_s3 = inlined_call_operand.hbm [shape: bf16[128,128], index: 3, kind: input, shape index: {}]   ;;  %s3668_s4 = inlined_call_operand.hbm [shape: f32[1,128], index: 4, kind: input, shape index: {}]   ;;  %s3669_s5 = inlined_call_operand.vmem [shape: f32[3,128], index: 5, kind: input, shape index: {}]   ;;  %s3670_s6 = inlined_call_operand.hbm [shape: f32[3,128], index: 6, kind: input, shape index: {}]   ;;  %s3671_s7 = inlined_call_operand.hbm [shape: f32[384,128], index: 7, kind: output, shape index: {}]  }
   0x1   :  { %3681 = sst [smem:[#allocation28_spill]] %s3665_s1 }
   0x2   :  { %3682 = sst [smem:[#allocation29_spill]] %s3666_s2 }
   0x3   :  { %3683 = sst [smem:[#allocation30_spill]] %s3667_s3 }
   0x4   :  { %3684 = sst [smem:[#allocation31_spill]] %s3668_s4 }
   0x5   :  { %3685 = sst [smem:[#allocation32_spill]] %s3670_s6 }
   0x6   :  { %3686 = sst [smem:[#allocation33_spill]] %s3671_s7 }
   0x7   :  { %12 = vsyncpa [#allocation7], 0 }
   0x8   :  { %14 = vsyncpa [#allocation7 + $0x1], 0 }
   0x9   :  { %15 = vsyncpa [#allocation10], 0 }
   0xa   :  { %16 = vsyncpa [#allocation13], 0 }
   0xb   :  { %17 = vsyncpa [#allocation16], 0 }
   0xc   :  { %18 = vsyncpa [#allocation8], 0 }
   0xd   :  { %20 = vsyncpa [#allocation8 + $0x1], 0  ;;  %s3015_s24 = smov 0   ;;  %s3017_s25 = smov 0  }
   0xe   :  { %s3019_s26 = smov 0   ;;  %s3021_s27 = smov 0  }
   0xf   :  { %s3023_s28 = smov 0   ;;  %s3025_s29 = smov 0  }
  0x10   :  { %s3027_s30 = smov 0   ;;  %s3029_s8 = smov 0  }
  0x11   :  { %s3031_s9 = smov 0   ;;  %s3033_s10 = smov 0  }
  0x12   :  { %s3035_s11 = smov 0  }
  0x13 LB: > { %3687 = sst [smem:[#allocation23_spill]] %s2920_s24  ;;  %s2075_s12 = sadd.s32 4294967295, %s2960_s11   ;;  %s2960_s11 = sphi %s3035_s11, %s26_s11   ;;  %s2956_s10 = sphi %s3033_s10, %s3722_s10   ;;  %s2952_s9 = sphi %s3031_s9, %s3721_s9   ;;  %s2948_s8 = sphi %s3029_s8, %s3720_s8   ;;  %s2944_s30 = sphi %s3027_s30, %s3719_s30   ;;  %s2940_s29 = sphi %s3025_s29, %s3718_s29   ;;  %s2936_s28 = sphi %s3023_s28, %s3717_s28   ;;  %s2932_s27 = sphi %s3021_s27, %s3716_s27   ;;  %s2928_s26 = sphi %s3019_s26, %s3715_s26   ;;  %s2924_s25 = sphi %s3017_s25, %s3714_s25   ;;  %s2920_s24 = sphi %s3015_s24, %s3713_s24  }
  0x14   : > { %s2076_s13 = sadd.s32 4294967294, %s2960_s11   ;;  %p3072_p0 = scmp.eq.s32.totalorder %s2075_s12, 0 }
  0x15   : > { %p211_p1 = scmp.ne.s32.totalorder %s2928_s26, %s2924_s25  ;;  %p212_p2 = scmp.eq.s32.totalorder %s2075_s12, 11 }
  0x16   : > { %p217_p3 = scmp.ne.s32.totalorder %s2924_s25, %s2920_s24  ;;  %p218_p4 = scmp.eq.s32.totalorder %s2076_s13, 11 }
  0x17   : > { %p2077_p5 = scmp.ge.s32.totalorder %s2960_s11, 1  ;;  %p3081_p6 = por %p212_p2, %p211_p1 }
  0x18   : > { %p225_p7 = scmp.lt.s32.totalorder %s2960_s11, 13  ;;  %p3086_p8 = por %p218_p4, %p217_p3 }
  0x19   : > { %s3689_s15 = scalar_select %p3081_p6, 1, 0 }
  0x1a   : > { %s3691_s16 = scalar_select %p3086_p8, 1, 0 }
  0x1b   : > { %3690 = sst [smem:[#allocation24_spill]] %s3689_s15  ;;  %p3090_p9 = pnand %p2077_p5, %p225_p7 }
  0x1c   : > { %3692 = sst [smem:[#allocation25_spill]] %s3691_s16  ;;  %s2962_s21 = smov [#allocation9]  }
  0x1d   : > { %s3694_s1 = sld [smem:[#allocation28_spill]]  ;;  %p2490_p10 = pneg %p3090_p9 }
  0x1e   : > { %s238_s22 = sshll.u32 %s2962_s21, 4  ;;  %s3696_s3 = sld [smem:[#allocation30_spill]]  ;;  %s239_s22 = int_to_ptr.vmem [resolvable:$true] %s238_s22 }
  0x1f   : > { %p3101_p11 = pnand %p2490_p10, %p3072_p0  ;;  %s3677_s18 = smov 64  }
  0x20   : > { %s3678_s19 = smov 4   ;;  %s3697_s2 = sld [smem:[#allocation29_spill]] }
  0x21   : > { %s2965_s7 = smov [#allocation12]   ;;  %s2966_s12 = smov [#allocation11]  }
  0x22   : > { %s266_s15 = sshll.u32 %s2965_s7, 4  ;;  %s252_s13 = sshll.u32 %s2966_s12, 4  ;;  %s267_s15 = int_to_ptr.vmem [resolvable:$true] %s266_s15  ;;  %s253_s13 = int_to_ptr.vmem [resolvable:$true] %s252_s13 }
  0x23   : > { %s236_s20 = sshll.u32 %s3694_s1, 4  ;;  %s3698_s4 = sld [smem:[#allocation31_spill]]  ;;  %s237_s20 = int_to_ptr.hbm [resolvable:$true] %s236_s20 }
  0x24   : > { %s264_s16 = sshll.u32 %s3696_s3, 4  ;;  %s3699_s6 = sld [smem:[#allocation32_spill]]  ;;  %s265_s16 = int_to_ptr.hbm [resolvable:$true] %s264_s16 }
  0x25   : > { %2493 = dma.hbm_to_vmem [thread:$0]  (!%p3101_p11), %s237_s20, 1024, %s239_s22, [#allocation10], %s3677_s18, %s3677_s18, %s3678_s19  }
  0x26   : > { %s250_s24 = sshll.u32 %s3697_s2, 4  ;;  %s2968_s21 = smov [#allocation15]   ;;  %s251_s24 = int_to_ptr.hbm [resolvable:$true] %s250_s24 }
  0x27   : > { %2499 = dma.hbm_to_vmem [thread:$0]  (!%p3101_p11), %s265_s16, 1024, %s267_s15, [#allocation13], %s3677_s18, %s3677_s18, %s3678_s19  }
  0x28   : > { %2496 = dma.hbm_to_vmem [thread:$0]  (!%p3101_p11), %s251_s24, 1024, %s253_s13, [#allocation10], %s3677_s18, %s3677_s18, %s3678_s19  }
  0x29   : > { %s279_s22 = sshll.u32 %s3698_s4, 4  ;;  %s2967_s16 = smov [#allocation14]   ;;  %s280_s22 = int_to_ptr.hbm [resolvable:$true] %s279_s22 }
  0x2a   : > { %s294_s15 = sshll.u32 %s3699_s6, 4  ;;  %s281_s3 = sshll.u32 %s2967_s16, 4  ;;  %s295_s15 = int_to_ptr.hbm [resolvable:$true] %s294_s15  ;;  %s282_s3 = int_to_ptr.vmem [resolvable:$true] %s281_s3 }
  0x2b   : > { %2502 = dma.hbm_to_vmem [thread:$0]  (!%p3101_p11), %s280_s22, 16, %s282_s3, [#allocation13]  }
  0x2c   : > { %s296_s12 = sshll.u32 %s2968_s21, 4  ;;  %s35_s24 = sadd.s32 1, %s2952_s9  ;;  %s297_s12 = int_to_ptr.vmem [resolvable:$true] %s296_s12 }
  0x2d   : > { %2505 = dma.hbm_to_vmem [thread:$0]  (!%p3101_p11), %s295_s15, 64, %s297_s12, [#allocation16]  }
  0x2e   : > { %p36_p12 = scmp.ge.s32.totalorder %s35_s24, 3  ;;  %s38_s13 = sadd.s32 1, %s2956_s10 }
  0x2f   : > { %s45_s20 = sadd.s32 1, %s2940_s29  ;;  %p52_p13 = scmp.ne.s32.totalorder %s2940_s29, %s2936_s28 }
  0x30   : > { %s3724_s24 = smov (%p36_p12, %s35_s24), 0  ;;  %s3726_s13 = smov (!%p36_p12, %s38_s13), %s2956_s10 }
  0x31   : > { %3700 = sst [smem:[#allocation26_spill]] %s3724_s24  ;;  %s42_s22 = ssub.s32 %s2952_s9, %s3724_s24 }
  0x32   : > { %p53_p1 = scmp.eq.s32.totalorder %s2960_s11, 0  ;;  %p40_p2 = scmp.ge.s32.totalorder %s3726_s13, 4 }
  0x33   : > { %p43_p3 = scmp.eq.s32.totalorder %s42_s22, 0  ;;  %p58_p4 = scmp.ne.s32.totalorder %s2936_s28, %s2932_s27 }
  0x34   : > { %p194_p5 = scmp.eq.s32.totalorder %s2956_s10, 3  ;;  %s3728_s13 = smov (%p40_p2, %s3726_s13), 0 }
  0x35   : > { %3701 = sst [smem:[#allocation27_spill]] %s3728_s13  ;;  %p3157_p7 = por %p3072_p0, %p58_p4 }
  0x36   : > { %s3153_s23 = scalar_select %p43_p3, %s2940_s29, %s45_s20  }
  0x37   : > { %p196_p10 = scmp.eq.s32.totalorder %s3728_s13, 3  ;;  %p3167_p11 = por %p53_p1, %p52_p13 }
  0x38   : > { %s195_s7 = scalar_select %p194_p5, %s2952_s9, 0 }
  0x39   : > { %s197_s15 = scalar_select %p196_p10, %s3724_s24, 0 }
  0x3a   : > { %s201_s27 = sadd.s32 1, %s2928_s26  ;;  %s307_s21 = sand.u32 1, %s2940_s29  }
  0x3b   : > { %s198_s3 = ssub.s32 %s195_s7, %s197_s15  ;;  %p2519_p2 = scmp.lt.s32.totalorder %s2960_s11, 12 }
  0x3c   : > { %p199_p12 = scmp.eq.s32.totalorder %s198_s3, 0  ;;  %s2084_s12 = sshll.u32 %s307_s21, 6 }
  0x3d   : > { %s2313_s20 = sshll.u32 %s2952_s9, 6  ;;  %s311_s6 = scalar_lea.vmem [#allocation6], %s2084_s12 }
  0x3e   : > { %s3176_s22 = scalar_select %p199_p12, %s2928_s26, %s201_s27  }
  0x3f   : > { %s316_s2 = scalar_lea.hbm %s3664_s0, %s2313_s20  ;;  %s319_s13 = sshll.u32 %s311_s6, 4  ;;  %s320_s13 = int_to_ptr.vmem [resolvable:$true] %s319_s13 }
  0x40   : > { %s317_s4 = sshll.u32 %s316_s2, 4  ;;  %p2507_p13 = pnand %p2519_p2, %p3167_p11  ;;  %s318_s4 = int_to_ptr.hbm [resolvable:$true] %s317_s4 }
  0x41   : > { %s308_s24 = scalar_lea.sflag [#allocation7], %s307_s21  ;;  %s3704_s7 = smov 4  }
  0x42   : > { %s3705_s15 = smov 64   ;;  %331 = sbr.rel (%p3090_p9) target bundleno = 1497 (0x5d9), region = 48 }
  0x43   : > { %2509 = dma.hbm_to_vmem [thread:$0]  (!%p2507_p13), %s318_s4, 1024, %s320_s13, %s308_s24, %s3705_s15, %s3705_s15, %s3704_s7  }
  0x44   : > { %s333_s27 = sand.u32 (!%p3090_p9), 1, %s2936_s28  }
  0x45   : > { %s2088_s18 = sshll.u32 (!%p3090_p9), %s333_s27, 6  ;;  %s334_s19 = scalar_lea.sflag (!%p3090_p9), [#allocation7], %s333_s27 }
  0x46   : > { %s3189_s2 = scalar_lea.vmem (!%p3090_p9), [#allocation6], %s2088_s18 }
  0x47   : > { %2899 = dma.done.wait (%p3157_p7), %s334_s19, 1024  }
  0x48   : > { %2901 = vsyncadd (%p3157_p7), %s334_s19, 4294966272 }
  0x49   : > { %2903 = dma.done.wait (%p3072_p0), [#allocation10], 2048  }
  0x4a   : > { %2905 = vsyncadd (%p3072_p0), [#allocation10], 4294965248 }
  0x4b   : > { %2907 = dma.done.wait (%p3072_p0), [#allocation13], 1040  }
  0x4c   : > { %2909 = vsyncadd (%p3072_p0), [#allocation13], 4294966256 }
  0x4d   : > { %2911 = dma.done.wait (%p3072_p0), [#allocation16], 64  }
  0x4e   : > { %2913 = vsyncadd (%p3072_p0), [#allocation16], 4294967232  ;;  %s391_s4 = sand.u32 1, %s2924_s25   ;;  %s2095_s6 = sshll.u32 %s2944_s30, 7  ;;  %v399_v0 = vlaneseq  ;;  %v2969_v34 = vmov 0.0   ;;  %v2364_v40 = vld [vmem:[%s3189_s2] sm:$0xff]  }
  0x4f   : > { %s3211_s17 = sshll.u32 %s391_s4, 7  ;;  %p497_p9 = scmp.eq.s32.totalorder %s2948_s8, 0  ;;  %v416_v2 = vstv %s2095_s6  ;;  %v2395_v45 = vld [vmem:[%s3189_s2 + $0x8] sm:$0xff]   ;;  %v2396_v46 = vld [vmem:[%s3189_s2 + $0x10] sm:$0xff]   ;;  %v2397_v51 = vld [vmem:[%s3189_s2 + $0x18] sm:$0xff]   ;;  %v3274_v56 = vunpack.c.l.bf16 %v2364_v40  ;;  %v3278_v59 = vunpack.c.h.bf16 %v2364_v40 }
  0x50   : > { %v400_v1 = vshrl.u32 %v399_v0, 7  ;;  %p498_p1 = scmp.eq.s32.totalorder %s2944_s30, 0  ;;  %v2398_v52 = vld [vmem:[%s3189_s2 + $0x20] sm:$0xff]   ;;  %v2399_v57 = vld [vmem:[%s3189_s2 + $0x28] sm:$0xff]   ;;  %v2400_v58 = vld [vmem:[%s3189_s2 + $0x30] sm:$0xff]   ;;  %v3280_v60 = vunpack.c.l.bf16 %v2395_v45  ;;  %v3282_v61 = vunpack.c.h.bf16 %v2395_v45  ;;  %v3284_v62 = vunpack.c.l.bf16 %v2396_v46  ;;  %s3310_s24 = scalar_lea.vmem [#allocation17], %s3211_s17 }
  0x51   : > { %v2401_v63 = vld [vmem:[%s3189_s2 + $0x38] sm:$0xff]   ;;  %v3287_v0 = vunpack.c.h.bf16 %v2396_v46 }
  0x52   : > { %v401_v3 = vadd.s32 8, %v400_v1  ;;  %v402_v4 = vadd.s32 16, %v400_v1  ;;  %v403_v5 = vadd.s32 24, %v400_v1  ;;  %v404_v6 = vadd.s32 32, %v400_v1  ;;  %p3217_p0 = pnand %p498_p1, %p497_p9 }
  0x53   : > { %v405_v7 = vadd.s32 40, %v400_v1  ;;  %v406_v8 = vadd.s32 48, %v400_v1  ;;  %v407_v9 = vadd.s32 56, %v400_v1  ;;  %v408_v10 = vadd.s32 64, %v400_v1 }
  0x54   : > { %v409_v11 = vadd.s32 72, %v400_v1  ;;  %v410_v12 = vadd.s32 80, %v400_v1  ;;  %v411_v13 = vadd.s32 88, %v400_v1  ;;  %v412_v14 = vadd.s32 96, %v400_v1 }
  0x55   : > { %v413_v15 = vadd.s32 104, %v400_v1  ;;  %v414_v16 = vadd.s32 112, %v400_v1  ;;  %v415_v17 = vadd.s32 120, %v400_v1  ;;  %v417_v18 = vadd.s32 %v416_v2, %v400_v1 }
  0x56   : > { %v418_v19 = vadd.s32 %v416_v2, %v401_v3  ;;  %v419_v20 = vadd.s32 %v416_v2, %v402_v4  ;;  %v420_v21 = vadd.s32 %v416_v2, %v403_v5  ;;  %v421_v22 = vadd.s32 %v416_v2, %v404_v6 }
  0x57   : > { %v422_v23 = vadd.s32 %v416_v2, %v405_v7  ;;  %v423_v24 = vadd.s32 %v416_v2, %v406_v8  ;;  %v424_v25 = vadd.s32 %v416_v2, %v407_v9  ;;  %v425_v26 = vadd.s32 %v416_v2, %v408_v10 }
  0x58   : > { %v426_v27 = vadd.s32 %v416_v2, %v409_v11  ;;  %v427_v28 = vadd.s32 %v416_v2, %v410_v12  ;;  %v428_v29 = vadd.s32 %v416_v2, %v411_v13  ;;  %v429_v30 = vadd.s32 %v416_v2, %v412_v14 }
  0x59   : > { %v430_v31 = vadd.s32 %v416_v2, %v413_v15  ;;  %v431_v32 = vadd.s32 %v416_v2, %v414_v16  ;;  %v432_v33 = vadd.s32 %v416_v2, %v415_v17  ;;  %vm433_vm0 = vcmp.lt.s32.totalorder %v417_v18, 300 }
  0x5a   : > { %vm434_vm1 = vcmp.lt.s32.totalorder %v418_v19, 300  ;;  %vm435_vm2 = vcmp.lt.s32.totalorder %v419_v20, 300  ;;  %vm436_vm3 = vcmp.lt.s32.totalorder %v420_v21, 300  ;;  %vm437_vm4 = vcmp.lt.s32.totalorder %v421_v22, 300 }
  0x5b   : > { %vm438_vm5 = vcmp.lt.s32.totalorder %v422_v23, 300  ;;  %vm439_vm6 = vcmp.lt.s32.totalorder %v423_v24, 300  ;;  %vm440_vm7 = vcmp.lt.s32.totalorder %v424_v25, 300  ;;  %vm441_vm8 = vcmp.lt.s32.totalorder %v425_v26, 300 }
  0x5c   : > { %vm442_vm9 = vcmp.lt.s32.totalorder %v426_v27, 300  ;;  %vm443_vm10 = vcmp.lt.s32.totalorder %v427_v28, 300  ;;  %vm444_vm11 = vcmp.lt.s32.totalorder %v428_v29, 300  ;;  %vm445_vm12 = vcmp.lt.s32.totalorder %v429_v30, 300 }
  0x5d   : > { %vm446_vm13 = vcmp.lt.s32.totalorder %v430_v31, 300  ;;  %vm447_vm14 = vcmp.lt.s32.totalorder %v431_v32, 300  ;;  %vm448_vm15 = vcmp.lt.s32.totalorder %v432_v33, 300  ;;  %v3222_v35 = vsel %vm433_vm0, 1.0, %v2969_v34 }
  0x5e   : > { %v3225_v36 = vsel %vm434_vm1, 1.0, %v2969_v34  ;;  %v3228_v37 = vsel %vm435_vm2, 1.0, %v2969_v34  ;;  %v3231_v38 = vsel %vm436_vm3, 1.0, %v2969_v34  ;;  %v3234_v39 = vsel %vm437_vm4, 1.0, %v2969_v34 }
  0x5f   : > { %v3238_v41 = vsel %vm438_vm5, 1.0, %v2969_v34  ;;  %v3241_v42 = vsel %vm439_vm6, 1.0, %v2969_v34  ;;  %v3244_v43 = vsel %vm440_vm7, 1.0, %v2969_v34  ;;  %v3247_v44 = vsel %vm441_vm8, 1.0, %v2969_v34 }
  0x60   : > { %v3252_v47 = vsel %vm442_vm9, 1.0, %v2969_v34  ;;  %v3255_v48 = vsel %vm443_vm10, 1.0, %v2969_v34  ;;  %v3258_v49 = vsel %vm444_vm11, 1.0, %v2969_v34  ;;  %v3261_v50 = vsel %vm445_vm12, 1.0, %v2969_v34  ;;  %502 = sbr.rel (%p3217_p0) target bundleno = 104 (0x68), region = 76 }
  0x61   : > { %v3266_v53 = vsel %vm446_vm13, 1.0, %v2969_v34  ;;  %v3269_v54 = vsel %vm447_vm14, 1.0, %v2969_v34  ;;  %v3272_v55 = vsel %vm448_vm15, 1.0, %v2969_v34  ;;  %v3289_v1 = vunpack.c.l.bf16 %v2397_v51 }
  0x62   : > { %v3291_v2 = vunpack.c.h.bf16 %v2397_v51  ;;  %v3293_v3 = vunpack.c.l.bf16 %v2398_v52  ;;  %v3295_v4 = vunpack.c.h.bf16 %v2398_v52  ;;  %v3297_v5 = vunpack.c.l.bf16 %v2399_v57 }
  0x63   : > { %v3299_v6 = vunpack.c.h.bf16 %v2399_v57  ;;  %v3301_v7 = vunpack.c.l.bf16 %v2400_v58  ;;  %v3303_v8 = vunpack.c.h.bf16 %v2400_v58  ;;  %v3305_v9 = vunpack.c.l.bf16 %v2401_v63 }
  0x64   : > { %v3307_v10 = vunpack.c.h.bf16 %v2401_v63 }
  0x65   : > { %v2970_v11 = vmov 0.0  }
  0x66   : > { %503 = vst [vmem:[#allocation2] sm:$0xff] %v2970_v11 }
  0x67   : > { %504 = vst [vmem:[#allocation3] sm:$0xff] %v2970_v11 }
  0x68 PF: > { %p2112_p3 = scmp.ne.s32.totalorder %s2948_s8, 0 }
  0x6a   : > { %507 = sbr.rel (%p2112_p3) target bundleno = 148 (0x94), region = 80 }
  0x6f   : > { %v524_v12 = vmul.f32 %v3274_v56, %v3222_v35  ;;  %v525_v13 = vmul.f32 %v3278_v59, %v3225_v36  ;;  %v526_v14 = vmul.f32 %v3280_v60, %v3228_v37  ;;  %v527_v15 = vmul.f32 %v3282_v61, %v3231_v38 }
  0x70   : > { %v528_v19 = vmul.f32 %v3284_v62, %v3234_v39  ;;  %v529_v22 = vmul.f32 %v3287_v0, %v3238_v41  ;;  %v530_v26 = vmul.f32 %v3289_v1, %v3241_v42  ;;  %v531_v30 = vmul.f32 %v3291_v2, %v3244_v43 }
  0x71   : > { %v541_v16 = vadd.f32 %v525_v13, %v524_v12  ;;  %v559_v17 = vmul.f32 %v3274_v56, %v524_v12  ;;  %v560_v18 = vmul.f32 %v3278_v59, %v525_v13  ;;  %v561_v21 = vmul.f32 %v3280_v60, %v526_v14 }
  0x72   : > { %v562_v24 = vmul.f32 %v3282_v61, %v527_v15  ;;  %v563_v28 = vmul.f32 %v3284_v62, %v528_v19  ;;  %v564_v32 = vmul.f32 %v3287_v0, %v529_v22  ;;  %v532_v34 = vmul.f32 %v3293_v3, %v3247_v44 }
  0x73   : > { %v542_v20 = vadd.f32 %v541_v16, %v526_v14  ;;  %v575_v25 = vadd.f32 %v560_v18, %v559_v17  ;;  %v565_v45 = vmul.f32 %v3289_v1, %v530_v26  ;;  %v533_v51 = vmul.f32 %v3295_v4, %v3252_v47 }
  0x74   : > { %v566_v57 = vmul.f32 %v3291_v2, %v531_v30  ;;  %v534_v63 = vmul.f32 %v3297_v5, %v3255_v48  ;;  %v567_v12 = vmul.f32 %v3293_v3, %v532_v34  ;;  %v535_v14 = vmul.f32 %v3299_v6, %v3258_v49 }
  0x75   : > { %v543_v23 = vadd.f32 %v542_v20, %v527_v15  ;;  %v576_v29 = vadd.f32 %v575_v25, %v561_v21  ;;  %v568_v16 = vmul.f32 %v3295_v4, %v533_v51  ;;  %v536_v18 = vmul.f32 %v3301_v7, %v3261_v50 }
  0x76   : > { %v569_v20 = vmul.f32 %v3297_v5, %v534_v63 }
  0x77   : > { %v544_v27 = vadd.f32 %v543_v23, %v528_v19  ;;  %v577_v33 = vadd.f32 %v576_v29, %v562_v24  ;;  %v570_v24 = vmul.f32 %v3299_v6, %v535_v14 }
  0x79   : > { %v545_v31 = vadd.f32 %v544_v27, %v529_v22  ;;  %v578_v46 = vadd.f32 %v577_v33, %v563_v28  ;;  %v537_v22 = vmul.f32 %v3303_v8, %v3266_v53  ;;  %v571_v28 = vmul.f32 %v3301_v7, %v536_v18 }
  0x7b   : > { %v546_v40 = vadd.f32 %v545_v31, %v530_v26  ;;  %v579_v58 = vadd.f32 %v578_v46, %v564_v32  ;;  %v538_v26 = vmul.f32 %v3305_v9, %v3269_v54  ;;  %v572_v32 = vmul.f32 %v3303_v8, %v537_v22  ;;  %v540_v46 = vld [vmem:[#allocation2] sm:$0xff] }
  0x7d   : > { %v547_v52 = vadd.f32 %v546_v40, %v531_v30  ;;  %v580_v13 = vadd.f32 %v579_v58, %v565_v45  ;;  %v539_v30 = vmul.f32 %v3307_v10, %v3272_v55  ;;  %v573_v40 = vmul.f32 %v3305_v9, %v538_v26 }
  0x7f   : > { %v548_v11 = vadd.f32 %v547_v52, %v532_v34  ;;  %v581_v17 = vadd.f32 %v580_v13, %v566_v57  ;;  %v574_v52 = vmul.f32 %v3307_v10, %v539_v30 }
  0x81   : > { %v549_v15 = vadd.f32 %v548_v11, %v533_v51  ;;  %v582_v21 = vadd.f32 %v581_v17, %v567_v12  ;;  %v558_v11 = vld [vmem:[#allocation3] sm:$0xff] }
  0x83   : > { %v550_v19 = vadd.f32 %v549_v15, %v534_v63  ;;  %v583_v25 = vadd.f32 %v582_v21, %v568_v16 }
  0x85   : > { %v551_v23 = vadd.f32 %v550_v19, %v535_v14  ;;  %v584_v29 = vadd.f32 %v583_v25, %v569_v20 }
  0x87   : > { %v552_v27 = vadd.f32 %v551_v23, %v536_v18  ;;  %v585_v33 = vadd.f32 %v584_v29, %v570_v24 }
  0x89   : > { %v553_v31 = vadd.f32 %v552_v27, %v537_v22  ;;  %v586_v45 = vadd.f32 %v585_v33, %v571_v28 }
  0x8b   : > { %v554_v34 = vadd.f32 %v553_v31, %v538_v26  ;;  %v587_v57 = vadd.f32 %v586_v45, %v572_v32 }
  0x8d   : > { %v555_v51 = vadd.f32 %v554_v34, %v539_v30  ;;  %v588_v63 = vadd.f32 %v587_v57, %v573_v40 }
  0x8f   : > { %v556_v58 = vadd.f32 %v555_v51, %v540_v46  ;;  %v589_v12 = vadd.f32 %v588_v63, %v574_v52 }
  0x91   : > { %557 = vst [vmem:[#allocation2] sm:$0xff] %v556_v58  ;;  %v590_v13 = vadd.f32 %v589_v12, %v558_v11 }
  0x93   : > { %591 = vst [vmem:[#allocation3] sm:$0xff] %v590_v13 }
  0x94 PF: > { %p592_p4 = scmp.eq.s32.totalorder %s2948_s8, 1 }
  0x96   : > { %p593_p5 = pnand %p592_p4, %p498_p1 }
  0x98   : > { %596 = sbr.rel (%p593_p5) target bundleno = 205 (0xcd), region = 84 }
  0x9d   : > { %v597_v14 = vld [vmem:[#allocation2] sm:$0xff]  ;;  %v605_v15 = vld [vmem:[#allocation3] sm:$0xff]  ;;  %v2971_v31 = vmov 0.0   ;;  %v630_v12 = vld [vmem:[#allocation15] sm:$0x1] }
  0x9e   : > { %v598_v16 = vrot.slane %v597_v14, 4  ;;  %v606_v17 = vrot.slane %v605_v15, 4  ;;  %634 = vst [vmem:[#allocation2] sm:$0xff] %v2971_v31  ;;  %v616_v57 = vld [vmem:[%s3669_s5] sm:$0x1] }
  0x9f   : > { %635 = vst [vmem:[#allocation3] sm:$0xff] %v2971_v31 }
  0xa0   : > { %v599_v18 = vadd.f32 %v598_v16, %v597_v14  ;;  %v607_v19 = vadd.f32 %v606_v17, %v605_v15 }
  0xa2   : > { %v600_v20 = vrot.slane %v599_v18, 2  ;;  %v608_v21 = vrot.slane %v607_v19, 2 }
  0xa4   : > { %v601_v22 = vadd.f32 %v600_v20, %v599_v18  ;;  %v609_v23 = vadd.f32 %v608_v21, %v607_v19 }
  0xa6   : > { %v602_v24 = vrot.slane %v601_v22, 1  ;;  %v610_v25 = vrot.slane %v609_v23, 1 }
  0xa8   : > { %v603_v26 = vadd.f32 %v602_v24, %v601_v22  ;;  %v611_v27 = vadd.f32 %v610_v25, %v609_v23 }
  0xaa   : > { %v604_v28 = vmul.f32 0.0033333334, %v603_v26  ;;  %v612_v29 = vmul.f32 0.0033333334, %v611_v27 }
  0xac   : > { %v613_v30 = vmul.f32 %v604_v28, %v604_v28 }
  0xae   : > { %v614_v32 = vsub.f32 %v612_v29, %v613_v30 }
  0xb0   : > { %v615_v33 = vmax.f32 %v614_v32, 0.0 }
  0xb2   : > { %v617_v34 = vadd.f32 1e-05, %v615_v33 }
  0xb4   : > { %2627 = vrsqrt.f32 %v617_v34  ;;  %vm624_vm0 = vweird.f32 %v617_v34 }
  0xba   : > { %v2628_v40 = vpop.eup %2627 }
  0xbb   : > { %v619_v45 = vmul.f32 %v2628_v40, %v617_v34  ;;  %vm625_vm1 = vweird.f32 %v2628_v40 }
  0xbc   : > { %vm626_vm2 = vmor %vm624_vm0, %vm625_vm1 }
  0xbd   : > { %v620_v46 = vmul.f32 %v2628_v40, %v619_v45 }
  0xbf   : > { %v621_v51 = vmul.f32 0.5, %v620_v46 }
  0xc1   : > { %v622_v52 = vsub.f32 1.5, %v621_v51 }
  0xc3   : > { %v623_v58 = vmul.f32 %v2628_v40, %v622_v52 }
  0xc5   : > { %v627_v63 = vsel %vm626_vm2, %v2628_v40, %v623_v58 }
  0xc6   : > { %v628_v11 = vmul.f32 %v627_v63, %v616_v57 }
  0xc8   : > { %629 = vst [vmem:[#allocation4] sm:$0x1] %v628_v11  ;;  %v631_v13 = vmul.f32 %v628_v11, %v604_v28 }
  0xca   : > { %v632_v14 = vsub.f32 %v630_v12, %v631_v13 }
  0xcc   : > { %633 = vst [vmem:[#allocation5] sm:$0x1] %v632_v14 }
  0xcd PF: > { %p2113_p7 = scmp.ne.s32.totalorder %s2948_s8, 1 }
  0xcf   : > { %638 = sbr.rel (%p2113_p7) target bundleno = 427 (0x1ab), region = 88 }
  0xd4   : > { %v2321_v15 = vld [vmem:[#allocation9 + $0x38] sm:$0xff]  ;;  %v2320_v16 = vld [vmem:[#allocation9 + $0x30] sm:$0xff]  ;;  %v2319_v17 = vld [vmem:[#allocation9 + $0x28] sm:$0xff] }
  0xd5   : > { %763 = vmatpush.bf16.msra.mxu0 %v2321_v15  ;;  %2402 = vmatpush.bf16.msra.mxu1 %v2321_v15  ;;  %v2318_v18 = vld [vmem:[#allocation9 + $0x20] sm:$0xff]  ;;  %v2317_v19 = vld [vmem:[#allocation9 + $0x18] sm:$0xff]  ;;  %v2316_v21 = vld [vmem:[#allocation9 + $0x10] sm:$0xff] }
  0xd6   : > { %2403 = vmatpush.bf16.msra.mxu2 %v2321_v15  ;;  %2404 = vmatpush.bf16.msra.mxu3 %v2321_v15  ;;  %v2629_v20 = vld [vmem:[#allocation4] ss:$0 sm:$0xff]  ;;  %v2630_v23 = vld [vmem:[#allocation5] ss:$0 sm:$0xff]  ;;  %v2315_v28 = vld [vmem:[#allocation9 + $0x8] sm:$0xff] }
  0xd7   : > { %v657_v22 = vmul.f32 %v2629_v20, %v3274_v56  ;;  %v658_v24 = vmul.f32 %v2629_v20, %v3278_v59  ;;  %v661_v25 = vmul.f32 %v2629_v20, %v3284_v62  ;;  %v662_v26 = vmul.f32 %v2629_v20, %v3287_v0  ;;  %v2314_v46 = vld [vmem:[#allocation9] sm:$0xff] }
  0xd8   : > { %v665_v27 = vmul.f32 %v2629_v20, %v3293_v3  ;;  %v666_v29 = vmul.f32 %v2629_v20, %v3295_v4  ;;  %v669_v30 = vmul.f32 %v2629_v20, %v3301_v7  ;;  %v670_v31 = vmul.f32 %v2629_v20, %v3303_v8 }
  0xd9   : > { %764 = vmatpush.bf16.msra.mxu0 %v2320_v16  ;;  %2405 = vmatpush.bf16.msra.mxu1 %v2320_v16  ;;  %v675_v32 = vadd.f32 %v2630_v23, %v657_v22  ;;  %v676_v33 = vadd.f32 %v2630_v23, %v658_v24  ;;  %v679_v34 = vadd.f32 %v2630_v23, %v661_v25 }
  0xda   : > { %2406 = vmatpush.bf16.msra.mxu2 %v2320_v16  ;;  %2407 = vmatpush.bf16.msra.mxu3 %v2320_v16  ;;  %v680_v40 = vadd.f32 %v2630_v23, %v662_v26  ;;  %v683_v45 = vadd.f32 %v2630_v23, %v665_v27  ;;  %v684_v51 = vadd.f32 %v2630_v23, %v666_v29 }
  0xdb   : > { %v687_v52 = vadd.f32 %v2630_v23, %v669_v30  ;;  %v688_v57 = vadd.f32 %v2630_v23, %v670_v31  ;;  %v691_v58 = vpack.c.bf16 %v676_v33, %v675_v32  ;;  %v659_v13 = vmul.f32 %v2629_v20, %v3280_v60 }
  0xdc   : > { %v693_v63 = vpack.c.bf16 %v680_v40, %v679_v34  ;;  %v695_v11 = vpack.c.bf16 %v684_v51, %v683_v45  ;;  %v660_v14 = vmul.f32 %v2629_v20, %v3282_v61  ;;  %v663_v15 = vmul.f32 %v2629_v20, %v3289_v1 }
  0xdd   : > { %765 = vmatpush.bf16.msra.mxu0 %v2319_v17  ;;  %2408 = vmatpush.bf16.msra.mxu1 %v2319_v17  ;;  %v697_v12 = vpack.c.bf16 %v688_v57, %v687_v52  ;;  %v664_v16 = vmul.f32 %v2629_v20, %v3291_v2  ;;  %v677_v22 = vadd.f32 %v2630_v23, %v659_v13 }
  0xde   : > { %2409 = vmatpush.bf16.msra.mxu2 %v2319_v17  ;;  %2410 = vmatpush.bf16.msra.mxu3 %v2319_v17  ;;  %v667_v17 = vmul.f32 %v2629_v20, %v3297_v5  ;;  %v678_v24 = vadd.f32 %v2630_v23, %v660_v14  ;;  %v681_v25 = vadd.f32 %v2630_v23, %v663_v15 }
  0xdf   : > { %v682_v26 = vadd.f32 %v2630_v23, %v664_v16 }
  0xe0   : > { %v685_v27 = vadd.f32 %v2630_v23, %v667_v17  ;;  %v692_v31 = vpack.c.bf16 %v678_v24, %v677_v22 }
  0xe1   : > { %766 = vmatpush.bf16.msra.mxu0 %v2318_v18  ;;  %2411 = vmatpush.bf16.msra.mxu1 %v2318_v18  ;;  %v694_v32 = vpack.c.bf16 %v682_v26, %v681_v25 }
  0xe2   : > { %2412 = vmatpush.bf16.msra.mxu2 %v2318_v18  ;;  %2413 = vmatpush.bf16.msra.mxu3 %v2318_v18  ;;  %v668_v18 = vmul.f32 %v2629_v20, %v3299_v6 }
  0xe5   : > { %767 = vmatpush.bf16.msra.mxu0 %v2317_v19  ;;  %2414 = vmatpush.bf16.msra.mxu1 %v2317_v19 }
  0xe6   : > { %2415 = vmatpush.bf16.msra.mxu2 %v2317_v19  ;;  %2416 = vmatpush.bf16.msra.mxu3 %v2317_v19  ;;  %v671_v19 = vmul.f32 %v2629_v20, %v3305_v9 }
  0xe8   : > { %v689_v29 = vadd.f32 %v2630_v23, %v671_v19 }
  0xe9   : > { %768 = vmatpush.bf16.msra.mxu0 %v2316_v21  ;;  %2417 = vmatpush.bf16.msra.mxu1 %v2316_v21 }
  0xea   : > { %2418 = vmatpush.bf16.msra.mxu2 %v2316_v21  ;;  %2419 = vmatpush.bf16.msra.mxu3 %v2316_v21  ;;  %v672_v21 = vmul.f32 %v2629_v20, %v3307_v10 }
  0xec   : > { %v690_v30 = vadd.f32 %v2630_v23, %v672_v21 }
  0xed   : > { %769 = vmatpush.bf16.msra.mxu0 %v2315_v28  ;;  %2420 = vmatpush.bf16.msra.mxu1 %v2315_v28 }
  0xee   : > { %2421 = vmatpush.bf16.msra.mxu2 %v2315_v28  ;;  %2422 = vmatpush.bf16.msra.mxu3 %v2315_v28  ;;  %v686_v28 = vadd.f32 %v2630_v23, %v668_v18  ;;  %v698_v34 = vpack.c.bf16 %v690_v30, %v689_v29 }
  0xf0   : > { %v696_v33 = vpack.c.bf16 %v686_v28, %v685_v27 }
  0xf1   : > { %770 = vmatpush.bf16.msra.mxu0 %v2314_v46  ;;  %2423 = vmatpush.bf16.msra.mxu1 %v2314_v46 }
  0xf2   : > { %2424 = vmatpush.bf16.msra.mxu2 %v2314_v46  ;;  %2425 = vmatpush.bf16.msra.mxu3 %v2314_v46 }
  0xf4   : > { %771 = vmatmul.bf16.vlgmr.msra.gmra.mxu0 %v691_v58  ;;  %781 = vmatmul.bf16.vlgmr.msra.gmra.mxu1 %v693_v63 }
  0xf5   : > { %791 = vmatmul.bf16.vlgmr.msra.gmra.mxu2 %v695_v11  ;;  %801 = vmatmul.bf16.vlgmr.msra.gmra.mxu3 %v697_v12 }
 0x104   : > { %776 = vmatmul.bf16.gmra.mxu0 %v692_v31  ;;  %786 = vmatmul.bf16.gmra.mxu1 %v694_v32 }
 0x105   : > { %796 = vmatmul.bf16.gmra.mxu2 %v696_v33  ;;  %806 = vmatmul.bf16.gmra.mxu3 %v698_v34 }
 0x171   : > { %v772_v40 = vpop.f32.mrf.mxu0  ;;  %v782_v45 = vpop.f32.mrf.mxu1 }
 0x172   : > { %v812_v23 = vmul.f32 %v3222_v35, %v772_v40  ;;  %v816_v19 = vmul.f32 %v3234_v39, %v782_v45 }
 0x174   : > { %v847_v14 = vmul.f32 %v812_v23, %v772_v40  ;;  %v851_v31 = vmul.f32 %v816_v19, %v782_v45 }
 0x178   : > { %v792_v46 = vpop.f32.mrf.mxu2  ;;  %v802_v52 = vpop.f32.mrf.mxu3 }
 0x179   : > { %v774_v20 = vpop.f32.mrf.mxu0  ;;  %v784_v51 = vpop.f32.mrf.mxu1 }
 0x17a   : > { %v813_v63 = vmul.f32 %v3225_v36, %v774_v20  ;;  %v817_v26 = vmul.f32 %v3238_v41, %v784_v51 }
 0x17c   : > { %v848_v13 = vmul.f32 %v813_v63, %v774_v20  ;;  %v829_v15 = vadd.f32 %v813_v63, %v812_v23  ;;  %v852_v40 = vmul.f32 %v817_v26, %v784_v51  ;;  %v820_v23 = vmul.f32 %v3247_v44, %v792_v46 }
 0x17e   : > { %v863_v21 = vadd.f32 %v848_v13, %v847_v14 }
 0x180   : > { %v794_v57 = vpop.f32.mrf.mxu2  ;;  %v804_v17 = vpop.f32.mrf.mxu3 }
 0x181   : > { %v777_v58 = vpop.f32.mrf.mxu0  ;;  %v787_v11 = vpop.f32.mrf.mxu1 }
 0x182   : > { %v814_v12 = vmul.f32 %v3228_v37, %v777_v58  ;;  %v818_v32 = vmul.f32 %v3241_v42, %v787_v11 }
 0x184   : > { %v849_v16 = vmul.f32 %v814_v12, %v777_v58  ;;  %v830_v22 = vadd.f32 %v829_v15, %v814_v12  ;;  %v853_v12 = vmul.f32 %v818_v32, %v787_v11  ;;  %v824_v11 = vmul.f32 %v3261_v50, %v802_v52 }
 0x186   : > { %v864_v27 = vadd.f32 %v863_v21, %v849_v16  ;;  %v821_v16 = vmul.f32 %v3252_v47, %v794_v57 }
 0x188   : > { %v797_v25 = vpop.f32.mrf.mxu2  ;;  %v807_v15 = vpop.f32.mrf.mxu3 }
 0x189   : > { %v779_v18 = vpop.f32.mrf.mxu0  ;;  %v789_v30 = vpop.f32.mrf.mxu1 }
 0x18a   : > { %v815_v24 = vmul.f32 %v3231_v38, %v779_v18  ;;  %v819_v58 = vmul.f32 %v3244_v43, %v789_v30 }
 0x18c   : > { %v831_v28 = vadd.f32 %v830_v22, %v815_v24  ;;  %v850_v29 = vmul.f32 %v815_v24, %v779_v18  ;;  %v854_v21 = vmul.f32 %v819_v58, %v789_v30  ;;  %v855_v24 = vmul.f32 %v820_v23, %v792_v46 }
 0x18e   : > { %v832_v33 = vadd.f32 %v831_v28, %v816_v19  ;;  %v865_v34 = vadd.f32 %v864_v27, %v850_v29  ;;  %v822_v19 = vmul.f32 %v3255_v48, %v797_v25  ;;  %v856_v28 = vmul.f32 %v821_v16, %v794_v57 }
 0x18f   : > { %v826_v57 = vmul.f32 %v3269_v54, %v807_v15 }
 0x190   : > { %v866_v20 = vadd.f32 %v865_v34, %v851_v31  ;;  %v833_v63 = vadd.f32 %v832_v33, %v817_v26  ;;  %v799_v22 = vpop.f32.mrf.mxu2  ;;  %v809_v46 = vpop.f32.mrf.mxu3 }
 0x191   : > { %v823_v26 = vmul.f32 %v3258_v49, %v799_v22 }
 0x192   : > { %v834_v13 = vadd.f32 %v833_v63, %v818_v32  ;;  %v867_v14 = vadd.f32 %v866_v20, %v852_v40  ;;  %v857_v32 = vmul.f32 %v822_v19, %v797_v25  ;;  %v825_v40 = vmul.f32 %v3266_v53, %v804_v17 }
 0x193   : > { %v858_v20 = vmul.f32 %v823_v26, %v799_v22  ;;  %v859_v63 = vmul.f32 %v824_v11, %v802_v52  ;;  %v861_v25 = vmul.f32 %v826_v57, %v807_v15  ;;  %v846_v22 = vld [vmem:[#allocation3] sm:$0xff] }
 0x194   : > { %v835_v18 = vadd.f32 %v834_v13, %v819_v58  ;;  %v868_v45 = vadd.f32 %v867_v14, %v853_v12  ;;  %v860_v13 = vmul.f32 %v825_v40, %v804_v17 }
 0x196   : > { %v836_v51 = vadd.f32 %v835_v18, %v820_v23  ;;  %v869_v27 = vadd.f32 %v868_v45, %v854_v21 }
 0x198   : > { %v870_v29 = vadd.f32 %v869_v27, %v855_v24  ;;  %v837_v31 = vadd.f32 %v836_v51, %v821_v16  ;;  %v827_v16 = vmul.f32 %v3272_v55, %v809_v46  ;;  %v828_v24 = vld [vmem:[#allocation2] sm:$0xff] }
 0x19a   : > { %v838_v33 = vadd.f32 %v837_v31, %v822_v19  ;;  %v871_v34 = vadd.f32 %v870_v29, %v856_v28  ;;  %v862_v27 = vmul.f32 %v827_v16, %v809_v46 }
 0x19c   : > { %v839_v30 = vadd.f32 %v838_v33, %v823_v26  ;;  %v872_v58 = vadd.f32 %v871_v34, %v857_v32 }
 0x19e   : > { %v840_v12 = vadd.f32 %v839_v30, %v824_v11  ;;  %v873_v23 = vadd.f32 %v872_v58, %v858_v20 }
 0x1a0   : > { %v874_v14 = vadd.f32 %v873_v23, %v859_v63  ;;  %v841_v18 = vadd.f32 %v840_v12, %v825_v40 }
 0x1a2   : > { %v842_v21 = vadd.f32 %v841_v18, %v826_v57  ;;  %v875_v45 = vadd.f32 %v874_v14, %v860_v13 }
 0x1a4   : > { %v876_v19 = vadd.f32 %v875_v45, %v861_v25  ;;  %v843_v51 = vadd.f32 %v842_v21, %v827_v16 }
 0x1a6   : > { %v844_v28 = vadd.f32 %v843_v51, %v828_v24  ;;  %v877_v29 = vadd.f32 %v876_v19, %v862_v27 }
 0x1a8   : > { %845 = vst [vmem:[#allocation2] sm:$0xff] %v844_v28  ;;  %v878_v52 = vadd.f32 %v877_v29, %v846_v22 }
 0x1aa   : > { %879 = vst [vmem:[#allocation3] sm:$0xff] %v878_v52 }
 0x1ab PF: > { %p880_p10 = scmp.eq.s32.totalorder %s2948_s8, 2 }
 0x1ad   : > { %p881_p11 = pnand %p880_p10, %p498_p1 }
 0x1af   : > { %884 = sbr.rel (%p881_p11) target bundleno = 484 (0x1e4), region = 92 }
 0x1b4   : > { %v885_v17 = vld [vmem:[#allocation2] sm:$0xff]  ;;  %v893_v15 = vld [vmem:[#allocation3] sm:$0xff]  ;;  %v2972_v13 = vmov 0.0   ;;  %v918_v29 = vld [vmem:[#allocation15 + $0x1] sm:$0x1] }
 0x1b5   : > { %v886_v26 = vrot.slane %v885_v17, 4  ;;  %v894_v31 = vrot.slane %v893_v15, 4  ;;  %922 = vst [vmem:[#allocation2] sm:$0xff] %v2972_v13  ;;  %v904_v51 = vld [vmem:[%s3669_s5 + $0x1] sm:$0x1] }
 0x1b6   : > { %923 = vst [vmem:[#allocation3] sm:$0xff] %v2972_v13 }
 0x1b7   : > { %v887_v11 = vadd.f32 %v886_v26, %v885_v17  ;;  %v895_v32 = vadd.f32 %v894_v31, %v893_v15 }
 0x1b9   : > { %v888_v33 = vrot.slane %v887_v11, 2  ;;  %v896_v34 = vrot.slane %v895_v32, 2 }
 0x1bb   : > { %v889_v40 = vadd.f32 %v888_v33, %v887_v11  ;;  %v897_v30 = vadd.f32 %v896_v34, %v895_v32 }
 0x1bd   : > { %v890_v20 = vrot.slane %v889_v40, 1  ;;  %v898_v58 = vrot.slane %v897_v30, 1 }
 0x1bf   : > { %v891_v46 = vadd.f32 %v890_v20, %v889_v40  ;;  %v899_v63 = vadd.f32 %v898_v58, %v897_v30 }
 0x1c1   : > { %v892_v12 = vmul.f32 0.0033333334, %v891_v46  ;;  %v900_v23 = vmul.f32 0.0033333334, %v899_v63 }
 0x1c3   : > { %v901_v57 = vmul.f32 %v892_v12, %v892_v12 }
 0x1c5   : > { %v902_v14 = vsub.f32 %v900_v23, %v901_v57 }
 0x1c7   : > { %v903_v18 = vmax.f32 %v902_v14, 0.0 }
 0x1c9   : > { %v905_v16 = vadd.f32 1e-05, %v903_v18 }
 0x1cb   : > { %2631 = vrsqrt.f32 %v905_v16  ;;  %vm912_vm3 = vweird.f32 %v905_v16 }
 0x1d1   : > { %v2632_v21 = vpop.eup %2631 }
 0x1d2   : > { %v907_v25 = vmul.f32 %v2632_v21, %v905_v16  ;;  %vm913_vm4 = vweird.f32 %v2632_v21 }
 0x1d3   : > { %vm914_vm5 = vmor %vm912_vm3, %vm913_vm4 }
 0x1d4   : > { %v908_v45 = vmul.f32 %v2632_v21, %v907_v25 }
 0x1d6   : > { %v909_v24 = vmul.f32 0.5, %v908_v45 }
 0x1d8   : > { %v910_v19 = vsub.f32 1.5, %v909_v24 }
 0x1da   : > { %v911_v27 = vmul.f32 %v2632_v21, %v910_v19 }
 0x1dc   : > { %v915_v22 = vsel %vm914_vm5, %v2632_v21, %v911_v27 }
 0x1dd   : > { %v916_v28 = vmul.f32 %v915_v22, %v904_v51 }
 0x1df   : > { %917 = vst [vmem:[#allocation4 + $0x1] sm:$0x1] %v916_v28  ;;  %v919_v52 = vmul.f32 %v916_v28, %v892_v12 }
 0x1e1   : > { %v920_v17 = vsub.f32 %v918_v29, %v919_v52 }
 0x1e3   : > { %921 = vst [vmem:[#allocation5 + $0x1] sm:$0x1] %v920_v17 }
 0x1e4 PF: > { %p2146_p12 = scmp.ne.s32.totalorder %s2948_s8, 2 }
 0x1e6   : > { %926 = sbr.rel (%p2146_p12) target bundleno = 872 (0x368), region = 96 }
 0x1eb   : > { %v2329_v15 = vld [vmem:[#allocation9 + $0x38] sm:$0xff]  ;;  %v2328_v26 = vld [vmem:[#allocation9 + $0x30] sm:$0xff]  ;;  %v2327_v31 = vld [vmem:[#allocation9 + $0x28] sm:$0xff] }
 0x1ec   : > { %1051 = vmatpush.bf16.msra.mxu0 %v2329_v15  ;;  %2426 = vmatpush.bf16.msra.mxu2 %v2329_v15  ;;  %v2326_v11 = vld [vmem:[#allocation9 + $0x20] sm:$0xff]  ;;  %v2325_v32 = vld [vmem:[#allocation9 + $0x18] sm:$0xff]  ;;  %v2324_v34 = vld [vmem:[#allocation9 + $0x10] sm:$0xff] }
 0x1ed   : > { %v3409_v33 = vld [vmem:[#allocation4] ss:$0 sm:$0xff]  ;;  %v2634_v20 = vld [vmem:[#allocation5] ss:$0 sm:$0xff]  ;;  %v2323_v63 = vld [vmem:[#allocation9 + $0x8] sm:$0xff] }
 0x1ee   : > { %v945_v40 = vmul.f32 %v3409_v33, %v3274_v56  ;;  %v946_v30 = vmul.f32 %v3409_v33, %v3278_v59  ;;  %v953_v58 = vmul.f32 %v3409_v33, %v3293_v3  ;;  %v954_v46 = vmul.f32 %v3409_v33, %v3295_v4  ;;  %v2322_v14 = vld [vmem:[#allocation9] sm:$0xff]  ;;  %v2337_v52 = vld [vmem:[#allocation11 + $0x38] sm:$0xff]  ;;  %v2336_v17 = vld [vmem:[#allocation11 + $0x30] sm:$0xff] }
 0x1ef   : > { %v947_v21 = vmul.f32 %v3409_v33, %v3280_v60  ;;  %v948_v25 = vmul.f32 %v3409_v33, %v3282_v61  ;;  %v955_v45 = vmul.f32 %v3409_v33, %v3297_v5  ;;  %v956_v24 = vmul.f32 %v3409_v33, %v3299_v6  ;;  %1224 = vmatpush.bf16.msra.mxu1 %v2337_v52 }
 0x1f0   : > { %1052 = vmatpush.bf16.msra.mxu0 %v2328_v26  ;;  %2427 = vmatpush.bf16.msra.mxu2 %v2328_v26  ;;  %v963_v12 = vadd.f32 %v2634_v20, %v945_v40  ;;  %v964_v23 = vadd.f32 %v2634_v20, %v946_v30  ;;  %v971_v57 = vadd.f32 %v2634_v20, %v953_v58 }
 0x1f1   : > { %v972_v13 = vadd.f32 %v2634_v20, %v954_v46  ;;  %v965_v19 = vadd.f32 %v2634_v20, %v947_v21  ;;  %v966_v51 = vadd.f32 %v2634_v20, %v948_v25  ;;  %v973_v27 = vadd.f32 %v2634_v20, %v955_v45  ;;  %2434 = vmatpush.bf16.msra.mxu3 %v2337_v52  ;;  %v2334_v46 = vld [vmem:[#allocation11 + $0x20] sm:$0xff] }
 0x1f2   : > { %v979_v18 = vpack.c.bf16 %v964_v23, %v963_v12  ;;  %v974_v22 = vadd.f32 %v2634_v20, %v956_v24  ;;  %v949_v15 = vmul.f32 %v3409_v33, %v3284_v62  ;;  %v950_v26 = vmul.f32 %v3409_v33, %v3287_v0 }
 0x1f3   : > { %v983_v16 = vpack.c.bf16 %v972_v13, %v971_v57  ;;  %v980_v28 = vpack.c.bf16 %v966_v51, %v965_v19  ;;  %1225 = vmatpush.bf16.msra.mxu1 %v2336_v17  ;;  %v951_v23 = vmul.f32 %v3409_v33, %v3289_v1  ;;  %v952_v57 = vmul.f32 %v3409_v33, %v3291_v2  ;;  %v2333_v19 = vld [vmem:[#allocation11 + $0x18] sm:$0xff]  ;;  %v2332_v51 = vld [vmem:[#allocation11 + $0x10] sm:$0xff] }
 0x1f4   : > { %1053 = vmatpush.bf16.msra.mxu0 %v2327_v31  ;;  %2428 = vmatpush.bf16.msra.mxu2 %v2327_v31  ;;  %v984_v29 = vpack.c.bf16 %v974_v22, %v973_v27  ;;  %v957_v31 = vmul.f32 %v3409_v33, %v3301_v7  ;;  %v968_v40 = vadd.f32 %v2634_v20, %v950_v26  ;;  %v2331_v27 = vld [vmem:[#allocation11 + $0x8] sm:$0xff]  ;;  %v2330_v22 = vld [vmem:[#allocation11] sm:$0xff] }
 0x1f5   : > { %2435 = vmatpush.bf16.msra.mxu3 %v2336_v17  ;;  %v959_v13 = vmul.f32 %v3409_v33, %v3305_v9 }
 0x1f6   : > { %v975_v30 = vadd.f32 %v2634_v20, %v957_v31 }
 0x1f7   : > { %v977_v21 = vadd.f32 %v2634_v20, %v959_v13 }
 0x1f8   : > { %1054 = vmatpush.bf16.msra.mxu0 %v2326_v11  ;;  %2429 = vmatpush.bf16.msra.mxu2 %v2326_v11  ;;  %v958_v11 = vmul.f32 %v3409_v33, %v3303_v8 }
 0x1fa   : > { %v976_v58 = vadd.f32 %v2634_v20, %v958_v11 }
 0x1fc   : > { %1055 = vmatpush.bf16.msra.mxu0 %v2325_v32  ;;  %2430 = vmatpush.bf16.msra.mxu2 %v2325_v32  ;;  %v2335_v32 = vld [vmem:[#allocation11 + $0x28] sm:$0xff]  ;;  %v985_v12 = vpack.c.bf16 %v976_v58, %v975_v30 }
 0x1fd   : > { %1226 = vmatpush.bf16.msra.mxu1 %v2335_v32  ;;  %2436 = vmatpush.bf16.msra.mxu3 %v2335_v32 }
 0x200   : > { %1056 = vmatpush.bf16.msra.mxu0 %v2324_v34  ;;  %2431 = vmatpush.bf16.msra.mxu2 %v2324_v34  ;;  %v967_v34 = vadd.f32 %v2634_v20, %v949_v15 }
 0x201   : > { %1227 = vmatpush.bf16.msra.mxu1 %v2334_v46  ;;  %2437 = vmatpush.bf16.msra.mxu3 %v2334_v46 }
 0x204   : > { %1057 = vmatpush.bf16.msra.mxu0 %v2323_v63  ;;  %2432 = vmatpush.bf16.msra.mxu2 %v2323_v63  ;;  %v981_v63 = vpack.c.bf16 %v968_v40, %v967_v34 }
 0x205   : > { %1228 = vmatpush.bf16.msra.mxu1 %v2333_v19  ;;  %2438 = vmatpush.bf16.msra.mxu3 %v2333_v19 }
 0x208   : > { %1058 = vmatpush.bf16.msra.mxu0 %v2322_v14  ;;  %2433 = vmatpush.bf16.msra.mxu2 %v2322_v14  ;;  %v960_v14 = vmul.f32 %v3409_v33, %v3307_v10 }
 0x209   : > { %1229 = vmatpush.bf16.msra.mxu1 %v2332_v51  ;;  %2439 = vmatpush.bf16.msra.mxu3 %v2332_v51 }
 0x20a   : > { %v978_v25 = vadd.f32 %v2634_v20, %v960_v14 }
 0x20b   : > { %1059 = vmatmul.bf16.vlgmr.msra.gmra.mxu0 %v979_v18  ;;  %1079 = vmatmul.bf16.vlgmr.msra.gmra.mxu2 %v983_v16  ;;  %v969_v18 = vadd.f32 %v2634_v20, %v951_v23  ;;  %v970_v16 = vadd.f32 %v2634_v20, %v952_v57 }
 0x20c   : > { %v986_v24 = vpack.c.bf16 %v978_v25, %v977_v21 }
 0x20d   : > { %v982_v45 = vpack.c.bf16 %v970_v16, %v969_v18  ;;  %1230 = vmatpush.bf16.msra.mxu1 %v2331_v27  ;;  %2440 = vmatpush.bf16.msra.mxu3 %v2331_v27 }
 0x211   : > { %1231 = vmatpush.bf16.msra.mxu1 %v2330_v22  ;;  %2441 = vmatpush.bf16.msra.mxu3 %v2330_v22 }
 0x21b   : > { %1064 = vmatmul.bf16.gmra.mxu0 %v980_v28  ;;  %1084 = vmatmul.bf16.gmra.mxu2 %v984_v29  ;;  %v3443_v28 = vld [vmem:[#allocation4 + $0x1] ss:$0 sm:$0xff]  ;;  %v3446_v29 = vld [vmem:[#allocation5 + $0x1] ss:$0 sm:$0xff] }
 0x22b   : > { %1069 = vmatmul.bf16.gmra.mxu0 %v981_v63  ;;  %1089 = vmatmul.bf16.gmra.mxu2 %v985_v12 }
 0x23b   : > { %1074 = vmatmul.bf16.gmra.mxu0 %v982_v45  ;;  %1094 = vmatmul.bf16.gmra.mxu2 %v986_v24 }
 0x288   : > { %v1060_v33 = vpop.f32.mrf.mxu0 }
 0x289   : > { %v1102_v20 = vmul.f32 %v3443_v28, %v1060_v33 }
 0x28b   : > { %v1120_v15 = vadd.f32 %v3446_v29, %v1102_v20 }
 0x28d   : > { %v1136_v32 = vmax.f32 %v1120_v15, 0.0 }
 0x28e   : > { %v1080_v52 = vpop.f32.mrf.mxu2 }
 0x28f   : > { %v1110_v31 = vmul.f32 %v3443_v28, %v1080_v52 }
 0x290   : > { %v1062_v17 = vpop.f32.mrf.mxu0 }
 0x291   : > { %v1103_v26 = vmul.f32 %v3443_v28, %v1062_v17  ;;  %v1128_v30 = vadd.f32 %v3446_v29, %v1110_v31 }
 0x293   : > { %v1121_v11 = vadd.f32 %v3446_v29, %v1103_v26  ;;  %v1144_v23 = vmax.f32 %v1128_v30, 0.0 }
 0x295   : > { %v1137_v34 = vmax.f32 %v1121_v11, 0.0 }
 0x296   : > { %v1082_v40 = vpop.f32.mrf.mxu2 }
 0x297   : > { %v1111_v58 = vmul.f32 %v3443_v28, %v1082_v40  ;;  %v1152_v46 = vpack.c.bf16 %v1137_v34, %v1136_v32 }
 0x298   : > { %v1065_v63 = vpop.f32.mrf.mxu0 }
 0x299   : > { %v1129_v12 = vadd.f32 %v3446_v29, %v1111_v58  ;;  %1232 = vmatmul.bf16.vlgmr.msra.gmra.mxu1 %v1152_v46  ;;  %v1104_v13 = vmul.f32 %v3443_v28, %v1065_v63 }
 0x29b   : > { %v1145_v57 = vmax.f32 %v1129_v12, 0.0  ;;  %v1122_v21 = vadd.f32 %v3446_v29, %v1104_v13 }
 0x29d   : > { %v1156_v14 = vpack.c.bf16 %v1145_v57, %v1144_v23  ;;  %v1138_v19 = vmax.f32 %v1122_v21, 0.0 }
 0x29e   : > { %v1085_v18 = vpop.f32.mrf.mxu2 }
 0x29f   : > { %1252 = vmatmul.bf16.vlgmr.msra.gmra.mxu3 %v1156_v14  ;;  %v1112_v45 = vmul.f32 %v3443_v28, %v1085_v18 }
 0x2a0   : > { %v1067_v16 = vpop.f32.mrf.mxu0 }
 0x2a1   : > { %v1105_v25 = vmul.f32 %v3443_v28, %v1067_v16  ;;  %v1130_v22 = vadd.f32 %v3446_v29, %v1112_v45 }
 0x2a3   : > { %v1123_v24 = vadd.f32 %v3446_v29, %v1105_v25  ;;  %v1146_v15 = vmax.f32 %v1130_v22, 0.0 }
 0x2a5   : > { %v1139_v51 = vmax.f32 %v1123_v24, 0.0 }
 0x2a6   : > { %v1087_v27 = vpop.f32.mrf.mxu2 }
 0x2a7   : > { %v1113_v33 = vmul.f32 %v3443_v28, %v1087_v27  ;;  %v1153_v20 = vpack.c.bf16 %v1139_v51, %v1138_v19 }
 0x2a8   : > { %v1070_v52 = vpop.f32.mrf.mxu0 }
 0x2a9   : > { %v1131_v17 = vadd.f32 %v3446_v29, %v1113_v33  ;;  %1237 = vmatmul.bf16.gmra.mxu1 %v1153_v20  ;;  %v1106_v31 = vmul.f32 %v3443_v28, %v1070_v52 }
 0x2ab   : > { %v1147_v26 = vmax.f32 %v1131_v17, 0.0  ;;  %v1124_v40 = vadd.f32 %v3446_v29, %v1106_v31 }
 0x2ad   : > { %v1157_v11 = vpack.c.bf16 %v1147_v26, %v1146_v15  ;;  %v1140_v63 = vmax.f32 %v1124_v40, 0.0 }
 0x2ae   : > { %v1090_v32 = vpop.f32.mrf.mxu2 }
 0x2af   : > { %1257 = vmatmul.bf16.gmra.mxu3 %v1157_v11  ;;  %v1114_v58 = vmul.f32 %v3443_v28, %v1090_v32 }
 0x2b0   : > { %v1072_v34 = vpop.f32.mrf.mxu0 }
 0x2b1   : > { %v1107_v30 = vmul.f32 %v3443_v28, %v1072_v34  ;;  %v1132_v57 = vadd.f32 %v3446_v29, %v1114_v58 }
 0x2b3   : > { %v1125_v46 = vadd.f32 %v3446_v29, %v1107_v30  ;;  %v1148_v21 = vmax.f32 %v1132_v57, 0.0 }
 0x2b5   : > { %v1141_v12 = vmax.f32 %v1125_v46, 0.0 }
 0x2b6   : > { %v1092_v23 = vpop.f32.mrf.mxu2 }
 0x2b7   : > { %v1115_v13 = vmul.f32 %v3443_v28, %v1092_v23  ;;  %v1154_v14 = vpack.c.bf16 %v1141_v12, %v1140_v63 }
 0x2b8   : > { %v1075_v18 = vpop.f32.mrf.mxu0 }
 0x2b9   : > { %v1133_v16 = vadd.f32 %v3446_v29, %v1115_v13  ;;  %1242 = vmatmul.bf16.gmra.mxu1 %v1154_v14  ;;  %v1108_v45 = vmul.f32 %v3443_v28, %v1075_v18 }
 0x2bb   : > { %v1149_v25 = vmax.f32 %v1133_v16, 0.0  ;;  %v1126_v27 = vadd.f32 %v3446_v29, %v1108_v45 }
 0x2bd   : > { %v1158_v24 = vpack.c.bf16 %v1149_v25, %v1148_v21  ;;  %v1142_v52 = vmax.f32 %v1126_v27, 0.0 }
 0x2be   : > { %v1095_v19 = vpop.f32.mrf.mxu2 }
 0x2bf   : > { %1262 = vmatmul.bf16.gmra.mxu3 %v1158_v24  ;;  %v1116_v33 = vmul.f32 %v3443_v28, %v1095_v19 }
 0x2c0   : > { %v1077_v51 = vpop.f32.mrf.mxu0 }
 0x2c1   : > { %v1109_v22 = vmul.f32 %v3443_v28, %v1077_v51  ;;  %v1134_v26 = vadd.f32 %v3446_v29, %v1116_v33 }
 0x2c3   : > { %v1127_v20 = vadd.f32 %v3446_v29, %v1109_v22  ;;  %v1150_v34 = vmax.f32 %v1134_v26, 0.0 }
 0x2c5   : > { %v1143_v17 = vmax.f32 %v1127_v20, 0.0 }
 0x2c6   : > { %v1097_v15 = vpop.f32.mrf.mxu2 }
 0x2c7   : > { %v1117_v31 = vmul.f32 %v3443_v28, %v1097_v15  ;;  %v1155_v11 = vpack.c.bf16 %v1143_v17, %v1142_v52 }
 0x2c9   : > { %v1135_v32 = vadd.f32 %v3446_v29, %v1117_v31  ;;  %1247 = vmatmul.bf16.gmra.mxu1 %v1155_v11 }
 0x2cb   : > { %v1151_v40 = vmax.f32 %v1135_v32, 0.0 }
 0x2cd   : > { %v1159_v30 = vpack.c.bf16 %v1151_v40, %v1150_v34 }
 0x2cf   : > { %1267 = vmatmul.bf16.gmra.mxu3 %v1159_v30 }
 0x316   : > { %v1233_v58 = vpop.f32.mrf.mxu1 }
 0x317   : > { %v1273_v21 = vmul.f32 %v3222_v35, %v1233_v58 }
 0x319   : > { %v1308_v19 = vmul.f32 %v1273_v21, %v1233_v58 }
 0x31e   : > { %v1235_v46 = vpop.f32.mrf.mxu1 }
 0x31f   : > { %v1274_v28 = vmul.f32 %v3225_v36, %v1235_v46 }
 0x321   : > { %v1309_v45 = vmul.f32 %v1274_v28, %v1235_v46  ;;  %v1290_v51 = vadd.f32 %v1274_v28, %v1273_v21 }
 0x322   : > { %v1253_v63 = vpop.f32.mrf.mxu3 }
 0x323   : > { %v1324_v20 = vadd.f32 %v1309_v45, %v1308_v19 }
 0x326   : > { %v1238_v12 = vpop.f32.mrf.mxu1 }
 0x327   : > { %v1275_v29 = vmul.f32 %v3228_v37, %v1238_v12 }
 0x329   : > { %v1310_v27 = vmul.f32 %v1275_v29, %v1238_v12  ;;  %v1291_v52 = vadd.f32 %v1290_v51, %v1275_v29 }
 0x32a   : > { %v1255_v23 = vpop.f32.mrf.mxu3 }
 0x32b   : > { %v1325_v36 = vadd.f32 %v1324_v20, %v1310_v27 }
 0x32e   : > { %v1240_v57 = vpop.f32.mrf.mxu1 }
 0x32f   : > { %v1276_v24 = vmul.f32 %v3231_v38, %v1240_v57 }
 0x331   : > { %v1311_v17 = vmul.f32 %v1276_v24, %v1240_v57  ;;  %v1292_v26 = vadd.f32 %v1291_v52, %v1276_v24 }
 0x332   : > { %v1258_v13 = vpop.f32.mrf.mxu3 }
 0x333   : > { %v1326_v11 = vadd.f32 %v1325_v36, %v1311_v17  ;;  %v1283_v45 = vmul.f32 %v3255_v48, %v1258_v13 }
 0x336   : > { %v1243_v14 = vpop.f32.mrf.mxu1 }
 0x337   : > { %v1277_v22 = vmul.f32 %v3234_v39, %v1243_v14  ;;  %v1281_v39 = vmul.f32 %v3247_v44, %v1253_v63 }
 0x339   : > { %v1312_v35 = vmul.f32 %v1277_v22, %v1243_v14  ;;  %v1293_v32 = vadd.f32 %v1292_v26, %v1277_v22  ;;  %v1316_v29 = vmul.f32 %v1281_v39, %v1253_v63  ;;  %v1318_v22 = vmul.f32 %v1283_v45, %v1258_v13 }
 0x33a   : > { %v1260_v18 = vpop.f32.mrf.mxu3 }
 0x33b   : > { %v1327_v34 = vadd.f32 %v1326_v11, %v1312_v35  ;;  %v1284_v51 = vmul.f32 %v3258_v49, %v1260_v18 }
 0x33e   : > { %v1245_v16 = vpop.f32.mrf.mxu1 }
 0x33f   : > { %v1278_v15 = vmul.f32 %v3238_v41, %v1245_v16  ;;  %v1282_v41 = vmul.f32 %v3252_v47, %v1255_v23  ;;  %v1319_v47 = vmul.f32 %v1284_v51, %v1260_v18 }
 0x341   : > { %v1313_v38 = vmul.f32 %v1278_v15, %v1245_v16  ;;  %v1294_v40 = vadd.f32 %v1293_v32, %v1278_v15  ;;  %v1317_v19 = vmul.f32 %v1282_v41, %v1255_v23 }
 0x342   : > { %v1263_v25 = vpop.f32.mrf.mxu3 }
 0x343   : > { %v1328_v46 = vadd.f32 %v1327_v34, %v1313_v38  ;;  %v1289_v38 = vld [vmem:[#allocation2] sm:$0xff] }
 0x346   : > { %v1248_v33 = vpop.f32.mrf.mxu1 }
 0x347   : > { %v1279_v37 = vmul.f32 %v3241_v42, %v1248_v33 }
 0x349   : > { %v1314_v30 = vmul.f32 %v1279_v37, %v1248_v33  ;;  %v1295_v12 = vadd.f32 %v1294_v40, %v1279_v37  ;;  %v1285_v33 = vmul.f32 %v3261_v50, %v1263_v25  ;;  %v1307_v40 = vld [vmem:[#allocation3] sm:$0xff] }
 0x34a   : > { %v1265_v31 = vpop.f32.mrf.mxu3 }
 0x34b   : > { %v1329_v28 = vadd.f32 %v1328_v46, %v1314_v30  ;;  %v1286_v52 = vmul.f32 %v3266_v53, %v1265_v31  ;;  %v1320_v36 = vmul.f32 %v1285_v33, %v1263_v25 }
 0x34d   : > { %v1321_v35 = vmul.f32 %v1286_v52, %v1265_v31 }
 0x34e   : > { %v1250_v58 = vpop.f32.mrf.mxu1 }
 0x34f   : > { %v1280_v57 = vmul.f32 %v3244_v43, %v1250_v58 }
 0x351   : > { %v1296_v14 = vadd.f32 %v1295_v12, %v1280_v57  ;;  %v1315_v21 = vmul.f32 %v1280_v57, %v1250_v58 }
 0x352   : > { %v1268_v42 = vpop.f32.mrf.mxu3 }
 0x353   : > { %v1297_v16 = vadd.f32 %v1296_v14, %v1281_v39  ;;  %v1330_v24 = vadd.f32 %v1329_v28, %v1315_v21  ;;  %v1287_v48 = vmul.f32 %v3269_v54, %v1268_v42 }
 0x355   : > { %v1298_v27 = vadd.f32 %v1297_v16, %v1282_v41  ;;  %v1331_v44 = vadd.f32 %v1330_v24, %v1316_v29  ;;  %v1322_v50 = vmul.f32 %v1287_v48, %v1268_v42 }
 0x357   : > { %v1299_v43 = vadd.f32 %v1298_v27, %v1283_v45  ;;  %v1332_v20 = vadd.f32 %v1331_v44, %v1317_v19 }
 0x359   : > { %v1333_v17 = vadd.f32 %v1332_v20, %v1318_v22  ;;  %v1300_v15 = vadd.f32 %v1299_v43, %v1284_v51 }
 0x35a   : > { %v1270_v63 = vpop.f32.mrf.mxu3 }
 0x35b   : > { %v1301_v26 = vadd.f32 %v1300_v15, %v1285_v33  ;;  %v1334_v23 = vadd.f32 %v1333_v17, %v1319_v47  ;;  %v1288_v13 = vmul.f32 %v3272_v55, %v1270_v63 }
 0x35d   : > { %v1302_v49 = vadd.f32 %v1301_v26, %v1286_v52  ;;  %v1335_v37 = vadd.f32 %v1334_v23, %v1320_v36  ;;  %v1323_v53 = vmul.f32 %v1288_v13, %v1270_v63 }
 0x35f   : > { %v1303_v11 = vadd.f32 %v1302_v49, %v1287_v48  ;;  %v1336_v32 = vadd.f32 %v1335_v37, %v1321_v35 }
 0x361   : > { %v1337_v18 = vadd.f32 %v1336_v32, %v1322_v50  ;;  %v1304_v34 = vadd.f32 %v1303_v11, %v1288_v13 }
 0x363   : > { %v1305_v30 = vadd.f32 %v1304_v34, %v1289_v38  ;;  %v1338_v58 = vadd.f32 %v1337_v18, %v1323_v53 }
 0x365   : > { %1306 = vst [vmem:[#allocation2] sm:$0xff] %v1305_v30  ;;  %v1339_v25 = vadd.f32 %v1338_v58, %v1307_v40 }
 0x367   : > { %1340 = vst [vmem:[#allocation3] sm:$0xff] %v1339_v25 }
 0x368 PF: > { %p1341_p2 = scmp.eq.s32.totalorder %s2948_s8, 3 }
 0x36a   : > { %p1342_p13 = pnand %p1341_p2, %p498_p1 }
 0x36c   : > { %1345 = sbr.rel (%p1342_p13) target bundleno = 929 (0x3a1), region = 100 }
 0x371   : > { %v1346_v54 = vld [vmem:[#allocation2] sm:$0xff]  ;;  %v1354_v55 = vld [vmem:[#allocation3] sm:$0xff]  ;;  %v1379_v36 = vld [vmem:[#allocation15 + $0x2] sm:$0x1] }
 0x372   : > { %v1347_v31 = vrot.slane %v1346_v54, 4  ;;  %v1355_v39 = vrot.slane %v1354_v55, 4  ;;  %v1365_v52 = vld [vmem:[%s3669_s5 + $0x2] sm:$0x1] }
 0x374   : > { %v1348_v46 = vadd.f32 %v1347_v31, %v1346_v54  ;;  %v1356_v12 = vadd.f32 %v1355_v39, %v1354_v55 }
 0x376   : > { %v1349_v57 = vrot.slane %v1348_v46, 2  ;;  %v1357_v41 = vrot.slane %v1356_v12, 2 }
 0x378   : > { %v1350_v28 = vadd.f32 %v1349_v57, %v1348_v46  ;;  %v1358_v14 = vadd.f32 %v1357_v41, %v1356_v12 }
 0x37a   : > { %v1351_v21 = vrot.slane %v1350_v28, 1  ;;  %v1359_v42 = vrot.slane %v1358_v14, 1 }
 0x37c   : > { %v1352_v29 = vadd.f32 %v1351_v21, %v1350_v28  ;;  %v1360_v45 = vadd.f32 %v1359_v42, %v1358_v14 }
 0x37e   : > { %v1353_v16 = vmul.f32 0.0033333334, %v1352_v29  ;;  %v1361_v24 = vmul.f32 0.0033333334, %v1360_v45 }
 0x380   : > { %v1362_v19 = vmul.f32 %v1353_v16, %v1353_v16 }
 0x382   : > { %v1363_v51 = vsub.f32 %v1361_v24, %v1362_v19 }
 0x384   : > { %v1364_v27 = vmax.f32 %v1363_v51, 0.0 }
 0x386   : > { %v1366_v44 = vadd.f32 1e-05, %v1364_v27 }
 0x388   : > { %2637 = vrsqrt.f32 %v1366_v44  ;;  %vm1373_vm6 = vweird.f32 %v1366_v44 }
 0x38e   : > { %v2638_v22 = vpop.eup %2637 }
 0x38f   : > { %v1368_v33 = vmul.f32 %v2638_v22, %v1366_v44  ;;  %vm1374_vm7 = vweird.f32 %v2638_v22 }
 0x390   : > { %vm1375_vm8 = vmor %vm1373_vm6, %vm1374_vm7 }
 0x391   : > { %v1369_v43 = vmul.f32 %v2638_v22, %v1368_v33 }
 0x393   : > { %v1370_v20 = vmul.f32 0.5, %v1369_v43 }
 0x395   : > { %v1371_v47 = vsub.f32 1.5, %v1370_v20 }
 0x397   : > { %v1372_v17 = vmul.f32 %v2638_v22, %v1371_v47 }
 0x399   : > { %v1376_v15 = vsel %vm1375_vm8, %v2638_v22, %v1372_v17 }
 0x39a   : > { %v1377_v63 = vmul.f32 %v1376_v15, %v1365_v52 }
 0x39c   : > { %1378 = vst [vmem:[#allocation4 + $0x2] sm:$0x1] %v1377_v63  ;;  %v1380_v48 = vmul.f32 %v1377_v63, %v1353_v16 }
 0x39e   : > { %v1381_v26 = vsub.f32 %v1379_v36, %v1380_v48 }
 0x3a0   : > { %1382 = vst [vmem:[#allocation5 + $0x2] sm:$0x1] %v1381_v26 }
 0x3a1 PF: > { %p2211_p9 = scmp.ne.s32.totalorder %s2948_s8, 3 }
 0x3a3   : > { %1385 = sbr.rel (%p2211_p9) target bundleno = 1475 (0x5c3), region = 104 }
 0x3a8   : > { %v2345_v23 = vld [vmem:[#allocation9 + $0x38] sm:$0xff]  ;;  %v2344_v35 = vld [vmem:[#allocation9 + $0x30] sm:$0xff]  ;;  %v2343_v49 = vld [vmem:[#allocation9 + $0x28] sm:$0xff] }
 0x3a9   : > { %1510 = vmatpush.bf16.msra.mxu0 %v2345_v23  ;;  %2442 = vmatpush.bf16.msra.mxu3 %v2345_v23  ;;  %v2342_v37 = vld [vmem:[#allocation9 + $0x20] sm:$0xff]  ;;  %v2341_v13 = vld [vmem:[#allocation9 + $0x18] sm:$0xff]  ;;  %v2340_v50 = vld [vmem:[#allocation9 + $0x10] sm:$0xff] }
 0x3aa   : > { %v2639_v11 = vld [vmem:[#allocation4] ss:$0 sm:$0xff]  ;;  %v2640_v18 = vld [vmem:[#allocation5] ss:$0 sm:$0xff]  ;;  %v2339_v40 = vld [vmem:[#allocation9 + $0x8] sm:$0xff] }
 0x3ab   : > { %v1404_v32 = vmul.f32 %v2639_v11, %v3274_v56  ;;  %v1405_v38 = vmul.f32 %v2639_v11, %v3278_v59  ;;  %v1416_v34 = vmul.f32 %v2639_v11, %v3301_v7  ;;  %v1417_v53 = vmul.f32 %v2639_v11, %v3303_v8  ;;  %v2338_v55 = vld [vmem:[#allocation9] sm:$0xff]  ;;  %v2352_v20 = vld [vmem:[#allocation11 + $0x30] sm:$0xff]  ;;  %v2351_v47 = vld [vmem:[#allocation11 + $0x28] sm:$0xff] }
 0x3ac   : > { %v1406_v56 = vmul.f32 %v2639_v11, %v3280_v60  ;;  %v1407_v59 = vmul.f32 %v2639_v11, %v3282_v61  ;;  %v1418_v7 = vmul.f32 %v2639_v11, %v3305_v9  ;;  %v1419_v8 = vmul.f32 %v2639_v11, %v3307_v10  ;;  %v2346_v52 = vld [vmem:[#allocation11] sm:$0xff]  ;;  %v3520_v15 = vld [vmem:[#allocation4 + $0x1] ss:$0 sm:$0xff]  ;;  %v3523_v36 = vld [vmem:[#allocation5 + $0x1] ss:$0 sm:$0xff] }
 0x3ad   : > { %1511 = vmatpush.bf16.msra.mxu0 %v2344_v35  ;;  %2443 = vmatpush.bf16.msra.mxu3 %v2344_v35  ;;  %v1422_v30 = vadd.f32 %v2640_v18, %v1404_v32  ;;  %v1423_v58 = vadd.f32 %v2640_v18, %v1405_v38  ;;  %v1434_v25 = vadd.f32 %v2640_v18, %v1416_v34 }
 0x3ae   : > { %v1435_v54 = vadd.f32 %v2640_v18, %v1417_v53  ;;  %v1424_v46 = vadd.f32 %v2640_v18, %v1406_v56  ;;  %v1425_v12 = vadd.f32 %v2640_v18, %v1407_v59  ;;  %v1436_v57 = vadd.f32 %v2640_v18, %v1418_v7 }
 0x3af   : > { %v1438_v31 = vpack.c.bf16 %v1423_v58, %v1422_v30  ;;  %v1437_v41 = vadd.f32 %v2640_v18, %v1419_v8  ;;  %v1412_v21 = vmul.f32 %v2639_v11, %v3293_v3  ;;  %v1413_v42 = vmul.f32 %v2639_v11, %v3295_v4 }
 0x3b0   : > { %v1444_v39 = vpack.c.bf16 %v1435_v54, %v1434_v25  ;;  %v1439_v28 = vpack.c.bf16 %v1425_v12, %v1424_v46  ;;  %v1408_v61 = vmul.f32 %v2639_v11, %v3284_v62  ;;  %v1409_v9 = vmul.f32 %v2639_v11, %v3287_v0  ;;  %v2353_v0 = vld [vmem:[#allocation11 + $0x38] sm:$0xff] }
 0x3b1   : > { %1512 = vmatpush.bf16.msra.mxu0 %v2343_v49  ;;  %2444 = vmatpush.bf16.msra.mxu3 %v2343_v49  ;;  %v1445_v14 = vpack.c.bf16 %v1437_v41, %v1436_v57  ;;  %v1430_v29 = vadd.f32 %v2640_v18, %v1412_v21  ;;  %v1431_v60 = vadd.f32 %v2640_v18, %v1413_v42 }
 0x3b2   : > { %v1426_v10 = vadd.f32 %v2640_v18, %v1408_v61  ;;  %v1427_v16 = vadd.f32 %v2640_v18, %v1409_v9  ;;  %v1414_v19 = vmul.f32 %v2639_v11, %v3297_v5  ;;  %v1415_v51 = vmul.f32 %v2639_v11, %v3299_v6  ;;  %1683 = vmatpush.bf16.msra.mxu1 %v2353_v0  ;;  %v2350_v5 = vld [vmem:[#allocation11 + $0x20] sm:$0xff]  ;;  %v2347_v6 = vld [vmem:[#allocation11 + $0x8] sm:$0xff] }
 0x3b3   : > { %v1442_v45 = vpack.c.bf16 %v1431_v60, %v1430_v29  ;;  %v1410_v3 = vmul.f32 %v2639_v11, %v3289_v1  ;;  %v1411_v4 = vmul.f32 %v2639_v11, %v3291_v2  ;;  %v2349_v1 = vld [vmem:[#allocation11 + $0x18] sm:$0xff]  ;;  %v2348_v2 = vld [vmem:[#allocation11 + $0x10] sm:$0xff] }
 0x3b4   : > { %v1440_v24 = vpack.c.bf16 %v1427_v16, %v1426_v10  ;;  %v1432_v27 = vadd.f32 %v2640_v18, %v1414_v19  ;;  %v1433_v44 = vadd.f32 %v2640_v18, %v1415_v51 }
 0x3b5   : > { %1513 = vmatpush.bf16.msra.mxu0 %v2342_v37  ;;  %2445 = vmatpush.bf16.msra.mxu3 %v2342_v37  ;;  %v1428_v33 = vadd.f32 %v2640_v18, %v1410_v3  ;;  %v1429_v62 = vadd.f32 %v2640_v18, %v1411_v4 }
 0x3b6   : > { %v1443_v22 = vpack.c.bf16 %v1433_v44, %v1432_v27  ;;  %1684 = vmatpush.bf16.msra.mxu1 %v2352_v20 }
 0x3b7   : > { %v1441_v43 = vpack.c.bf16 %v1429_v62, %v1428_v33 }
 0x3b9   : > { %1514 = vmatpush.bf16.msra.mxu0 %v2341_v13  ;;  %2446 = vmatpush.bf16.msra.mxu3 %v2341_v13 }
 0x3ba   : > { %1685 = vmatpush.bf16.msra.mxu1 %v2351_v47 }
 0x3bd   : > { %1515 = vmatpush.bf16.msra.mxu0 %v2340_v50  ;;  %2447 = vmatpush.bf16.msra.mxu3 %v2340_v50 }
 0x3be   : > { %1686 = vmatpush.bf16.msra.mxu1 %v2350_v5 }
 0x3c1   : > { %1516 = vmatpush.bf16.msra.mxu0 %v2339_v40  ;;  %2448 = vmatpush.bf16.msra.mxu3 %v2339_v40 }
 0x3c2   : > { %1687 = vmatpush.bf16.msra.mxu1 %v2349_v1 }
 0x3c5   : > { %1517 = vmatpush.bf16.msra.mxu0 %v2338_v55  ;;  %2449 = vmatpush.bf16.msra.mxu3 %v2338_v55 }
 0x3c6   : > { %1688 = vmatpush.bf16.msra.mxu1 %v2348_v2 }
 0x3c8   : > { %1518 = vmatmul.bf16.vlgmr.msra.gmra.mxu0 %v1438_v31  ;;  %1548 = vmatmul.bf16.vlgmr.msra.gmra.mxu3 %v1444_v39 }
 0x3c9   : > { %2450 = vmatpush.bf16.msrb.mxu3 %v2353_v0 }
 0x3ca   : > { %1689 = vmatpush.bf16.msra.mxu1 %v2347_v6 }
 0x3cd   : > { %2451 = vmatpush.bf16.msrb.mxu3 %v2352_v20  ;;  %v2361_v20 = vld [vmem:[#allocation12 + $0x38] sm:$0xff] }
 0x3ce   : > { %1690 = vmatpush.bf16.msra.mxu1 %v2346_v52  ;;  %1860 = vmatpush.bf16.msra.mxu2 %v2361_v20 }
 0x3d1   : > { %2452 = vmatpush.bf16.msrb.mxu3 %v2351_v47  ;;  %v2360_v47 = vld [vmem:[#allocation12 + $0x30] sm:$0xff] }
 0x3d2   : > { %1861 = vmatpush.bf16.msra.mxu2 %v2360_v47 }
 0x3d5   : > { %2453 = vmatpush.bf16.msrb.mxu3 %v2350_v5 }
 0x3d8   : > { %1523 = vmatmul.bf16.gmra.mxu0 %v1439_v28  ;;  %1553 = vmatmul.bf16.gmra.mxu3 %v1445_v14 }
 0x3d9   : > { %2454 = vmatpush.bf16.msrb.mxu3 %v2349_v1  ;;  %v2359_v1 = vld [vmem:[#allocation12 + $0x28] sm:$0xff] }
 0x3da   : > { %1862 = vmatpush.bf16.msra.mxu2 %v2359_v1 }
 0x3dd   : > { %2455 = vmatpush.bf16.msrb.mxu3 %v2348_v2 }
 0x3e1   : > { %2456 = vmatpush.bf16.msrb.mxu3 %v2347_v6 }
 0x3e5   : > { %2457 = vmatpush.bf16.msrb.mxu3 %v2346_v52 }
 0x3e8   : > { %1528 = vmatmul.bf16.gmra.mxu0 %v1440_v24 }
 0x3e9   : > { %2458 = vmatpush.bf16.msra.mxu3 %v2361_v20 }
 0x3ed   : > { %2459 = vmatpush.bf16.msra.mxu3 %v2360_v47 }
 0x3f1   : > { %2460 = vmatpush.bf16.msra.mxu3 %v2359_v1 }
 0x3f8   : > { %1533 = vmatmul.bf16.gmra.mxu0 %v1441_v43 }
 0x408   : > { %1538 = vmatmul.bf16.gmra.mxu0 %v1442_v45 }
 0x418   : > { %1543 = vmatmul.bf16.gmra.mxu0 %v1443_v22 }
 0x445   : > { %v1519_v17 = vpop.f32.mrf.mxu0 }
 0x446   : > { %v1561_v63 = vmul.f32 %v3520_v15, %v1519_v17 }
 0x448   : > { %v1579_v23 = vadd.f32 %v3523_v36, %v1561_v63  ;;  %v2358_v63 = vld [vmem:[#allocation12 + $0x20] sm:$0xff] }
 0x449   : > { %1863 = vmatpush.bf16.msra.mxu2 %v2358_v63  ;;  %2461 = vmatpush.bf16.msra.mxu3 %v2358_v63 }
 0x44a   : > { %v1595_v13 = vmax.f32 %v1579_v23, 0.0 }
 0x44b   : > { %v1549_v48 = vpop.f32.mrf.mxu3 }
 0x44c   : > { %v1573_v49 = vmul.f32 %v3520_v15, %v1549_v48 }
 0x44d   : > { %v1521_v26 = vpop.f32.mrf.mxu0 }
 0x44e   : > { %v1562_v35 = vmul.f32 %v3520_v15, %v1521_v26  ;;  %v1591_v50 = vadd.f32 %v3523_v36, %v1573_v49 }
 0x450   : > { %v1580_v37 = vadd.f32 %v3523_v36, %v1562_v35  ;;  %v1607_v53 = vmax.f32 %v1591_v50, 0.0 }
 0x452   : > { %v1596_v11 = vmax.f32 %v1580_v37, 0.0 }
 0x453   : > { %v1551_v32 = vpop.f32.mrf.mxu3 }
 0x454   : > { %v1611_v38 = vpack.c.bf16 %v1596_v11, %v1595_v13  ;;  %v1574_v18 = vmul.f32 %v3520_v15, %v1551_v32 }
 0x455   : > { %v1524_v34 = vpop.f32.mrf.mxu0 }
 0x456   : > { %1691 = vmatmul.bf16.vlgmr.msra.gmra.mxu1 %v1611_v38  ;;  %v1592_v40 = vadd.f32 %v3523_v36, %v1574_v18  ;;  %v1563_v58 = vmul.f32 %v3520_v15, %v1524_v34  ;;  %v2357_v34 = vld [vmem:[#allocation12 + $0x18] sm:$0xff] }
 0x457   : > { %1864 = vmatpush.bf16.msra.mxu2 %v2357_v34  ;;  %2462 = vmatpush.bf16.msra.mxu3 %v2357_v34 }
 0x458   : > { %v1608_v30 = vmax.f32 %v1592_v40, 0.0  ;;  %v1581_v31 = vadd.f32 %v3523_v36, %v1563_v58  ;;  %v2355_v40 = vld [vmem:[#allocation12 + $0x8] sm:$0xff] }
 0x45a   : > { %v1617_v25 = vpack.c.bf16 %v1608_v30, %v1607_v53  ;;  %v1597_v7 = vmax.f32 %v1581_v31, 0.0  ;;  %v2356_v53 = vld [vmem:[#allocation12 + $0x10] sm:$0xff]  ;;  %v2354_v30 = vld [vmem:[#allocation12] sm:$0xff] }
 0x45b   : > { %v1554_v54 = vpop.f32.mrf.mxu3  ;;  %1865 = vmatpush.bf16.msra.mxu2 %v2356_v53  ;;  %2463 = vmatpush.bf16.msra.mxu3 %v2356_v53 }
 0x45c   : > { %1721 = vmatmul.bf16.vlgmr.msrb.gmra.mxu3 %v1617_v25  ;;  %v1575_v56 = vmul.f32 %v3520_v15, %v1554_v54  ;;  %v3559_v25 = vld [vmem:[#allocation5 + $0x2] ss:$0 sm:$0xff] }
 0x45d   : > { %v1526_v55 = vpop.f32.mrf.mxu0 }
 0x45e   : > { %v1564_v39 = vmul.f32 %v3520_v15, %v1526_v55  ;;  %v1593_v46 = vadd.f32 %v3523_v36, %v1575_v56 }
 0x45f   : > { %1866 = vmatpush.bf16.msra.mxu2 %v2355_v40  ;;  %2464 = vmatpush.bf16.msra.mxu3 %v2355_v40 }
 0x460   : > { %v1582_v59 = vadd.f32 %v3523_v36, %v1564_v39  ;;  %v1609_v14 = vmax.f32 %v1593_v46, 0.0 }
 0x462   : > { %v1598_v8 = vmax.f32 %v1582_v59, 0.0 }
 0x463   : > { %v1556_v12 = vpop.f32.mrf.mxu3  ;;  %1867 = vmatpush.bf16.msra.mxu2 %v2354_v30  ;;  %2465 = vmatpush.bf16.msra.mxu3 %v2354_v30 }
 0x464   : > { %v1612_v57 = vpack.c.bf16 %v1598_v8, %v1597_v7  ;;  %v1576_v41 = vmul.f32 %v3520_v15, %v1556_v12 }
 0x465   : > { %v1529_v28 = vpop.f32.mrf.mxu0 }
 0x466   : > { %1696 = vmatmul.bf16.gmra.mxu1 %v1612_v57  ;;  %v1594_v21 = vadd.f32 %v3523_v36, %v1576_v41  ;;  %v1565_v29 = vmul.f32 %v3520_v15, %v1529_v28 }
 0x468   : > { %v1610_v42 = vmax.f32 %v1594_v21, 0.0  ;;  %v1583_v9 = vadd.f32 %v3523_v36, %v1565_v29 }
 0x46a   : > { %v1618_v60 = vpack.c.bf16 %v1610_v42, %v1609_v14  ;;  %v1599_v16 = vmax.f32 %v1583_v9, 0.0 }
 0x46c   : > { %1726 = vmatmul.bf16.gmra.mxu3 %v1618_v60 }
 0x46d   : > { %v1531_v61 = vpop.f32.mrf.mxu0 }
 0x46e   : > { %v1566_v45 = vmul.f32 %v3520_v15, %v1531_v61 }
 0x470   : > { %v1584_v10 = vadd.f32 %v3523_v36, %v1566_v45 }
 0x472   : > { %v1600_v24 = vmax.f32 %v1584_v10, 0.0 }
 0x474   : > { %v1613_v19 = vpack.c.bf16 %v1600_v24, %v1599_v16 }
 0x475   : > { %v1534_v51 = vpop.f32.mrf.mxu0 }
 0x476   : > { %1701 = vmatmul.bf16.gmra.mxu1 %v1613_v19  ;;  %v1567_v27 = vmul.f32 %v3520_v15, %v1534_v51 }
 0x478   : > { %v1585_v3 = vadd.f32 %v3523_v36, %v1567_v27 }
 0x47a   : > { %v1601_v33 = vmax.f32 %v1585_v3, 0.0 }
 0x47d   : > { %v1536_v44 = vpop.f32.mrf.mxu0 }
 0x47e   : > { %v1568_v4 = vmul.f32 %v3520_v15, %v1536_v44 }
 0x480   : > { %v1586_v22 = vadd.f32 %v3523_v36, %v1568_v4 }
 0x482   : > { %v1602_v62 = vmax.f32 %v1586_v22, 0.0 }
 0x484   : > { %v1614_v43 = vpack.c.bf16 %v1602_v62, %v1601_v33 }
 0x485   : > { %v1539_v0 = vpop.f32.mrf.mxu0 }
 0x486   : > { %1706 = vmatmul.bf16.gmra.mxu1 %v1614_v43  ;;  %v1569_v5 = vmul.f32 %v3520_v15, %v1539_v0 }
 0x488   : > { %v1587_v6 = vadd.f32 %v3523_v36, %v1569_v5 }
 0x48a   : > { %v1603_v48 = vmax.f32 %v1587_v6, 0.0 }
 0x48d   : > { %v1541_v2 = vpop.f32.mrf.mxu0 }
 0x48e   : > { %v1570_v52 = vmul.f32 %v3520_v15, %v1541_v2 }
 0x490   : > { %v1588_v17 = vadd.f32 %v3523_v36, %v1570_v52 }
 0x492   : > { %v1604_v26 = vmax.f32 %v1588_v17, 0.0 }
 0x494   : > { %v1615_v23 = vpack.c.bf16 %v1604_v26, %v1603_v48 }
 0x495   : > { %v1544_v35 = vpop.f32.mrf.mxu0 }
 0x496   : > { %1711 = vmatmul.bf16.gmra.mxu1 %v1615_v23  ;;  %v1571_v49 = vmul.f32 %v3520_v15, %v1544_v35 }
 0x498   : > { %v1589_v13 = vadd.f32 %v3523_v36, %v1571_v49 }
 0x49a   : > { %v1605_v32 = vmax.f32 %v1589_v13, 0.0 }
 0x49d   : > { %v1546_v37 = vpop.f32.mrf.mxu0 }
 0x49e   : > { %v1572_v11 = vmul.f32 %v3520_v15, %v1546_v37  ;;  %v3556_v15 = vld [vmem:[#allocation4 + $0x2] ss:$0 sm:$0xff] }
 0x4a0   : > { %v1590_v50 = vadd.f32 %v3523_v36, %v1572_v11 }
 0x4a2   : > { %v1606_v38 = vmax.f32 %v1590_v50, 0.0 }
 0x4a4   : > { %v1616_v18 = vpack.c.bf16 %v1606_v38, %v1605_v32 }
 0x4a6   : > { %1716 = vmatmul.bf16.gmra.mxu1 %v1616_v18 }
 0x4d3   : > { %v1692_v58 = vpop.f32.mrf.mxu1 }
 0x4d4   : > { %v1734_v36 = vmul.f32 %v3556_v15, %v1692_v58 }
 0x4d6   : > { %v1752_v55 = vadd.f32 %v3559_v25, %v1734_v36 }
 0x4d8   : > { %v1768_v59 = vmax.f32 %v1752_v55, 0.0 }
 0x4db   : > { %v1694_v54 = vpop.f32.mrf.mxu1 }
 0x4dc   : > { %v1735_v31 = vmul.f32 %v3556_v15, %v1694_v54 }
 0x4de   : > { %v1753_v39 = vadd.f32 %v3559_v25, %v1735_v31 }
 0x4df   : > { %v1722_v56 = vpop.f32.mrf.mxu3 }
 0x4e0   : > { %v1769_v7 = vmax.f32 %v1753_v39, 0.0  ;;  %v1746_v46 = vmul.f32 %v3556_v15, %v1722_v56 }
 0x4e2   : > { %v1784_v8 = vpack.c.bf16 %v1769_v7, %v1768_v59  ;;  %v1764_v57 = vadd.f32 %v3559_v25, %v1746_v46  ;;  %v2645_v46 = vld [vmem:[#allocation14] ss:$0 sm:$0xff] }
 0x4e3   : > { %v1697_v12 = vpop.f32.mrf.mxu1 }
 0x4e4   : > { %1868 = vmatmul.bf16.vlgmr.msra.gmra.mxu2 %v1784_v8  ;;  %v1736_v28 = vmul.f32 %v3556_v15, %v1697_v12  ;;  %v1780_v21 = vmax.f32 %v1764_v57, 0.0 }
 0x4e6   : > { %v1754_v60 = vadd.f32 %v3559_v25, %v1736_v28 }
 0x4e7   : > { %v1724_v41 = vpop.f32.mrf.mxu3 }
 0x4e8   : > { %v1747_v14 = vmul.f32 %v3556_v15, %v1724_v41  ;;  %v1770_v24 = vmax.f32 %v1754_v60, 0.0 }
 0x4ea   : > { %v1765_v42 = vadd.f32 %v3559_v25, %v1747_v14 }
 0x4eb   : > { %v1699_v29 = vpop.f32.mrf.mxu1 }
 0x4ec   : > { %v1737_v61 = vmul.f32 %v3556_v15, %v1699_v29  ;;  %v1781_v9 = vmax.f32 %v1765_v42, 0.0 }
 0x4ee   : > { %v1755_v45 = vadd.f32 %v3559_v25, %v1737_v61  ;;  %v1790_v10 = vpack.c.bf16 %v1781_v9, %v1780_v21 }
 0x4ef   : > { %v1727_v16 = vpop.f32.mrf.mxu3 }
 0x4f0   : > { %v1771_v19 = vmax.f32 %v1755_v45, 0.0  ;;  %1898 = vmatmul.bf16.vlgmr.msra.gmra.mxu3 %v1790_v10  ;;  %v1748_v27 = vmul.f32 %v3556_v15, %v1727_v16 }
 0x4f2   : > { %v1785_v51 = vpack.c.bf16 %v1771_v19, %v1770_v24  ;;  %v1766_v3 = vadd.f32 %v3559_v25, %v1748_v27 }
 0x4f3   : > { %v1702_v44 = vpop.f32.mrf.mxu1 }
 0x4f4   : > { %1873 = vmatmul.bf16.gmra.mxu2 %v1785_v51  ;;  %v1738_v22 = vmul.f32 %v3556_v15, %v1702_v44  ;;  %v1782_v62 = vmax.f32 %v1766_v3, 0.0 }
 0x4f6   : > { %v1756_v20 = vadd.f32 %v3559_v25, %v1738_v22 }
 0x4f7   : > { %v1729_v4 = vpop.f32.mrf.mxu3 }
 0x4f8   : > { %v1749_v33 = vmul.f32 %v3556_v15, %v1729_v4  ;;  %v1772_v6 = vmax.f32 %v1756_v20, 0.0 }
 0x4fa   : > { %v1767_v43 = vadd.f32 %v3559_v25, %v1749_v33 }
 0x4fb   : > { %v1704_v0 = vpop.f32.mrf.mxu1 }
 0x4fc   : > { %v1739_v47 = vmul.f32 %v3556_v15, %v1704_v0  ;;  %v1783_v5 = vmax.f32 %v1767_v43, 0.0 }
 0x4fe   : > { %v1757_v1 = vadd.f32 %v3559_v25, %v1739_v47  ;;  %v1791_v2 = vpack.c.bf16 %v1783_v5, %v1782_v62 }
 0x500   : > { %v1773_v52 = vmax.f32 %v1757_v1, 0.0  ;;  %1903 = vmatmul.bf16.gmra.mxu3 %v1791_v2 }
 0x502   : > { %v1786_v17 = vpack.c.bf16 %v1773_v52, %v1772_v6 }
 0x503   : > { %v1707_v63 = vpop.f32.mrf.mxu1 }
 0x504   : > { %1878 = vmatmul.bf16.gmra.mxu2 %v1786_v17  ;;  %v1740_v48 = vmul.f32 %v3556_v15, %v1707_v63 }
 0x506   : > { %v1758_v23 = vadd.f32 %v3559_v25, %v1740_v48 }
 0x508   : > { %v1774_v37 = vmax.f32 %v1758_v23, 0.0 }
 0x50b   : > { %v1709_v26 = vpop.f32.mrf.mxu1 }
 0x50c   : > { %v1741_v35 = vmul.f32 %v3556_v15, %v1709_v26 }
 0x50e   : > { %v1759_v49 = vadd.f32 %v3559_v25, %v1741_v35 }
 0x510   : > { %v1775_v13 = vmax.f32 %v1759_v49, 0.0 }
 0x512   : > { %v1787_v11 = vpack.c.bf16 %v1775_v13, %v1774_v37 }
 0x513   : > { %v1712_v50 = vpop.f32.mrf.mxu1 }
 0x514   : > { %1883 = vmatmul.bf16.gmra.mxu2 %v1787_v11  ;;  %v1742_v32 = vmul.f32 %v3556_v15, %v1712_v50 }
 0x516   : > { %v1760_v18 = vadd.f32 %v3559_v25, %v1742_v32 }
 0x518   : > { %v1776_v40 = vmax.f32 %v1760_v18, 0.0 }
 0x51b   : > { %v1714_v38 = vpop.f32.mrf.mxu1 }
 0x51c   : > { %v1743_v34 = vmul.f32 %v3556_v15, %v1714_v38 }
 0x51e   : > { %v1761_v53 = vadd.f32 %v3559_v25, %v1743_v34 }
 0x520   : > { %v1777_v30 = vmax.f32 %v1761_v53, 0.0 }
 0x522   : > { %v1788_v58 = vpack.c.bf16 %v1777_v30, %v1776_v40 }
 0x523   : > { %v1717_v36 = vpop.f32.mrf.mxu1 }
 0x524   : > { %1888 = vmatmul.bf16.gmra.mxu2 %v1788_v58  ;;  %v1744_v54 = vmul.f32 %v3556_v15, %v1717_v36 }
 0x526   : > { %v1762_v31 = vadd.f32 %v3559_v25, %v1744_v54 }
 0x528   : > { %v1778_v59 = vmax.f32 %v1762_v31, 0.0 }
 0x52b   : > { %v1719_v55 = vpop.f32.mrf.mxu1 }
 0x52c   : > { %v1745_v39 = vmul.f32 %v3556_v15, %v1719_v55 }
 0x52e   : > { %v1763_v56 = vadd.f32 %v3559_v25, %v1745_v39 }
 0x530   : > { %v1779_v7 = vmax.f32 %v1763_v56, 0.0 }
 0x532   : > { %v1789_v8 = vpack.c.bf16 %v1779_v7, %v1778_v59 }
 0x534   : > { %1893 = vmatmul.bf16.gmra.mxu2 %v1789_v8 }
 0x567   : > { %v1869_v12 = vpop.f32.mrf.mxu2 }
 0x568   : > { %v1870_v57 = vadd.f32 %v2645_v46, %v1869_v12 }
 0x56a   : > { %1909 = vst [vmem:[%s3310_s24] sm:$0xff] %v1870_v57 }
 0x56f   : > { %v1871_v41 = vpop.f32.mrf.mxu2 }
 0x570   : > { %v1872_v28 = vadd.f32 %v2645_v46, %v1871_v41 }
 0x572   : > { %1910 = vst [vmem:[%s3310_s24 + $0x8] sm:$0xff] %v1872_v28 }
 0x573   : > { %v1899_v14 = vpop.f32.mrf.mxu3 }
 0x574   : > { %v1900_v21 = vadd.f32 %v2645_v46, %v1899_v14 }
 0x576   : > { %1921 = vst [vmem:[%s3310_s24 + $0x60] sm:$0xff] %v1900_v21 }
 0x577   : > { %v1874_v15 = vpop.f32.mrf.mxu2 }
 0x578   : > { %v1875_v25 = vadd.f32 %v2645_v46, %v1874_v15 }
 0x57a   : > { %1911 = vst [vmem:[%s3310_s24 + $0x10] sm:$0xff] %v1875_v25 }
 0x57b   : > { %v1901_v42 = vpop.f32.mrf.mxu3 }
 0x57c   : > { %v1902_v29 = vadd.f32 %v2645_v46, %v1901_v42 }
 0x57e   : > { %1922 = vst [vmem:[%s3310_s24 + $0x68] sm:$0xff] %v1902_v29 }
 0x57f   : > { %v1876_v60 = vpop.f32.mrf.mxu2 }
 0x580   : > { %v1877_v61 = vadd.f32 %v2645_v46, %v1876_v60 }
 0x582   : > { %1912 = vst [vmem:[%s3310_s24 + $0x18] sm:$0xff] %v1877_v61 }
 0x583   : > { %v1904_v9 = vpop.f32.mrf.mxu3 }
 0x584   : > { %v1905_v45 = vadd.f32 %v2645_v46, %v1904_v9 }
 0x586   : > { %1923 = vst [vmem:[%s3310_s24 + $0x70] sm:$0xff] %v1905_v45 }
 0x587   : > { %v1879_v10 = vpop.f32.mrf.mxu2 }
 0x588   : > { %v1880_v16 = vadd.f32 %v2645_v46, %v1879_v10 }
 0x58a   : > { %1913 = vst [vmem:[%s3310_s24 + $0x20] sm:$0xff] %v1880_v16 }
 0x58b   : > { %v1906_v24 = vpop.f32.mrf.mxu3 }
 0x58c   : > { %v1907_v19 = vadd.f32 %v2645_v46, %v1906_v24 }
 0x58e   : > { %1924 = vst [vmem:[%s3310_s24 + $0x78] sm:$0xff] %v1907_v19 }
 0x58f   : > { %v1881_v51 = vpop.f32.mrf.mxu2 }
 0x590   : > { %v1882_v27 = vadd.f32 %v2645_v46, %v1881_v51 }
 0x592   : > { %1914 = vst [vmem:[%s3310_s24 + $0x28] sm:$0xff] %v1882_v27 }
 0x597   : > { %v1884_v44 = vpop.f32.mrf.mxu2 }
 0x598   : > { %v1885_v3 = vadd.f32 %v2645_v46, %v1884_v44 }
 0x59a   : > { %1915 = vst [vmem:[%s3310_s24 + $0x30] sm:$0xff] %v1885_v3 }
 0x59f   : > { %v1886_v4 = vpop.f32.mrf.mxu2 }
 0x5a0   : > { %v1887_v22 = vadd.f32 %v2645_v46, %v1886_v4 }
 0x5a2   : > { %1916 = vst [vmem:[%s3310_s24 + $0x38] sm:$0xff] %v1887_v22 }
 0x5a7   : > { %v1889_v33 = vpop.f32.mrf.mxu2 }
 0x5a8   : > { %v1890_v62 = vadd.f32 %v2645_v46, %v1889_v33 }
 0x5aa   : > { %1917 = vst [vmem:[%s3310_s24 + $0x40] sm:$0xff] %v1890_v62 }
 0x5af   : > { %v1891_v43 = vpop.f32.mrf.mxu2 }
 0x5b0   : > { %v1892_v0 = vadd.f32 %v2645_v46, %v1891_v43 }
 0x5b2   : > { %1918 = vst [vmem:[%s3310_s24 + $0x48] sm:$0xff] %v1892_v0 }
 0x5b7   : > { %v1894_v20 = vpop.f32.mrf.mxu2 }
 0x5b8   : > { %v1895_v47 = vadd.f32 %v2645_v46, %v1894_v20 }
 0x5ba   : > { %1919 = vst [vmem:[%s3310_s24 + $0x50] sm:$0xff] %v1895_v47 }
 0x5bf   : > { %v1896_v5 = vpop.f32.mrf.mxu2 }
 0x5c0   : > { %v1897_v1 = vadd.f32 %v2645_v46, %v1896_v5 }
 0x5c2   : > { %1920 = vst [vmem:[%s3310_s24 + $0x58] sm:$0xff] %v1897_v1 }
 0x5c3 PF: > { %s1940_s7 = sshll.u32 %s3310_s24, 4  ;;  %s3730_s30 = smov (!%p1341_p2, %s2944_s30), 0  ;;  %s1941_s7 = int_to_ptr.vmem [resolvable:$true] %s1940_s7 }
 0x5c4   : > { %s2362_s15 = sshll.u32 %s3730_s30, 7  ;;  %s3708_s19 = sld [smem:[#allocation33_spill]] }
 0x5c5   : > { %s1926_s17 = scalar_lea.sflag [#allocation8], %s391_s4 }
 0x5ca   : > { %s1939_s2 = scalar_lea.hbm %s3708_s19, %s2362_s15  ;;  %s2846_s1 = scalar_lea.hbm %s3708_s19, 384 }
 0x5cb   : > { %s1942_s6 = sshll.u32 %s1939_s2, 4  ;;  %s1943_s6 = int_to_ptr.hbm [resolvable:$true] %s1942_s6 }
 0x5cc   : > { %s2840_s14 = sshra.s32 %s1943_s6, 4  ;;  %s2841_s14 = int_to_ptr.hbm [resolvable:$true] %s2840_s14 }
 0x5cd   : > { %s2842_s13 = scalar_lea.hbm %s2841_s14, 128  ;;  %p2847_p4 = scmp.lt.s32.totalorder %s2841_s14, %s3708_s19 }
 0x5ce   : > { %p2843_p1 = scmp.ne.s32.totalorder %s2841_s14, %s2842_s13  ;;  %p2848_p5 = scmp.lt.s32.totalorder %s2846_s1, %s2842_s13 }
 0x5d0   : > { %p2844_p0 = pnand %p2843_p1, %p3081_p6  ;;  %p2849_p7 = por %p2848_p5, %p2847_p4 }
 0x5d2   : > { %p2845_p3 = pneg %p2844_p0 }
 0x5d4   : > { %p2850_p10 = pnand %p2849_p7, %p2845_p3 }
 0x5d6   : > { %2853 = shalt.err (!%p2850_p10)
}
 0x5d7   : > { %s2973_s4 = smov 128   ;;  %s2974_s3 = smov 8  }
 0x5d8   : > { %2488 = dma.vmem_to_hbm [thread:$0]  (%p3081_p6), %s1941_s7, 2048, %s1943_s6, %s1926_s17, %s2973_s4, %s2973_s4, %s2974_s3  }
 0x5d9 PF: > { %s3709_s21 = sld [smem:[#allocation23_spill]]  ;;  %p2525_p11 = scmp.ge.s32.totalorder %s2960_s11, 2 }
 0x5db   : > { %p2511_p12 = pnand %p2525_p11, %p3086_p8 }
 0x5dd   : > { %p2512_p2 = pneg %p2511_p12 }
 0x5df   : > { %s1957_s15 = sand.u32 1, %s3709_s21  }
 0x5e0   : > { %s1958_s27 = scalar_lea.sflag [#allocation8], %s1957_s15 }
 0x5e1   : > { %2915 = dma.done.wait (%p2512_p2), %s1958_s27, 2048  }
 0x5e2   : > { %2917 = vsyncadd (%p2512_p2), %s1958_s27, 4294965248  ;;  %s26_s11 = sadd.s32 1, %s2960_s11   ;;  %s3711_s20 = sld [smem:[#allocation26_spill]] }
 0x5e3   : > { %p23_p13 = scmp.ge.s32.totalorder %s26_s11, 14   ;;  %s3712_s7 = sld [smem:[#allocation27_spill]] }
 0x5e4   : > { %s3713_s24 = smov %s2924_s25  ;;  %s3714_s25 = smov %s2928_s26 }
 0x5e5   : > { %s3715_s26 = smov %s3176_s22  ;;  %s3716_s27 = smov %s2936_s28 }
 0x5e6   : > { %s3717_s28 = smov %s2940_s29  ;;  %s3718_s29 = smov %s3153_s23 }
 0x5e7   : > { %s3719_s30 = smov %s2952_s9  ;;  %s3720_s8 = smov %s2956_s10 }
 0x5e8   : > { %s3721_s9 = smov %s3711_s20  ;;  %25 = sbr.rel (!%p23_p13) target bundleno = 19 (0x13), region = 145 }
 0x5e9   : > { %s3722_s10 = smov %s3712_s7 }
 0x5ed   :  { %1964 = vsyncpa [#allocation7], 1 }
 0x5ee   :  { %1966 = vsyncpa [#allocation7 + $0x1], 1 }
 0x5ef   :  { %1967 = vsyncpa [#allocation10], 1 }
 0x5f0   :  { %1968 = vsyncpa [#allocation13], 1 }
 0x5f1   :  { %1969 = vsyncpa [#allocation16], 1 }
 0x5f2   :  { %1970 = vsyncpa [#allocation8], 1 }
 0x5f3   :  { %1972 = vsyncpa [#allocation8 + $0x1], 1 }

// kernel: tpu_custom_call.1
= control target key start
LH: loop header
LB: loop body
LE: loop exit
PB: predicated region body
PF: predicated region fallthrough
CT: control target
= control target key end

     0   :  { %s3664_s0 = inlined_call_operand.hbm [shape: bf16[384,128], index: 0, kind: input, shape index: {}]   ;;  %s3665_s1 = inlined_call_operand.hbm [shape: bf16[128,128], index: 1, kind: input, shape index: {}]   ;;  %s3666_s2 = inlined_call_operand.hbm [shape: bf16[128,128], index: 2, kind: input, shape index: {}]   ;;  %s3667_s3 = inlined_call_operand.hbm [shape: bf16[128,128], index: 3, kind: input, shape index: {}]   ;;  %s3668_s4 = inlined_call_operand.hbm [shape: f32[1,128], index: 4, kind: input, shape index: {}]   ;;  %s3669_s5 = inlined_call_operand.vmem [shape: f32[3,128], index: 5, kind: input, shape index: {}]   ;;  %s3670_s6 = inlined_call_operand.hbm [shape: f32[3,128], index: 6, kind: input, shape index: {}]   ;;  %s3671_s7 = inlined_call_operand.hbm [shape: f32[384,128], index: 7, kind: output, shape index: {}]  }
   0x1   :  { %3681 = sst [smem:[#allocation28_spill]] %s3665_s1 }
   0x2   :  { %3682 = sst [smem:[#allocation29_spill]] %s3666_s2 }
   0x3   :  { %3683 = sst [smem:[#allocation30_spill]] %s3667_s3 }
   0x4   :  { %3684 = sst [smem:[#allocation31_spill]] %s3668_s4 }
   0x5   :  { %3685 = sst [smem:[#allocation32_spill]] %s3670_s6 }
   0x6   :  { %3686 = sst [smem:[#allocation33_spill]] %s3671_s7 }
   0x7   :  { %12 = vsyncpa [#allocation7], 0 }
   0x8   :  { %14 = vsyncpa [#allocation7 + $0x1], 0 }
   0x9   :  { %15 = vsyncpa [#allocation10], 0 }
   0xa   :  { %16 = vsyncpa [#allocation13], 0 }
   0xb   :  { %17 = vsyncpa [#allocation16], 0 }
   0xc   :  { %18 = vsyncpa [#allocation8], 0 }
   0xd   :  { %20 = vsyncpa [#allocation8 + $0x1], 0  ;;  %s3015_s24 = smov 0   ;;  %s3017_s25 = smov 0  }
   0xe   :  { %s3019_s26 = smov 0   ;;  %s3021_s27 = smov 0  }
   0xf   :  { %s3023_s28 = smov 0   ;;  %s3025_s29 = smov 0  }
  0x10   :  { %s3027_s30 = smov 0   ;;  %s3029_s8 = smov 0  }
  0x11   :  { %s3031_s9 = smov 0   ;;  %s3033_s10 = smov 0  }
  0x12   :  { %s3035_s11 = smov 0  }
  0x13 LB: > { %3687 = sst [smem:[#allocation23_spill]] %s2920_s24  ;;  %s2075_s12 = sadd.s32 4294967295, %s2960_s11   ;;  %s2960_s11 = sphi %s3035_s11, %s26_s11   ;;  %s2956_s10 = sphi %s3033_s10, %s3722_s10   ;;  %s2952_s9 = sphi %s3031_s9, %s3721_s9   ;;  %s2948_s8 = sphi %s3029_s8, %s3720_s8   ;;  %s2944_s30 = sphi %s3027_s30, %s3719_s30   ;;  %s2940_s29 = sphi %s3025_s29, %s3718_s29   ;;  %s2936_s28 = sphi %s3023_s28, %s3717_s28   ;;  %s2932_s27 = sphi %s3021_s27, %s3716_s27   ;;  %s2928_s26 = sphi %s3019_s26, %s3715_s26   ;;  %s2924_s25 = sphi %s3017_s25, %s3714_s25   ;;  %s2920_s24 = sphi %s3015_s24, %s3713_s24  }
  0x14   : > { %s2076_s13 = sadd.s32 4294967294, %s2960_s11   ;;  %p3072_p0 = scmp.eq.s32.totalorder %s2075_s12, 0 }
  0x15   : > { %p211_p1 = scmp.ne.s32.totalorder %s2928_s26, %s2924_s25  ;;  %p212_p2 = scmp.eq.s32.totalorder %s2075_s12, 11 }
  0x16   : > { %p217_p3 = scmp.ne.s32.totalorder %s2924_s25, %s2920_s24  ;;  %p218_p4 = scmp.eq.s32.totalorder %s2076_s13, 11 }
  0x17   : > { %p2077_p5 = scmp.ge.s32.totalorder %s2960_s11, 1  ;;  %p3081_p6 = por %p212_p2, %p211_p1 }
  0x18   : > { %p225_p7 = scmp.lt.s32.totalorder %s2960_s11, 13  ;;  %p3086_p8 = por %p218_p4, %p217_p3 }
  0x19   : > { %s3689_s15 = scalar_select %p3081_p6, 1, 0 }
  0x1a   : > { %s3691_s16 = scalar_select %p3086_p8, 1, 0 }
  0x1b   : > { %3690 = sst [smem:[#allocation24_spill]] %s3689_s15  ;;  %p3090_p9 = pnand %p2077_p5, %p225_p7 }
  0x1c   : > { %3692 = sst [smem:[#allocation25_spill]] %s3691_s16  ;;  %s2962_s21 = smov [#allocation9]  }
  0x1d   : > { %s3694_s1 = sld [smem:[#allocation28_spill]]  ;;  %p2490_p10 = pneg %p3090_p9 }
  0x1e   : > { %s238_s22 = sshll.u32 %s2962_s21, 4  ;;  %s3696_s3 = sld [smem:[#allocation30_spill]]  ;;  %s239_s22 = int_to_ptr.vmem [resolvable:$true] %s238_s22 }
  0x1f   : > { %p3101_p11 = pnand %p2490_p10, %p3072_p0  ;;  %s3677_s18 = smov 64  }
  0x20   : > { %s3678_s19 = smov 4   ;;  %s3697_s2 = sld [smem:[#allocation29_spill]] }
  0x21   : > { %s2965_s7 = smov [#allocation12]   ;;  %s2966_s12 = smov [#allocation11]  }
  0x22   : > { %s266_s15 = sshll.u32 %s2965_s7, 4  ;;  %s252_s13 = sshll.u32 %s2966_s12, 4  ;;  %s267_s15 = int_to_ptr.vmem [resolvable:$true] %s266_s15  ;;  %s253_s13 = int_to_ptr.vmem [resolvable:$true] %s252_s13 }
  0x23   : > { %s236_s20 = sshll.u32 %s3694_s1, 4  ;;  %s3698_s4 = sld [smem:[#allocation31_spill]]  ;;  %s237_s20 = int_to_ptr.hbm [resolvable:$true] %s236_s20 }
  0x24   : > { %s264_s16 = sshll.u32 %s3696_s3, 4  ;;  %s3699_s6 = sld [smem:[#allocation32_spill]]  ;;  %s265_s16 = int_to_ptr.hbm [resolvable:$true] %s264_s16 }
  0x25   : > { %2493 = dma.hbm_to_vmem [thread:$0]  (!%p3101_p11), %s237_s20, 1024, %s239_s22, [#allocation10], %s3677_s18, %s3677_s18, %s3678_s19  }
  0x26   : > { %s250_s24 = sshll.u32 %s3697_s2, 4  ;;  %s2968_s21 = smov [#allocation15]   ;;  %s251_s24 = int_to_ptr.hbm [resolvable:$true] %s250_s24 }
  0x27   : > { %2499 = dma.hbm_to_vmem [thread:$0]  (!%p3101_p11), %s265_s16, 1024, %s267_s15, [#allocation13], %s3677_s18, %s3677_s18, %s3678_s19  }
  0x28   : > { %2496 = dma.hbm_to_vmem [thread:$0]  (!%p3101_p11), %s251_s24, 1024, %s253_s13, [#allocation10], %s3677_s18, %s3677_s18, %s3678_s19  }
  0x29   : > { %s279_s22 = sshll.u32 %s3698_s4, 4  ;;  %s2967_s16 = smov [#allocation14]   ;;  %s280_s22 = int_to_ptr.hbm [resolvable:$true] %s279_s22 }
  0x2a   : > { %s294_s15 = sshll.u32 %s3699_s6, 4  ;;  %s281_s3 = sshll.u32 %s2967_s16, 4  ;;  %s295_s15 = int_to_ptr.hbm [resolvable:$true] %s294_s15  ;;  %s282_s3 = int_to_ptr.vmem [resolvable:$true] %s281_s3 }
  0x2b   : > { %2502 = dma.hbm_to_vmem [thread:$0]  (!%p3101_p11), %s280_s22, 16, %s282_s3, [#allocation13]  }
  0x2c   : > { %s296_s12 = sshll.u32 %s2968_s21, 4  ;;  %s35_s24 = sadd.s32 1, %s2952_s9  ;;  %s297_s12 = int_to_ptr.vmem [resolvable:$true] %s296_s12 }
  0x2d   : > { %2505 = dma.hbm_to_vmem [thread:$0]  (!%p3101_p11), %s295_s15, 64, %s297_s12, [#allocation16]  }
  0x2e   : > { %p36_p12 = scmp.ge.s32.totalorder %s35_s24, 3  ;;  %s38_s13 = sadd.s32 1, %s2956_s10 }
  0x2f   : > { %s45_s20 = sadd.s32 1, %s2940_s29  ;;  %p52_p13 = scmp.ne.s32.totalorder %s2940_s29, %s2936_s28 }
  0x30   : > { %s3724_s24 = smov (%p36_p12, %s35_s24), 0  ;;  %s3726_s13 = smov (!%p36_p12, %s38_s13), %s2956_s10 }
  0x31   : > { %3700 = sst [smem:[#allocation26_spill]] %s3724_s24  ;;  %s42_s22 = ssub.s32 %s2952_s9, %s3724_s24 }
  0x32   : > { %p53_p1 = scmp.eq.s32.totalorder %s2960_s11, 0  ;;  %p40_p2 = scmp.ge.s32.totalorder %s3726_s13, 4 }
  0x33   : > { %p43_p3 = scmp.eq.s32.totalorder %s42_s22, 0  ;;  %p58_p4 = scmp.ne.s32.totalorder %s2936_s28, %s2932_s27 }
  0x34   : > { %p194_p5 = scmp.eq.s32.totalorder %s2956_s10, 3  ;;  %s3728_s13 = smov (%p40_p2, %s3726_s13), 0 }
  0x35   : > { %3701 = sst [smem:[#allocation27_spill]] %s3728_s13  ;;  %p3157_p7 = por %p3072_p0, %p58_p4 }
  0x36   : > { %s3153_s23 = scalar_select %p43_p3, %s2940_s29, %s45_s20  }
  0x37   : > { %p196_p10 = scmp.eq.s32.totalorder %s3728_s13, 3  ;;  %p3167_p11 = por %p53_p1, %p52_p13 }
  0x38   : > { %s195_s7 = scalar_select %p194_p5, %s2952_s9, 0 }
  0x39   : > { %s197_s15 = scalar_select %p196_p10, %s3724_s24, 0 }
  0x3a   : > { %s201_s27 = sadd.s32 1, %s2928_s26  ;;  %s307_s21 = sand.u32 1, %s2940_s29  }
  0x3b   : > { %s198_s3 = ssub.s32 %s195_s7, %s197_s15  ;;  %p2519_p2 = scmp.lt.s32.totalorder %s2960_s11, 12 }
  0x3c   : > { %p199_p12 = scmp.eq.s32.totalorder %s198_s3, 0  ;;  %s2084_s12 = sshll.u32 %s307_s21, 6 }
  0x3d   : > { %s2313_s20 = sshll.u32 %s2952_s9, 6  ;;  %s311_s6 = scalar_lea.vmem [#allocation6], %s2084_s12 }
  0x3e   : > { %s3176_s22 = scalar_select %p199_p12, %s2928_s26, %s201_s27  }
  0x3f   : > { %s316_s2 = scalar_lea.hbm %s3664_s0, %s2313_s20  ;;  %s319_s13 = sshll.u32 %s311_s6, 4  ;;  %s320_s13 = int_to_ptr.vmem [resolvable:$true] %s319_s13 }
  0x40   : > { %s317_s4 = sshll.u32 %s316_s2, 4  ;;  %p2507_p13 = pnand %p2519_p2, %p3167_p11  ;;  %s318_s4 = int_to_ptr.hbm [resolvable:$true] %s317_s4 }
  0x41   : > { %s308_s24 = scalar_lea.sflag [#allocation7], %s307_s21  ;;  %s3704_s7 = smov 4  }
  0x42   : > { %s3705_s15 = smov 64   ;;  %331 = sbr.rel (%p3090_p9) target bundleno = 1497 (0x5d9), region = 48 }
  0x43   : > { %2509 = dma.hbm_to_vmem [thread:$0]  (!%p2507_p13), %s318_s4, 1024, %s320_s13, %s308_s24, %s3705_s15, %s3705_s15, %s3704_s7  }
  0x44   : > { %s333_s27 = sand.u32 (!%p3090_p9), 1, %s2936_s28  }
  0x45   : > { %s2088_s18 = sshll.u32 (!%p3090_p9), %s333_s27, 6  ;;  %s334_s19 = scalar_lea.sflag (!%p3090_p9), [#allocation7], %s333_s27 }
  0x46   : > { %s3189_s2 = scalar_lea.vmem (!%p3090_p9), [#allocation6], %s2088_s18 }
  0x47   : > { %2899 = dma.done.wait (%p3157_p7), %s334_s19, 1024  }
  0x48   : > { %2901 = vsyncadd (%p3157_p7), %s334_s19, 4294966272 }
  0x49   : > { %2903 = dma.done.wait (%p3072_p0), [#allocation10], 2048  }
  0x4a   : > { %2905 = vsyncadd (%p3072_p0), [#allocation10], 4294965248 }
  0x4b   : > { %2907 = dma.done.wait (%p3072_p0), [#allocation13], 1040  }
  0x4c   : > { %2909 = vsyncadd (%p3072_p0), [#allocation13], 4294966256 }
  0x4d   : > { %2911 = dma.done.wait (%p3072_p0), [#allocation16], 64  }
  0x4e   : > { %2913 = vsyncadd (%p3072_p0), [#allocation16], 4294967232  ;;  %s391_s4 = sand.u32 1, %s2924_s25   ;;  %s2095_s6 = sshll.u32 %s2944_s30, 7  ;;  %v399_v0 = vlaneseq  ;;  %v2969_v34 = vmov 0.0   ;;  %v2364_v40 = vld [vmem:[%s3189_s2] sm:$0xff]  }
  0x4f   : > { %s3211_s17 = sshll.u32 %s391_s4, 7  ;;  %p497_p9 = scmp.eq.s32.totalorder %s2948_s8, 0  ;;  %v416_v2 = vstv %s2095_s6  ;;  %v2395_v45 = vld [vmem:[%s3189_s2 + $0x8] sm:$0xff]   ;;  %v2396_v46 = vld [vmem:[%s3189_s2 + $0x10] sm:$0xff]   ;;  %v2397_v51 = vld [vmem:[%s3189_s2 + $0x18] sm:$0xff]   ;;  %v3274_v56 = vunpack.c.l.bf16 %v2364_v40  ;;  %v3278_v59 = vunpack.c.h.bf16 %v2364_v40 }
  0x50   : > { %v400_v1 = vshrl.u32 %v399_v0, 7  ;;  %p498_p1 = scmp.eq.s32.totalorder %s2944_s30, 0  ;;  %v2398_v52 = vld [vmem:[%s3189_s2 + $0x20] sm:$0xff]   ;;  %v2399_v57 = vld [vmem:[%s3189_s2 + $0x28] sm:$0xff]   ;;  %v2400_v58 = vld [vmem:[%s3189_s2 + $0x30] sm:$0xff]   ;;  %v3280_v60 = vunpack.c.l.bf16 %v2395_v45  ;;  %v3282_v61 = vunpack.c.h.bf16 %v2395_v45  ;;  %v3284_v62 = vunpack.c.l.bf16 %v2396_v46  ;;  %s3310_s24 = scalar_lea.vmem [#allocation17], %s3211_s17 }
  0x51   : > { %v2401_v63 = vld [vmem:[%s3189_s2 + $0x38] sm:$0xff]   ;;  %v3287_v0 = vunpack.c.h.bf16 %v2396_v46 }
  0x52   : > { %v401_v3 = vadd.s32 8, %v400_v1  ;;  %v402_v4 = vadd.s32 16, %v400_v1  ;;  %v403_v5 = vadd.s32 24, %v400_v1  ;;  %v404_v6 = vadd.s32 32, %v400_v1  ;;  %p3217_p0 = pnand %p498_p1, %p497_p9 }
  0x53   : > { %v405_v7 = vadd.s32 40, %v400_v1  ;;  %v406_v8 = vadd.s32 48, %v400_v1  ;;  %v407_v9 = vadd.s32 56, %v400_v1  ;;  %v408_v10 = vadd.s32 64, %v400_v1 }
  0x54   : > { %v409_v11 = vadd.s32 72, %v400_v1  ;;  %v410_v12 = vadd.s32 80, %v400_v1  ;;  %v411_v13 = vadd.s32 88, %v400_v1  ;;  %v412_v14 = vadd.s32 96, %v400_v1 }
  0x55   : > { %v413_v15 = vadd.s32 104, %v400_v1  ;;  %v414_v16 = vadd.s32 112, %v400_v1  ;;  %v415_v17 = vadd.s32 120, %v400_v1  ;;  %v417_v18 = vadd.s32 %v416_v2, %v400_v1 }
  0x56   : > { %v418_v19 = vadd.s32 %v416_v2, %v401_v3  ;;  %v419_v20 = vadd.s32 %v416_v2, %v402_v4  ;;  %v420_v21 = vadd.s32 %v416_v2, %v403_v5  ;;  %v421_v22 = vadd.s32 %v416_v2, %v404_v6 }
  0x57   : > { %v422_v23 = vadd.s32 %v416_v2, %v405_v7  ;;  %v423_v24 = vadd.s32 %v416_v2, %v406_v8  ;;  %v424_v25 = vadd.s32 %v416_v2, %v407_v9  ;;  %v425_v26 = vadd.s32 %v416_v2, %v408_v10 }
  0x58   : > { %v426_v27 = vadd.s32 %v416_v2, %v409_v11  ;;  %v427_v28 = vadd.s32 %v416_v2, %v410_v12  ;;  %v428_v29 = vadd.s32 %v416_v2, %v411_v13  ;;  %v429_v30 = vadd.s32 %v416_v2, %v412_v14 }
  0x59   : > { %v430_v31 = vadd.s32 %v416_v2, %v413_v15  ;;  %v431_v32 = vadd.s32 %v416_v2, %v414_v16  ;;  %v432_v33 = vadd.s32 %v416_v2, %v415_v17  ;;  %vm433_vm0 = vcmp.lt.s32.totalorder %v417_v18, 300 }
  0x5a   : > { %vm434_vm1 = vcmp.lt.s32.totalorder %v418_v19, 300  ;;  %vm435_vm2 = vcmp.lt.s32.totalorder %v419_v20, 300  ;;  %vm436_vm3 = vcmp.lt.s32.totalorder %v420_v21, 300  ;;  %vm437_vm4 = vcmp.lt.s32.totalorder %v421_v22, 300 }
  0x5b   : > { %vm438_vm5 = vcmp.lt.s32.totalorder %v422_v23, 300  ;;  %vm439_vm6 = vcmp.lt.s32.totalorder %v423_v24, 300  ;;  %vm440_vm7 = vcmp.lt.s32.totalorder %v424_v25, 300  ;;  %vm441_vm8 = vcmp.lt.s32.totalorder %v425_v26, 300 }
  0x5c   : > { %vm442_vm9 = vcmp.lt.s32.totalorder %v426_v27, 300  ;;  %vm443_vm10 = vcmp.lt.s32.totalorder %v427_v28, 300  ;;  %vm444_vm11 = vcmp.lt.s32.totalorder %v428_v29, 300  ;;  %vm445_vm12 = vcmp.lt.s32.totalorder %v429_v30, 300 }
  0x5d   : > { %vm446_vm13 = vcmp.lt.s32.totalorder %v430_v31, 300  ;;  %vm447_vm14 = vcmp.lt.s32.totalorder %v431_v32, 300  ;;  %vm448_vm15 = vcmp.lt.s32.totalorder %v432_v33, 300  ;;  %v3222_v35 = vsel %vm433_vm0, 1.0, %v2969_v34 }
  0x5e   : > { %v3225_v36 = vsel %vm434_vm1, 1.0, %v2969_v34  ;;  %v3228_v37 = vsel %vm435_vm2, 1.0, %v2969_v34  ;;  %v3231_v38 = vsel %vm436_vm3, 1.0, %v2969_v34  ;;  %v3234_v39 = vsel %vm437_vm4, 1.0, %v2969_v34 }
  0x5f   : > { %v3238_v41 = vsel %vm438_vm5, 1.0, %v2969_v34  ;;  %v3241_v42 = vsel %vm439_vm6, 1.0, %v2969_v34  ;;  %v3244_v43 = vsel %vm440_vm7, 1.0, %v2969_v34  ;;  %v3247_v44 = vsel %vm441_vm8, 1.0, %v2969_v34 }
  0x60   : > { %v3252_v47 = vsel %vm442_vm9, 1.0, %v2969_v34  ;;  %v3255_v48 = vsel %vm443_vm10, 1.0, %v2969_v34  ;;  %v3258_v49 = vsel %vm444_vm11, 1.0, %v2969_v34  ;;  %v3261_v50 = vsel %vm445_vm12, 1.0, %v2969_v34  ;;  %502 = sbr.rel (%p3217_p0) target bundleno = 104 (0x68), region = 76 }
  0x61   : > { %v3266_v53 = vsel %vm446_vm13, 1.0, %v2969_v34  ;;  %v3269_v54 = vsel %vm447_vm14, 1.0, %v2969_v34  ;;  %v3272_v55 = vsel %vm448_vm15, 1.0, %v2969_v34  ;;  %v3289_v1 = vunpack.c.l.bf16 %v2397_v51 }
  0x62   : > { %v3291_v2 = vunpack.c.h.bf16 %v2397_v51  ;;  %v3293_v3 = vunpack.c.l.bf16 %v2398_v52  ;;  %v3295_v4 = vunpack.c.h.bf16 %v2398_v52  ;;  %v3297_v5 = vunpack.c.l.bf16 %v2399_v57 }
  0x63   : > { %v3299_v6 = vunpack.c.h.bf16 %v2399_v57  ;;  %v3301_v7 = vunpack.c.l.bf16 %v2400_v58  ;;  %v3303_v8 = vunpack.c.h.bf16 %v2400_v58  ;;  %v3305_v9 = vunpack.c.l.bf16 %v2401_v63 }
  0x64   : > { %v3307_v10 = vunpack.c.h.bf16 %v2401_v63 }
  0x65   : > { %v2970_v11 = vmov 0.0  }
  0x66   : > { %503 = vst [vmem:[#allocation2] sm:$0xff] %v2970_v11 }
  0x67   : > { %504 = vst [vmem:[#allocation3] sm:$0xff] %v2970_v11 }
  0x68 PF: > { %p2112_p3 = scmp.ne.s32.totalorder %s2948_s8, 0 }
  0x6a   : > { %507 = sbr.rel (%p2112_p3) target bundleno = 148 (0x94), region = 80 }
  0x6f   : > { %v524_v12 = vmul.f32 %v3274_v56, %v3222_v35  ;;  %v525_v13 = vmul.f32 %v3278_v59, %v3225_v36  ;;  %v526_v14 = vmul.f32 %v3280_v60, %v3228_v37  ;;  %v527_v15 = vmul.f32 %v3282_v61, %v3231_v38 }
  0x70   : > { %v528_v19 = vmul.f32 %v3284_v62, %v3234_v39  ;;  %v529_v22 = vmul.f32 %v3287_v0, %v3238_v41  ;;  %v530_v26 = vmul.f32 %v3289_v1, %v3241_v42  ;;  %v531_v30 = vmul.f32 %v3291_v2, %v3244_v43 }
  0x71   : > { %v541_v16 = vadd.f32 %v525_v13, %v524_v12  ;;  %v559_v17 = vmul.f32 %v3274_v56, %v524_v12  ;;  %v560_v18 = vmul.f32 %v3278_v59, %v525_v13  ;;  %v561_v21 = vmul.f32 %v3280_v60, %v526_v14 }
  0x72   : > { %v562_v24 = vmul.f32 %v3282_v61, %v527_v15  ;;  %v563_v28 = vmul.f32 %v3284_v62, %v528_v19  ;;  %v564_v32 = vmul.f32 %v3287_v0, %v529_v22  ;;  %v532_v34 = vmul.f32 %v3293_v3, %v3247_v44 }
  0x73   : > { %v542_v20 = vadd.f32 %v541_v16, %v526_v14  ;;  %v575_v25 = vadd.f32 %v560_v18, %v559_v17  ;;  %v565_v45 = vmul.f32 %v3289_v1, %v530_v26  ;;  %v533_v51 = vmul.f32 %v3295_v4, %v3252_v47 }
  0x74   : > { %v566_v57 = vmul.f32 %v3291_v2, %v531_v30  ;;  %v534_v63 = vmul.f32 %v3297_v5, %v3255_v48  ;;  %v567_v12 = vmul.f32 %v3293_v3, %v532_v34  ;;  %v535_v14 = vmul.f32 %v3299_v6, %v3258_v49 }
  0x75   : > { %v543_v23 = vadd.f32 %v542_v20, %v527_v15  ;;  %v576_v29 = vadd.f32 %v575_v25, %v561_v21  ;;  %v568_v16 = vmul.f32 %v3295_v4, %v533_v51  ;;  %v536_v18 = vmul.f32 %v3301_v7, %v3261_v50 }
  0x76   : > { %v569_v20 = vmul.f32 %v3297_v5, %v534_v63 }
  0x77   : > { %v544_v27 = vadd.f32 %v543_v23, %v528_v19  ;;  %v577_v33 = vadd.f32 %v576_v29, %v562_v24  ;;  %v570_v24 = vmul.f32 %v3299_v6, %v535_v14 }
  0x79   : > { %v545_v31 = vadd.f32 %v544_v27, %v529_v22  ;;  %v578_v46 = vadd.f32 %v577_v33, %v563_v28  ;;  %v537_v22 = vmul.f32 %v3303_v8, %v3266_v53  ;;  %v571_v28 = vmul.f32 %v3301_v7, %v536_v18 }
  0x7b   : > { %v546_v40 = vadd.f32 %v545_v31, %v530_v26  ;;  %v579_v58 = vadd.f32 %v578_v46, %v564_v32  ;;  %v538_v26 = vmul.f32 %v3305_v9, %v3269_v54  ;;  %v572_v32 = vmul.f32 %v3303_v8, %v537_v22  ;;  %v540_v46 = vld [vmem:[#allocation2] sm:$0xff] }
  0x7d   : > { %v547_v52 = vadd.f32 %v546_v40, %v531_v30  ;;  %v580_v13 = vadd.f32 %v579_v58, %v565_v45  ;;  %v539_v30 = vmul.f32 %v3307_v10, %v3272_v55  ;;  %v573_v40 = vmul.f32 %v3305_v9, %v538_v26 }
  0x7f   : > { %v548_v11 = vadd.f32 %v547_v52, %v532_v34  ;;  %v581_v17 = vadd.f32 %v580_v13, %v566_v57  ;;  %v574_v52 = vmul.f32 %v3307_v10, %v539_v30 }
  0x81   : > { %v549_v15 = vadd.f32 %v548_v11, %v533_v51  ;;  %v582_v21 = vadd.f32 %v581_v17, %v567_v12  ;;  %v558_v11 = vld [vmem:[#allocation3] sm:$0xff] }
  0x83   : > { %v550_v19 = vadd.f32 %v549_v15, %v534_v63  ;;  %v583_v25 = vadd.f32 %v582_v21, %v568_v16 }
  0x85   : > { %v551_v23 = vadd.f32 %v550_v19, %v535_v14  ;;  %v584_v29 = vadd.f32 %v583_v25, %v569_v20 }
  0x87   : > { %v552_v27 = vadd.f32 %v551_v23, %v536_v18  ;;  %v585_v33 = vadd.f32 %v584_v29, %v570_v24 }
  0x89   : > { %v553_v31 = vadd.f32 %v552_v27, %v537_v22  ;;  %v586_v45 = vadd.f32 %v585_v33, %v571_v28 }
  0x8b   : > { %v554_v34 = vadd.f32 %v553_v31, %v538_v26  ;;  %v587_v57 = vadd.f32 %v586_v45, %v572_v32 }
  0x8d   : > { %v555_v51 = vadd.f32 %v554_v34, %v539_v30  ;;  %v588_v63 = vadd.f32 %v587_v57, %v573_v40 }
  0x8f   : > { %v556_v58 = vadd.f32 %v555_v51, %v540_v46  ;;  %v589_v12 = vadd.f32 %v588_v63, %v574_v52 }
  0x91   : > { %557 = vst [vmem:[#allocation2] sm:$0xff] %v556_v58  ;;  %v590_v13 = vadd.f32 %v589_v12, %v558_v11 }
  0x93   : > { %591 = vst [vmem:[#allocation3] sm:$0xff] %v590_v13 }
  0x94 PF: > { %p592_p4 = scmp.eq.s32.totalorder %s2948_s8, 1 }
  0x96   : > { %p593_p5 = pnand %p592_p4, %p498_p1 }
  0x98   : > { %596 = sbr.rel (%p593_p5) target bundleno = 205 (0xcd), region = 84 }
  0x9d   : > { %v597_v14 = vld [vmem:[#allocation2] sm:$0xff]  ;;  %v605_v15 = vld [vmem:[#allocation3] sm:$0xff]  ;;  %v2971_v31 = vmov 0.0   ;;  %v630_v12 = vld [vmem:[#allocation15] sm:$0x1] }
  0x9e   : > { %v598_v16 = vrot.slane %v597_v14, 4  ;;  %v606_v17 = vrot.slane %v605_v15, 4  ;;  %634 = vst [vmem:[#allocation2] sm:$0xff] %v2971_v31  ;;  %v616_v57 = vld [vmem:[%s3669_s5] sm:$0x1] }
  0x9f   : > { %635 = vst [vmem:[#allocation3] sm:$0xff] %v2971_v31 }
  0xa0   : > { %v599_v18 = vadd.f32 %v598_v16, %v597_v14  ;;  %v607_v19 = vadd.f32 %v606_v17, %v605_v15 }
  0xa2   : > { %v600_v20 = vrot.slane %v599_v18, 2  ;;  %v608_v21 = vrot.slane %v607_v19, 2 }
  0xa4   : > { %v601_v22 = vadd.f32 %v600_v20, %v599_v18  ;;  %v609_v23 = vadd.f32 %v608_v21, %v607_v19 }
  0xa6   : > { %v602_v24 = vrot.slane %v601_v22, 1  ;;  %v610_v25 = vrot.slane %v609_v23, 1 }
  0xa8   : > { %v603_v26 = vadd.f32 %v602_v24, %v601_v22  ;;  %v611_v27 = vadd.f32 %v610_v25, %v609_v23 }
  0xaa   : > { %v604_v28 = vmul.f32 0.0033333334, %v603_v26  ;;  %v612_v29 = vmul.f32 0.0033333334, %v611_v27 }
  0xac   : > { %v613_v30 = vmul.f32 %v604_v28, %v604_v28 }
  0xae   : > { %v614_v32 = vsub.f32 %v612_v29, %v613_v30 }
  0xb0   : > { %v615_v33 = vmax.f32 %v614_v32, 0.0 }
  0xb2   : > { %v617_v34 = vadd.f32 1e-05, %v615_v33 }
  0xb4   : > { %2627 = vrsqrt.f32 %v617_v34  ;;  %vm624_vm0 = vweird.f32 %v617_v34 }
  0xba   : > { %v2628_v40 = vpop.eup %2627 }
  0xbb   : > { %v619_v45 = vmul.f32 %v2628_v40, %v617_v34  ;;  %vm625_vm1 = vweird.f32 %v2628_v40 }
  0xbc   : > { %vm626_vm2 = vmor %vm624_vm0, %vm625_vm1 }
  0xbd   : > { %v620_v46 = vmul.f32 %v2628_v40, %v619_v45 }
  0xbf   : > { %v621_v51 = vmul.f32 0.5, %v620_v46 }
  0xc1   : > { %v622_v52 = vsub.f32 1.5, %v621_v51 }
  0xc3   : > { %v623_v58 = vmul.f32 %v2628_v40, %v622_v52 }
  0xc5   : > { %v627_v63 = vsel %vm626_vm2, %v2628_v40, %v623_v58 }
  0xc6   : > { %v628_v11 = vmul.f32 %v627_v63, %v616_v57 }
  0xc8   : > { %629 = vst [vmem:[#allocation4] sm:$0x1] %v628_v11  ;;  %v631_v13 = vmul.f32 %v628_v11, %v604_v28 }
  0xca   : > { %v632_v14 = vsub.f32 %v630_v12, %v631_v13 }
  0xcc   : > { %633 = vst [vmem:[#allocation5] sm:$0x1] %v632_v14 }
  0xcd PF: > { %p2113_p7 = scmp.ne.s32.totalorder %s2948_s8, 1 }
  0xcf   : > { %638 = sbr.rel (%p2113_p7) target bundleno = 427 (0x1ab), region = 88 }
  0xd4   : > { %v2321_v15 = vld [vmem:[#allocation9 + $0x38] sm:$0xff]  ;;  %v2320_v16 = vld [vmem:[#allocation9 + $0x30] sm:$0xff]  ;;  %v2319_v17 = vld [vmem:[#allocation9 + $0x28] sm:$0xff] }
  0xd5   : > { %763 = vmatpush.bf16.msra.mxu0 %v2321_v15  ;;  %2402 = vmatpush.bf16.msra.mxu1 %v2321_v15  ;;  %v2318_v18 = vld [vmem:[#allocation9 + $0x20] sm:$0xff]  ;;  %v2317_v19 = vld [vmem:[#allocation9 + $0x18] sm:$0xff]  ;;  %v2316_v21 = vld [vmem:[#allocation9 + $0x10] sm:$0xff] }
  0xd6   : > { %2403 = vmatpush.bf16.msra.mxu2 %v2321_v15  ;;  %2404 = vmatpush.bf16.msra.mxu3 %v2321_v15  ;;  %v2629_v20 = vld [vmem:[#allocation4] ss:$0 sm:$0xff]  ;;  %v2630_v23 = vld [vmem:[#allocation5] ss:$0 sm:$0xff]  ;;  %v2315_v28 = vld [vmem:[#allocation9 + $0x8] sm:$0xff] }
  0xd7   : > { %v657_v22 = vmul.f32 %v2629_v20, %v3274_v56  ;;  %v658_v24 = vmul.f32 %v2629_v20, %v3278_v59  ;;  %v661_v25 = vmul.f32 %v2629_v20, %v3284_v62  ;;  %v662_v26 = vmul.f32 %v2629_v20, %v3287_v0  ;;  %v2314_v46 = vld [vmem:[#allocation9] sm:$0xff] }
  0xd8   : > { %v665_v27 = vmul.f32 %v2629_v20, %v3293_v3  ;;  %v666_v29 = vmul.f32 %v2629_v20, %v3295_v4  ;;  %v669_v30 = vmul.f32 %v2629_v20, %v3301_v7  ;;  %v670_v31 = vmul.f32 %v2629_v20, %v3303_v8 }
  0xd9   : > { %764 = vmatpush.bf16.msra.mxu0 %v2320_v16  ;;  %2405 = vmatpush.bf16.msra.mxu1 %v2320_v16  ;;  %v675_v32 = vadd.f32 %v2630_v23, %v657_v22  ;;  %v676_v33 = vadd.f32 %v2630_v23, %v658_v24  ;;  %v679_v34 = vadd.f32 %v2630_v23, %v661_v25 }
  0xda   : > { %2406 = vmatpush.bf16.msra.mxu2 %v2320_v16  ;;  %2407 = vmatpush.bf16.msra.mxu3 %v2320_v16  ;;  %v680_v40 = vadd.f32 %v2630_v23, %v662_v26  ;;  %v683_v45 = vadd.f32 %v2630_v23, %v665_v27  ;;  %v684_v51 = vadd.f32 %v2630_v23, %v666_v29 }
  0xdb   : > { %v687_v52 = vadd.f32 %v2630_v23, %v669_v30  ;;  %v688_v57 = vadd.f32 %v2630_v23, %v670_v31  ;;  %v691_v58 = vpack.c.bf16 %v676_v33, %v675_v32  ;;  %v659_v13 = vmul.f32 %v2629_v20, %v3280_v60 }
  0xdc   : > { %v693_v63 = vpack.c.bf16 %v680_v40, %v679_v34  ;;  %v695_v11 = vpack.c.bf16 %v684_v51, %v683_v45  ;;  %v660_v14 = vmul.f32 %v2629_v20, %v3282_v61  ;;  %v663_v15 = vmul.f32 %v2629_v20, %v3289_v1 }
  0xdd   : > { %765 = vmatpush.bf16.msra.mxu0 %v2319_v17  ;;  %2408 = vmatpush.bf16.msra.mxu1 %v2319_v17  ;;  %v697_v12 = vpack.c.bf16 %v688_v57, %v687_v52  ;;  %v664_v16 = vmul.f32 %v2629_v20, %v3291_v2  ;;  %v677_v22 = vadd.f32 %v2630_v23, %v659_v13 }
  0xde   : > { %2409 = vmatpush.bf16.msra.mxu2 %v2319_v17  ;;  %2410 = vmatpush.bf16.msra.mxu3 %v2319_v17  ;;  %v667_v17 = vmul.f32 %v2629_v20, %v3297_v5  ;;  %v678_v24 = vadd.f32 %v2630_v23, %v660_v14  ;;  %v681_v25 = vadd.f32 %v2630_v23, %v663_v15 }
  0xdf   : > { %v682_v26 = vadd.f32 %v2630_v23, %v664_v16 }
  0xe0   : > { %v685_v27 = vadd.f32 %v2630_v23, %v667_v17  ;;  %v692_v31 = vpack.c.bf16 %v678_v24, %v677_v22 }
  0xe1   : > { %766 = vmatpush.bf16.msra.mxu0 %v2318_v18  ;;  %2411 = vmatpush.bf16.msra.mxu1 %v2318_v18  ;;  %v694_v32 = vpack.c.bf16 %v682_v26, %v681_v25 }
  0xe2   : > { %2412 = vmatpush.bf16.msra.mxu2 %v2318_v18  ;;  %2413 = vmatpush.bf16.msra.mxu3 %v2318_v18  ;;  %v668_v18 = vmul.f32 %v2629_v20, %v3299_v6 }
  0xe5   : > { %767 = vmatpush.bf16.msra.mxu0 %v2317_v19  ;;  %2414 = vmatpush.bf16.msra.mxu1 %v2317_v19 }
  0xe6   : > { %2415 = vmatpush.bf16.msra.mxu2 %v2317_v19  ;;  %2416 = vmatpush.bf16.msra.mxu3 %v2317_v19  ;;  %v671_v19 = vmul.f32 %v2629_v20, %v3305_v9 }
  0xe8   : > { %v689_v29 = vadd.f32 %v2630_v23, %v671_v19 }
  0xe9   : > { %768 = vmatpush.bf16.msra.mxu0 %v2316_v21  ;;  %2417 = vmatpush.bf16.msra.mxu1 %v2316_v21 }
  0xea   : > { %2418 = vmatpush.bf16.msra.mxu2 %v2316_v21  ;;  %2419 = vmatpush.bf16.msra.mxu3 %v2316_v21  ;;  %v672_v21 = vmul.f32 %v2629_v20, %v3307_v10 }
  0xec   : > { %v690_v30 = vadd.f32 %v2630_v23, %v672_v21 }
  0xed   : > { %769 = vmatpush.bf16.msra.mxu0 %v2315_v28  ;;  %2420 = vmatpush.bf16.msra.mxu1 %v2315_v28 }
  0xee   : > { %2421 = vmatpush.bf16.msra.mxu2 %v2315_v28  ;;  %2422 = vmatpush.bf16.msra.mxu3 %v2315_v28  ;;  %v686_v28 = vadd.f32 %v2630_v23, %v668_v18  ;;  %v698_v34 = vpack.c.bf16 %v690_v30, %v689_v29 }
  0xf0   : > { %v696_v33 = vpack.c.bf16 %v686_v28, %v685_v27 }
  0xf1   : > { %770 = vmatpush.bf16.msra.mxu0 %v2314_v46  ;;  %2423 = vmatpush.bf16.msra.mxu1 %v2314_v46 }
  0xf2   : > { %2424 = vmatpush.bf16.msra.mxu2 %v2314_v46  ;;  %2425 = vmatpush.bf16.msra.mxu3 %v2314_v46 }
  0xf4   : > { %771 = vmatmul.bf16.vlgmr.msra.gmra.mxu0 %v691_v58  ;;  %781 = vmatmul.bf16.vlgmr.msra.gmra.mxu1 %v693_v63 }
  0xf5   : > { %791 = vmatmul.bf16.vlgmr.msra.gmra.mxu2 %v695_v11  ;;  %801 = vmatmul.bf16.vlgmr.msra.gmra.mxu3 %v697_v12 }
 0x104   : > { %776 = vmatmul.bf16.gmra.mxu0 %v692_v31  ;;  %786 = vmatmul.bf16.gmra.mxu1 %v694_v32 }
 0x105   : > { %796 = vmatmul.bf16.gmra.mxu2 %v696_v33  ;;  %806 = vmatmul.bf16.gmra.mxu3 %v698_v34 }
 0x171   : > { %v772_v40 = vpop.f32.mrf.mxu0  ;;  %v782_v45 = vpop.f32.mrf.mxu1 }
 0x172   : > { %v812_v23 = vmul.f32 %v3222_v35, %v772_v40  ;;  %v816_v19 = vmul.f32 %v3234_v39, %v782_v45 }
 0x174   : > { %v847_v14 = vmul.f32 %v812_v23, %v772_v40  ;;  %v851_v31 = vmul.f32 %v816_v19, %v782_v45 }
 0x178   : > { %v792_v46 = vpop.f32.mrf.mxu2  ;;  %v802_v52 = vpop.f32.mrf.mxu3 }
 0x179   : > { %v774_v20 = vpop.f32.mrf.mxu0  ;;  %v784_v51 = vpop.f32.mrf.mxu1 }
 0x17a   : > { %v813_v63 = vmul.f32 %v3225_v36, %v774_v20  ;;  %v817_v26 = vmul.f32 %v3238_v41, %v784_v51 }
 0x17c   : > { %v848_v13 = vmul.f32 %v813_v63, %v774_v20  ;;  %v829_v15 = vadd.f32 %v813_v63, %v812_v23  ;;  %v852_v40 = vmul.f32 %v817_v26, %v784_v51  ;;  %v820_v23 = vmul.f32 %v3247_v44, %v792_v46 }
 0x17e   : > { %v863_v21 = vadd.f32 %v848_v13, %v847_v14 }
 0x180   : > { %v794_v57 = vpop.f32.mrf.mxu2  ;;  %v804_v17 = vpop.f32.mrf.mxu3 }
 0x181   : > { %v777_v58 = vpop.f32.mrf.mxu0  ;;  %v787_v11 = vpop.f32.mrf.mxu1 }
 0x182   : > { %v814_v12 = vmul.f32 %v3228_v37, %v777_v58  ;;  %v818_v32 = vmul.f32 %v3241_v42, %v787_v11 }
 0x184   : > { %v849_v16 = vmul.f32 %v814_v12, %v777_v58  ;;  %v830_v22 = vadd.f32 %v829_v15, %v814_v12  ;;  %v853_v12 = vmul.f32 %v818_v32, %v787_v11  ;;  %v824_v11 = vmul.f32 %v3261_v50, %v802_v52 }
 0x186   : > { %v864_v27 = vadd.f32 %v863_v21, %v849_v16  ;;  %v821_v16 = vmul.f32 %v3252_v47, %v794_v57 }
 0x188   : > { %v797_v25 = vpop.f32.mrf.mxu2  ;;  %v807_v15 = vpop.f32.mrf.mxu3 }
 0x189   : > { %v779_v18 = vpop.f32.mrf.mxu0  ;;  %v789_v30 = vpop.f32.mrf.mxu1 }
 0x18a   : > { %v815_v24 = vmul.f32 %v3231_v38, %v779_v18  ;;  %v819_v58 = vmul.f32 %v3244_v43, %v789_v30 }
 0x18c   : > { %v831_v28 = vadd.f32 %v830_v22, %v815_v24  ;;  %v850_v29 = vmul.f32 %v815_v24, %v779_v18  ;;  %v854_v21 = vmul.f32 %v819_v58, %v789_v30  ;;  %v855_v24 = vmul.f32 %v820_v23, %v792_v46 }
 0x18e   : > { %v832_v33 = vadd.f32 %v831_v28, %v816_v19  ;;  %v865_v34 = vadd.f32 %v864_v27, %v850_v29  ;;  %v822_v19 = vmul.f32 %v3255_v48, %v797_v25  ;;  %v856_v28 = vmul.f32 %v821_v16, %v794_v57 }
 0x18f   : > { %v826_v57 = vmul.f32 %v3269_v54, %v807_v15 }
 0x190   : > { %v866_v20 = vadd.f32 %v865_v34, %v851_v31  ;;  %v833_v63 = vadd.f32 %v832_v33, %v817_v26  ;;  %v799_v22 = vpop.f32.mrf.mxu2  ;;  %v809_v46 = vpop.f32.mrf.mxu3 }
 0x191   : > { %v823_v26 = vmul.f32 %v3258_v49, %v799_v22 }
 0x192   : > { %v834_v13 = vadd.f32 %v833_v63, %v818_v32  ;;  %v867_v14 = vadd.f32 %v866_v20, %v852_v40  ;;  %v857_v32 = vmul.f32 %v822_v19, %v797_v25  ;;  %v825_v40 = vmul.f32 %v3266_v53, %v804_v17 }
 0x193   : > { %v858_v20 = vmul.f32 %v823_v26, %v799_v22  ;;  %v859_v63 = vmul.f32 %v824_v11, %v802_v52  ;;  %v861_v25 = vmul.f32 %v826_v57, %v807_v15  ;;  %v846_v22 = vld [vmem:[#allocation3] sm:$0xff] }
 0x194   : > { %v835_v18 = vadd.f32 %v834_v13, %v819_v58  ;;  %v868_v45 = vadd.f32 %v867_v14, %v853_v12  ;;  %v860_v13 = vmul.f32 %v825_v40, %v804_v17 }
 0x196   : > { %v836_v51 = vadd.f32 %v835_v18, %v820_v23  ;;  %v869_v27 = vadd.f32 %v868_v45, %v854_v21 }
 0x198   : > { %v870_v29 = vadd.f32 %v869_v27, %v855_v24  ;;  %v837_v31 = vadd.f32 %v836_v51, %v821_v16  ;;  %v827_v16 = vmul.f32 %v3272_v55, %v809_v46  ;;  %v828_v24 = vld [vmem:[#allocation2] sm:$0xff] }
 0x19a   : > { %v838_v33 = vadd.f32 %v837_v31, %v822_v19  ;;  %v871_v34 = vadd.f32 %v870_v29, %v856_v28  ;;  %v862_v27 = vmul.f32 %v827_v16, %v809_v46 }
 0x19c   : > { %v839_v30 = vadd.f32 %v838_v33, %v823_v26  ;;  %v872_v58 = vadd.f32 %v871_v34, %v857_v32 }
 0x19e   : > { %v840_v12 = vadd.f32 %v839_v30, %v824_v11  ;;  %v873_v23 = vadd.f32 %v872_v58, %v858_v20 }
 0x1a0   : > { %v874_v14 = vadd.f32 %v873_v23, %v859_v63  ;;  %v841_v18 = vadd.f32 %v840_v12, %v825_v40 }
 0x1a2   : > { %v842_v21 = vadd.f32 %v841_v18, %v826_v57  ;;  %v875_v45 = vadd.f32 %v874_v14, %v860_v13 }
 0x1a4   : > { %v876_v19 = vadd.f32 %v875_v45, %v861_v25  ;;  %v843_v51 = vadd.f32 %v842_v21, %v827_v16 }
 0x1a6   : > { %v844_v28 = vadd.f32 %v843_v51, %v828_v24  ;;  %v877_v29 = vadd.f32 %v876_v19, %v862_v27 }
 0x1a8   : > { %845 = vst [vmem:[#allocation2] sm:$0xff] %v844_v28  ;;  %v878_v52 = vadd.f32 %v877_v29, %v846_v22 }
 0x1aa   : > { %879 = vst [vmem:[#allocation3] sm:$0xff] %v878_v52 }
 0x1ab PF: > { %p880_p10 = scmp.eq.s32.totalorder %s2948_s8, 2 }
 0x1ad   : > { %p881_p11 = pnand %p880_p10, %p498_p1 }
 0x1af   : > { %884 = sbr.rel (%p881_p11) target bundleno = 484 (0x1e4), region = 92 }
 0x1b4   : > { %v885_v17 = vld [vmem:[#allocation2] sm:$0xff]  ;;  %v893_v15 = vld [vmem:[#allocation3] sm:$0xff]  ;;  %v2972_v13 = vmov 0.0   ;;  %v918_v29 = vld [vmem:[#allocation15 + $0x1] sm:$0x1] }
 0x1b5   : > { %v886_v26 = vrot.slane %v885_v17, 4  ;;  %v894_v31 = vrot.slane %v893_v15, 4  ;;  %922 = vst [vmem:[#allocation2] sm:$0xff] %v2972_v13  ;;  %v904_v51 = vld [vmem:[%s3669_s5 + $0x1] sm:$0x1] }
 0x1b6   : > { %923 = vst [vmem:[#allocation3] sm:$0xff] %v2972_v13 }
 0x1b7   : > { %v887_v11 = vadd.f32 %v886_v26, %v885_v17  ;;  %v895_v32 = vadd.f32 %v894_v31, %v893_v15 }
 0x1b9   : > { %v888_v33 = vrot.slane %v887_v11, 2  ;;  %v896_v34 = vrot.slane %v895_v32, 2 }
 0x1bb   : > { %v889_v40 = vadd.f32 %v888_v33, %v887_v11  ;;  %v897_v30 = vadd.f32 %v896_v34, %v895_v32 }
 0x1bd   : > { %v890_v20 = vrot.slane %v889_v40, 1  ;;  %v898_v58 = vrot.slane %v897_v30, 1 }
 0x1bf   : > { %v891_v46 = vadd.f32 %v890_v20, %v889_v40  ;;  %v899_v63 = vadd.f32 %v898_v58, %v897_v30 }
 0x1c1   : > { %v892_v12 = vmul.f32 0.0033333334, %v891_v46  ;;  %v900_v23 = vmul.f32 0.0033333334, %v899_v63 }
 0x1c3   : > { %v901_v57 = vmul.f32 %v892_v12, %v892_v12 }
 0x1c5   : > { %v902_v14 = vsub.f32 %v900_v23, %v901_v57 }
 0x1c7   : > { %v903_v18 = vmax.f32 %v902_v14, 0.0 }
 0x1c9   : > { %v905_v16 = vadd.f32 1e-05, %v903_v18 }
 0x1cb   : > { %2631 = vrsqrt.f32 %v905_v16  ;;  %vm912_vm3 = vweird.f32 %v905_v16 }
 0x1d1   : > { %v2632_v21 = vpop.eup %2631 }
 0x1d2   : > { %v907_v25 = vmul.f32 %v2632_v21, %v905_v16  ;;  %vm913_vm4 = vweird.f32 %v2632_v21 }
 0x1d3   : > { %vm914_vm5 = vmor %vm912_vm3, %vm913_vm4 }
 0x1d4   : > { %v908_v45 = vmul.f32 %v2632_v21, %v907_v25 }
 0x1d6   : > { %v909_v24 = vmul.f32 0.5, %v908_v45 }
 0x1d8   : > { %v910_v19 = vsub.f32 1.5, %v909_v24 }
 0x1da   : > { %v911_v27 = vmul.f32 %v2632_v21, %v910_v19 }
 0x1dc   : > { %v915_v22 = vsel %vm914_vm5, %v2632_v21, %v911_v27 }
 0x1dd   : > { %v916_v28 = vmul.f32 %v915_v22, %v904_v51 }
 0x1df   : > { %917 = vst [vmem:[#allocation4 + $0x1] sm:$0x1] %v916_v28  ;;  %v919_v52 = vmul.f32 %v916_v28, %v892_v12 }
 0x1e1   : > { %v920_v17 = vsub.f32 %v918_v29, %v919_v52 }
 0x1e3   : > { %921 = vst [vmem:[#allocation5 + $0x1] sm:$0x1] %v920_v17 }
 0x1e4 PF: > { %p2146_p12 = scmp.ne.s32.totalorder %s2948_s8, 2 }
 0x1e6   : > { %926 = sbr.rel (%p2146_p12) target bundleno = 872 (0x368), region = 96 }
 0x1eb   : > { %v2329_v15 = vld [vmem:[#allocation9 + $0x38] sm:$0xff]  ;;  %v2328_v26 = vld [vmem:[#allocation9 + $0x30] sm:$0xff]  ;;  %v2327_v31 = vld [vmem:[#allocation9 + $0x28] sm:$0xff] }
 0x1ec   : > { %1051 = vmatpush.bf16.msra.mxu0 %v2329_v15  ;;  %2426 = vmatpush.bf16.msra.mxu2 %v2329_v15  ;;  %v2326_v11 = vld [vmem:[#allocation9 + $0x20] sm:$0xff]  ;;  %v2325_v32 = vld [vmem:[#allocation9 + $0x18] sm:$0xff]  ;;  %v2324_v34 = vld [vmem:[#allocation9 + $0x10] sm:$0xff] }
 0x1ed   : > { %v3409_v33 = vld [vmem:[#allocation4] ss:$0 sm:$0xff]  ;;  %v2634_v20 = vld [vmem:[#allocation5] ss:$0 sm:$0xff]  ;;  %v2323_v63 = vld [vmem:[#allocation9 + $0x8] sm:$0xff] }
 0x1ee   : > { %v945_v40 = vmul.f32 %v3409_v33, %v3274_v56  ;;  %v946_v30 = vmul.f32 %v3409_v33, %v3278_v59  ;;  %v953_v58 = vmul.f32 %v3409_v33, %v3293_v3  ;;  %v954_v46 = vmul.f32 %v3409_v33, %v3295_v4  ;;  %v2322_v14 = vld [vmem:[#allocation9] sm:$0xff]  ;;  %v2337_v52 = vld [vmem:[#allocation11 + $0x38] sm:$0xff]  ;;  %v2336_v17 = vld [vmem:[#allocation11 + $0x30] sm:$0xff] }
 0x1ef   : > { %v947_v21 = vmul.f32 %v3409_v33, %v3280_v60  ;;  %v948_v25 = vmul.f32 %v3409_v33, %v3282_v61  ;;  %v955_v45 = vmul.f32 %v3409_v33, %v3297_v5  ;;  %v956_v24 = vmul.f32 %v3409_v33, %v3299_v6  ;;  %1224 = vmatpush.bf16.msra.mxu1 %v2337_v52 }
 0x1f0   : > { %1052 = vmatpush.bf16.msra.mxu0 %v2328_v26  ;;  %2427 = vmatpush.bf16.msra.mxu2 %v2328_v26  ;;  %v963_v12 = vadd.f32 %v2634_v20, %v945_v40  ;;  %v964_v23 = vadd.f32 %v2634_v20, %v946_v30  ;;  %v971_v57 = vadd.f32 %v2634_v20, %v953_v58 }
 0x1f1   : > { %v972_v13 = vadd.f32 %v2634_v20, %v954_v46  ;;  %v965_v19 = vadd.f32 %v2634_v20, %v947_v21  ;;  %v966_v51 = vadd.f32 %v2634_v20, %v948_v25  ;;  %v973_v27 = vadd.f32 %v2634_v20, %v955_v45  ;;  %2434 = vmatpush.bf16.msra.mxu3 %v2337_v52  ;;  %v2334_v46 = vld [vmem:[#allocation11 + $0x20] sm:$0xff] }
 0x1f2   : > { %v979_v18 = vpack.c.bf16 %v964_v23, %v963_v12  ;;  %v974_v22 = vadd.f32 %v2634_v20, %v956_v24  ;;  %v949_v15 = vmul.f32 %v3409_v33, %v3284_v62  ;;  %v950_v26 = vmul.f32 %v3409_v33, %v3287_v0 }
 0x1f3   : > { %v983_v16 = vpack.c.bf16 %v972_v13, %v971_v57  ;;  %v980_v28 = vpack.c.bf16 %v966_v51, %v965_v19  ;;  %1225 = vmatpush.bf16.msra.mxu1 %v2336_v17  ;;  %v951_v23 = vmul.f32 %v3409_v33, %v3289_v1  ;;  %v952_v57 = vmul.f32 %v3409_v33, %v3291_v2  ;;  %v2333_v19 = vld [vmem:[#allocation11 + $0x18] sm:$0xff]  ;;  %v2332_v51 = vld [vmem:[#allocation11 + $0x10] sm:$0xff] }
 0x1f4   : > { %1053 = vmatpush.bf16.msra.mxu0 %v2327_v31  ;;  %2428 = vmatpush.bf16.msra.mxu2 %v2327_v31  ;;  %v984_v29 = vpack.c.bf16 %v974_v22, %v973_v27  ;;  %v957_v31 = vmul.f32 %v3409_v33, %v3301_v7  ;;  %v968_v40 = vadd.f32 %v2634_v20, %v950_v26  ;;  %v2331_v27 = vld [vmem:[#allocation11 + $0x8] sm:$0xff]  ;;  %v2330_v22 = vld [vmem:[#allocation11] sm:$0xff] }
 0x1f5   : > { %2435 = vmatpush.bf16.msra.mxu3 %v2336_v17  ;;  %v959_v13 = vmul.f32 %v3409_v33, %v3305_v9 }
 0x1f6   : > { %v975_v30 = vadd.f32 %v2634_v20, %v957_v31 }
 0x1f7   : > { %v977_v21 = vadd.f32 %v2634_v20, %v959_v13 }
 0x1f8   : > { %1054 = vmatpush.bf16.msra.mxu0 %v2326_v11  ;;  %2429 = vmatpush.bf16.msra.mxu2 %v2326_v11  ;;  %v958_v11 = vmul.f32 %v3409_v33, %v3303_v8 }
 0x1fa   : > { %v976_v58 = vadd.f32 %v2634_v20, %v958_v11 }
 0x1fc   : > { %1055 = vmatpush.bf16.msra.mxu0 %v2325_v32  ;;  %2430 = vmatpush.bf16.msra.mxu2 %v2325_v32  ;;  %v2335_v32 = vld [vmem:[#allocation11 + $0x28] sm:$0xff]  ;;  %v985_v12 = vpack.c.bf16 %v976_v58, %v975_v30 }
 0x1fd   : > { %1226 = vmatpush.bf16.msra.mxu1 %v2335_v32  ;;  %2436 = vmatpush.bf16.msra.mxu3 %v2335_v32 }
 0x200   : > { %1056 = vmatpush.bf16.msra.mxu0 %v2324_v34  ;;  %2431 = vmatpush.bf16.msra.mxu2 %v2324_v34  ;;  %v967_v34 = vadd.f32 %v2634_v20, %v949_v15 }
 0x201   : > { %1227 = vmatpush.bf16.msra.mxu1 %v2334_v46  ;;  %2437 = vmatpush.bf16.msra.mxu3 %v2334_v46 }
 0x204   : > { %1057 = vmatpush.bf16.msra.mxu0 %v2323_v63  ;;  %2432 = vmatpush.bf16.msra.mxu2 %v2323_v63  ;;  %v981_v63 = vpack.c.bf16 %v968_v40, %v967_v34 }
 0x205   : > { %1228 = vmatpush.bf16.msra.mxu1 %v2333_v19  ;;  %2438 = vmatpush.bf16.msra.mxu3 %v2333_v19 }
 0x208   : > { %1058 = vmatpush.bf16.msra.mxu0 %v2322_v14  ;;  %2433 = vmatpush.bf16.msra.mxu2 %v2322_v14  ;;  %v960_v14 = vmul.f32 %v3409_v33, %v3307_v10 }
 0x209   : > { %1229 = vmatpush.bf16.msra.mxu1 %v2332_v51  ;;  %2439 = vmatpush.bf16.msra.mxu3 %v2332_v51 }
 0x20a   : > { %v978_v25 = vadd.f32 %v2634_v20, %v960_v14 }
 0x20b   : > { %1059 = vmatmul.bf16.vlgmr.msra.gmra.mxu0 %v979_v18  ;;  %1079 = vmatmul.bf16.vlgmr.msra.gmra.mxu2 %v983_v16  ;;  %v969_v18 = vadd.f32 %v2634_v20, %v951_v23  ;;  %v970_v16 = vadd.f32 %v2634_v20, %v952_v57 }
 0x20c   : > { %v986_v24 = vpack.c.bf16 %v978_v25, %v977_v21 }
 0x20d   : > { %v982_v45 = vpack.c.bf16 %v970_v16, %v969_v18  ;;  %1230 = vmatpush.bf16.msra.mxu1 %v2331_v27  ;;  %2440 = vmatpush.bf16.msra.mxu3 %v2331_v27 }
 0x211   : > { %1231 = vmatpush.bf16.msra.mxu1 %v2330_v22  ;;  %2441 = vmatpush.bf16.msra.mxu3 %v2330_v22 }
 0x21b   : > { %1064 = vmatmul.bf16.gmra.mxu0 %v980_v28  ;;  %1084 = vmatmul.bf16.gmra.mxu2 %v984_v29  ;;  %v3443_v28 = vld [vmem:[#allocation4 + $0x1] ss:$0 sm:$0xff]  ;;  %v3446_v29 = vld [vmem:[#allocation5 + $0x1] ss:$0 sm:$0xff] }
 0x22b   : > { %1069 = vmatmul.bf16.gmra.mxu0 %v981_v63  ;;  %1089 = vmatmul.bf16.gmra.mxu2 %v985_v12 }
 0x23b   : > { %1074 = vmatmul.bf16.gmra.mxu0 %v982_v45  ;;  %1094 = vmatmul.bf16.gmra.mxu2 %v986_v24 }
 0x288   : > { %v1060_v33 = vpop.f32.mrf.mxu0 }
 0x289   : > { %v1102_v20 = vmul.f32 %v3443_v28, %v1060_v33 }
 0x28b   : > { %v1120_v15 = vadd.f32 %v3446_v29, %v1102_v20 }
 0x28d   : > { %v1136_v32 = vmax.f32 %v1120_v15, 0.0 }
 0x28e   : > { %v1080_v52 = vpop.f32.mrf.mxu2 }
 0x28f   : > { %v1110_v31 = vmul.f32 %v3443_v28, %v1080_v52 }
 0x290   : > { %v1062_v17 = vpop.f32.mrf.mxu0 }
 0x291   : > { %v1103_v26 = vmul.f32 %v3443_v28, %v1062_v17  ;;  %v1128_v30 = vadd.f32 %v3446_v29, %v1110_v31 }
 0x293   : > { %v1121_v11 = vadd.f32 %v3446_v29, %v1103_v26  ;;  %v1144_v23 = vmax.f32 %v1128_v30, 0.0 }
 0x295   : > { %v1137_v34 = vmax.f32 %v1121_v11, 0.0 }
 0x296   : > { %v1082_v40 = vpop.f32.mrf.mxu2 }
 0x297   : > { %v1111_v58 = vmul.f32 %v3443_v28, %v1082_v40  ;;  %v1152_v46 = vpack.c.bf16 %v1137_v34, %v1136_v32 }
 0x298   : > { %v1065_v63 = vpop.f32.mrf.mxu0 }
 0x299   : > { %v1129_v12 = vadd.f32 %v3446_v29, %v1111_v58  ;;  %1232 = vmatmul.bf16.vlgmr.msra.gmra.mxu1 %v1152_v46  ;;  %v1104_v13 = vmul.f32 %v3443_v28, %v1065_v63 }
 0x29b   : > { %v1145_v57 = vmax.f32 %v1129_v12, 0.0  ;;  %v1122_v21 = vadd.f32 %v3446_v29, %v1104_v13 }
 0x29d   : > { %v1156_v14 = vpack.c.bf16 %v1145_v57, %v1144_v23  ;;  %v1138_v19 = vmax.f32 %v1122_v21, 0.0 }
 0x29e   : > { %v1085_v18 = vpop.f32.mrf.mxu2 }
 0x29f   : > { %1252 = vmatmul.bf16.vlgmr.msra.gmra.mxu3 %v1156_v14  ;;  %v1112_v45 = vmul.f32 %v3443_v28, %v1085_v18 }
 0x2a0   : > { %v1067_v16 = vpop.f32.mrf.mxu0 }
 0x2a1   : > { %v1105_v25 = vmul.f32 %v3443_v28, %v1067_v16  ;;  %v1130_v22 = vadd.f32 %v3446_v29, %v1112_v45 }
 0x2a3   : > { %v1123_v24 = vadd.f32 %v3446_v29, %v1105_v25  ;;  %v1146_v15 = vmax.f32 %v1130_v22, 0.0 }
 0x2a5   : > { %v1139_v51 = vmax.f32 %v1123_v24, 0.0 }
 0x2a6   : > { %v1087_v27 = vpop.f32.mrf.mxu2 }
 0x2a7   : > { %v1113_v33 = vmul.f32 %v3443_v28, %v1087_v27  ;;  %v1153_v20 = vpack.c.bf16 %v1139_v51, %v1138_v19 }
 0x2a8   : > { %v1070_v52 = vpop.f32.mrf.mxu0 }
 0x2a9   : > { %v1131_v17 = vadd.f32 %v3446_v29, %v1113_v33  ;;  %1237 = vmatmul.bf16.gmra.mxu1 %v1153_v20  ;;  %v1106_v31 = vmul.f32 %v3443_v28, %v1070_v52 }
 0x2ab   : > { %v1147_v26 = vmax.f32 %v1131_v17, 0.0  ;;  %v1124_v40 = vadd.f32 %v3446_v29, %v1106_v31 }
 0x2ad   : > { %v1157_v11 = vpack.c.bf16 %v1147_v26, %v1146_v15  ;;  %v1140_v63 = vmax.f32 %v1124_v40, 0.0 }
 0x2ae   : > { %v1090_v32 = vpop.f32.mrf.mxu2 }
 0x2af   : > { %1257 = vmatmul.bf16.gmra.mxu3 %v1157_v11  ;;  %v1114_v58 = vmul.f32 %v3443_v28, %v1090_v32 }
 0x2b0   : > { %v1072_v34 = vpop.f32.mrf.mxu0 }
 0x2b1   : > { %v1107_v30 = vmul.f32 %v3443_v28, %v1072_v34  ;;  %v1132_v57 = vadd.f32 %v3446_v29, %v1114_v58 }
 0x2b3   : > { %v1125_v46 = vadd.f32 %v3446_v29, %v1107_v30  ;;  %v1148_v21 = vmax.f32 %v1132_v57, 0.0 }
 0x2b5   : > { %v1141_v12 = vmax.f32 %v1125_v46, 0.0 }
 0x2b6   : > { %v1092_v23 = vpop.f32.mrf.mxu2 }
 0x2b7   : > { %v1115_v13 = vmul.f32 %v3443_v28, %v1092_v23  ;;  %v1154_v14 = vpack.c.bf16 %v1141_v12, %v1140_v63 }
 0x2b8   : > { %v1075_v18 = vpop.f32.mrf.mxu0 }
 0x2b9   : > { %v1133_v16 = vadd.f32 %v3446_v29, %v1115_v13  ;;  %1242 = vmatmul.bf16.gmra.mxu1 %v1154_v14  ;;  %v1108_v45 = vmul.f32 %v3443_v28, %v1075_v18 }
 0x2bb   : > { %v1149_v25 = vmax.f32 %v1133_v16, 0.0  ;;  %v1126_v27 = vadd.f32 %v3446_v29, %v1108_v45 }
 0x2bd   : > { %v1158_v24 = vpack.c.bf16 %v1149_v25, %v1148_v21  ;;  %v1142_v52 = vmax.f32 %v1126_v27, 0.0 }
 0x2be   : > { %v1095_v19 = vpop.f32.mrf.mxu2 }
 0x2bf   : > { %1262 = vmatmul.bf16.gmra.mxu3 %v1158_v24  ;;  %v1116_v33 = vmul.f32 %v3443_v28, %v1095_v19 }
 0x2c0   : > { %v1077_v51 = vpop.f32.mrf.mxu0 }
 0x2c1   : > { %v1109_v22 = vmul.f32 %v3443_v28, %v1077_v51  ;;  %v1134_v26 = vadd.f32 %v3446_v29, %v1116_v33 }
 0x2c3   : > { %v1127_v20 = vadd.f32 %v3446_v29, %v1109_v22  ;;  %v1150_v34 = vmax.f32 %v1134_v26, 0.0 }
 0x2c5   : > { %v1143_v17 = vmax.f32 %v1127_v20, 0.0 }
 0x2c6   : > { %v1097_v15 = vpop.f32.mrf.mxu2 }
 0x2c7   : > { %v1117_v31 = vmul.f32 %v3443_v28, %v1097_v15  ;;  %v1155_v11 = vpack.c.bf16 %v1143_v17, %v1142_v52 }
 0x2c9   : > { %v1135_v32 = vadd.f32 %v3446_v29, %v1117_v31  ;;  %1247 = vmatmul.bf16.gmra.mxu1 %v1155_v11 }
 0x2cb   : > { %v1151_v40 = vmax.f32 %v1135_v32, 0.0 }
 0x2cd   : > { %v1159_v30 = vpack.c.bf16 %v1151_v40, %v1150_v34 }
 0x2cf   : > { %1267 = vmatmul.bf16.gmra.mxu3 %v1159_v30 }
 0x316   : > { %v1233_v58 = vpop.f32.mrf.mxu1 }
 0x317   : > { %v1273_v21 = vmul.f32 %v3222_v35, %v1233_v58 }
 0x319   : > { %v1308_v19 = vmul.f32 %v1273_v21, %v1233_v58 }
 0x31e   : > { %v1235_v46 = vpop.f32.mrf.mxu1 }
 0x31f   : > { %v1274_v28 = vmul.f32 %v3225_v36, %v1235_v46 }
 0x321   : > { %v1309_v45 = vmul.f32 %v1274_v28, %v1235_v46  ;;  %v1290_v51 = vadd.f32 %v1274_v28, %v1273_v21 }
 0x322   : > { %v1253_v63 = vpop.f32.mrf.mxu3 }
 0x323   : > { %v1324_v20 = vadd.f32 %v1309_v45, %v1308_v19 }
 0x326   : > { %v1238_v12 = vpop.f32.mrf.mxu1 }
 0x327   : > { %v1275_v29 = vmul.f32 %v3228_v37, %v1238_v12 }
 0x329   : > { %v1310_v27 = vmul.f32 %v1275_v29, %v1238_v12  ;;  %v1291_v52 = vadd.f32 %v1290_v51, %v1275_v29 }
 0x32a   : > { %v1255_v23 = vpop.f32.mrf.mxu3 }
 0x32b   : > { %v1325_v36 = vadd.f32 %v1324_v20, %v1310_v27 }
 0x32e   : > { %v1240_v57 = vpop.f32.mrf.mxu1 }
 0x32f   : > { %v1276_v24 = vmul.f32 %v3231_v38, %v1240_v57 }
 0x331   : > { %v1311_v17 = vmul.f32 %v1276_v24, %v1240_v57  ;;  %v1292_v26 = vadd.f32 %v1291_v52, %v1276_v24 }
 0x332   : > { %v1258_v13 = vpop.f32.mrf.mxu3 }
 0x333   : > { %v1326_v11 = vadd.f32 %v1325_v36, %v1311_v17  ;;  %v1283_v45 = vmul.f32 %v3255_v48, %v1258_v13 }
 0x336   : > { %v1243_v14 = vpop.f32.mrf.mxu1 }
 0x337   : > { %v1277_v22 = vmul.f32 %v3234_v39, %v1243_v14  ;;  %v1281_v39 = vmul.f32 %v3247_v44, %v1253_v63 }
 0x339   : > { %v1312_v35 = vmul.f32 %v1277_v22, %v1243_v14  ;;  %v1293_v32 = vadd.f32 %v1292_v26, %v1277_v22  ;;  %v1316_v29 = vmul.f32 %v1281_v39, %v1253_v63  ;;  %v1318_v22 = vmul.f32 %v1283_v45, %v1258_v13 }
 0x33a   : > { %v1260_v18 = vpop.f32.mrf.mxu3 }
 0x33b   : > { %v1327_v34 = vadd.f32 %v1326_v11, %v1312_v35  ;;  %v1284_v51 = vmul.f32 %v3258_v49, %v1260_v18 }
 0x33e   : > { %v1245_v16 = vpop.f32.mrf.mxu1 }
 0x33f   : > { %v1278_v15 = vmul.f32 %v3238_v41, %v1245_v16  ;;  %v1282_v41 = vmul.f32 %v3252_v47, %v1255_v23  ;;  %v1319_v47 = vmul.f32 %v1284_v51, %v1260_v18 }
 0x341   : > { %v1313_v38 = vmul.f32 %v1278_v15, %v1245_v16  ;;  %v1294_v40 = vadd.f32 %v1293_v32, %v1278_v15  ;;  %v1317_v19 = vmul.f32 %v1282_v41, %v1255_v23 }
 0x342   : > { %v1263_v25 = vpop.f32.mrf.mxu3 }
 0x343   : > { %v1328_v46 = vadd.f32 %v1327_v34, %v1313_v38  ;;  %v1289_v38 = vld [vmem:[#allocation2] sm:$0xff] }
 0x346   : > { %v1248_v33 = vpop.f32.mrf.mxu1 }
 0x347   : > { %v1279_v37 = vmul.f32 %v3241_v42, %v1248_v33 }
 0x349   : > { %v1314_v30 = vmul.f32 %v1279_v37, %v1248_v33  ;;  %v1295_v12 = vadd.f32 %v1294_v40, %v1279_v37  ;;  %v1285_v33 = vmul.f32 %v3261_v50, %v1263_v25  ;;  %v1307_v40 = vld [vmem:[#allocation3] sm:$0xff] }
 0x34a   : > { %v1265_v31 = vpop.f32.mrf.mxu3 }
 0x34b   : > { %v1329_v28 = vadd.f32 %v1328_v46, %v1314_v30  ;;  %v1286_v52 = vmul.f32 %v3266_v53, %v1265_v31  ;;  %v1320_v36 = vmul.f32 %v1285_v33, %v1263_v25 }
 0x34d   : > { %v1321_v35 = vmul.f32 %v1286_v52, %v1265_v31 }
 0x34e   : > { %v1250_v58 = vpop.f32.mrf.mxu1 }
 0x34f   : > { %v1280_v57 = vmul.f32 %v3244_v43, %v1250_v58 }
 0x351   : > { %v1296_v14 = vadd.f32 %v1295_v12, %v1280_v57  ;;  %v1315_v21 = vmul.f32 %v1280_v57, %v1250_v58 }
 0x352   : > { %v1268_v42 = vpop.f32.mrf.mxu3 }
 0x353   : > { %v1297_v16 = vadd.f32 %v1296_v14, %v1281_v39  ;;  %v1330_v24 = vadd.f32 %v1329_v28, %v1315_v21  ;;  %v1287_v48 = vmul.f32 %v3269_v54, %v1268_v42 }
 0x355   : > { %v1298_v27 = vadd.f32 %v1297_v16, %v1282_v41  ;;  %v1331_v44 = vadd.f32 %v1330_v24, %v1316_v29  ;;  %v1322_v50 = vmul.f32 %v1287_v48, %v1268_v42 }
 0x357   : > { %v1299_v43 = vadd.f32 %v1298_v27, %v1283_v45  ;;  %v1332_v20 = vadd.f32 %v1331_v44, %v1317_v19 }
 0x359   : > { %v1333_v17 = vadd.f32 %v1332_v20, %v1318_v22  ;;  %v1300_v15 = vadd.f32 %v1299_v43, %v1284_v51 }
 0x35a   : > { %v1270_v63 = vpop.f32.mrf.mxu3 }
 0x35b   : > { %v1301_v26 = vadd.f32 %v1300_v15, %v1285_v33  ;;  %v1334_v23 = vadd.f32 %v1333_v17, %v1319_v47  ;;  %v1288_v13 = vmul.f32 %v3272_v55, %v1270_v63 }
 0x35d   : > { %v1302_v49 = vadd.f32 %v1301_v26, %v1286_v52  ;;  %v1335_v37 = vadd.f32 %v1334_v23, %v1320_v36  ;;  %v1323_v53 = vmul.f32 %v1288_v13, %v1270_v63 }
 0x35f   : > { %v1303_v11 = vadd.f32 %v1302_v49, %v1287_v48  ;;  %v1336_v32 = vadd.f32 %v1335_v37, %v1321_v35 }
 0x361   : > { %v1337_v18 = vadd.f32 %v1336_v32, %v1322_v50  ;;  %v1304_v34 = vadd.f32 %v1303_v11, %v1288_v13 }
 0x363   : > { %v1305_v30 = vadd.f32 %v1304_v34, %v1289_v38  ;;  %v1338_v58 = vadd.f32 %v1337_v18, %v1323_v53 }
 0x365   : > { %1306 = vst [vmem:[#allocation2] sm:$0xff] %v1305_v30  ;;  %v1339_v25 = vadd.f32 %v1338_v58, %v1307_v40 }
 0x367   : > { %1340 = vst [vmem:[#allocation3] sm:$0xff] %v1339_v25 }
 0x368 PF: > { %p1341_p2 = scmp.eq.s32.totalorder %s2948_s8, 3 }
 0x36a   : > { %p1342_p13 = pnand %p1341_p2, %p498_p1 }
 0x36c   : > { %1345 = sbr.rel (%p1342_p13) target bundleno = 929 (0x3a1), region = 100 }
 0x371   : > { %v1346_v54 = vld [vmem:[#allocation2] sm:$0xff]  ;;  %v1354_v55 = vld [vmem:[#allocation3] sm:$0xff]  ;;  %v1379_v36 = vld [vmem:[#allocation15 + $0x2] sm:$0x1] }
 0x372   : > { %v1347_v31 = vrot.slane %v1346_v54, 4  ;;  %v1355_v39 = vrot.slane %v1354_v55, 4  ;;  %v1365_v52 = vld [vmem:[%s3669_s5 + $0x2] sm:$0x1] }
 0x374   : > { %v1348_v46 = vadd.f32 %v1347_v31, %v1346_v54  ;;  %v1356_v12 = vadd.f32 %v1355_v39, %v1354_v55 }
 0x376   : > { %v1349_v57 = vrot.slane %v1348_v46, 2  ;;  %v1357_v41 = vrot.slane %v1356_v12, 2 }
 0x378   : > { %v1350_v28 = vadd.f32 %v1349_v57, %v1348_v46  ;;  %v1358_v14 = vadd.f32 %v1357_v41, %v1356_v12 }
 0x37a   : > { %v1351_v21 = vrot.slane %v1350_v28, 1  ;;  %v1359_v42 = vrot.slane %v1358_v14, 1 }
 0x37c   : > { %v1352_v29 = vadd.f32 %v1351_v21, %v1350_v28  ;;  %v1360_v45 = vadd.f32 %v1359_v42, %v1358_v14 }
 0x37e   : > { %v1353_v16 = vmul.f32 0.0033333334, %v1352_v29  ;;  %v1361_v24 = vmul.f32 0.0033333334, %v1360_v45 }
 0x380   : > { %v1362_v19 = vmul.f32 %v1353_v16, %v1353_v16 }
 0x382   : > { %v1363_v51 = vsub.f32 %v1361_v24, %v1362_v19 }
 0x384   : > { %v1364_v27 = vmax.f32 %v1363_v51, 0.0 }
 0x386   : > { %v1366_v44 = vadd.f32 1e-05, %v1364_v27 }
 0x388   : > { %2637 = vrsqrt.f32 %v1366_v44  ;;  %vm1373_vm6 = vweird.f32 %v1366_v44 }
 0x38e   : > { %v2638_v22 = vpop.eup %2637 }
 0x38f   : > { %v1368_v33 = vmul.f32 %v2638_v22, %v1366_v44  ;;  %vm1374_vm7 = vweird.f32 %v2638_v22 }
 0x390   : > { %vm1375_vm8 = vmor %vm1373_vm6, %vm1374_vm7 }
 0x391   : > { %v1369_v43 = vmul.f32 %v2638_v22, %v1368_v33 }
 0x393   : > { %v1370_v20 = vmul.f32 0.5, %v1369_v43 }
 0x395   : > { %v1371_v47 = vsub.f32 1.5, %v1370_v20 }
 0x397   : > { %v1372_v17 = vmul.f32 %v2638_v22, %v1371_v47 }
 0x399   : > { %v1376_v15 = vsel %vm1375_vm8, %v2638_v22, %v1372_v17 }
 0x39a   : > { %v1377_v63 = vmul.f32 %v1376_v15, %v1365_v52 }
 0x39c   : > { %1378 = vst [vmem:[#allocation4 + $0x2] sm:$0x1] %v1377_v63  ;;  %v1380_v48 = vmul.f32 %v1377_v63, %v1353_v16 }
 0x39e   : > { %v1381_v26 = vsub.f32 %v1379_v36, %v1380_v48 }
 0x3a0   : > { %1382 = vst [vmem:[#allocation5 + $0x2] sm:$0x1] %v1381_v26 }
 0x3a1 PF: > { %p2211_p9 = scmp.ne.s32.totalorder %s2948_s8, 3 }
 0x3a3   : > { %1385 = sbr.rel (%p2211_p9) target bundleno = 1475 (0x5c3), region = 104 }
 0x3a8   : > { %v2345_v23 = vld [vmem:[#allocation9 + $0x38] sm:$0xff]  ;;  %v2344_v35 = vld [vmem:[#allocation9 + $0x30] sm:$0xff]  ;;  %v2343_v49 = vld [vmem:[#allocation9 + $0x28] sm:$0xff] }
 0x3a9   : > { %1510 = vmatpush.bf16.msra.mxu0 %v2345_v23  ;;  %2442 = vmatpush.bf16.msra.mxu3 %v2345_v23  ;;  %v2342_v37 = vld [vmem:[#allocation9 + $0x20] sm:$0xff]  ;;  %v2341_v13 = vld [vmem:[#allocation9 + $0x18] sm:$0xff]  ;;  %v2340_v50 = vld [vmem:[#allocation9 + $0x10] sm:$0xff] }
 0x3aa   : > { %v2639_v11 = vld [vmem:[#allocation4] ss:$0 sm:$0xff]  ;;  %v2640_v18 = vld [vmem:[#allocation5] ss:$0 sm:$0xff]  ;;  %v2339_v40 = vld [vmem:[#allocation9 + $0x8] sm:$0xff] }
 0x3ab   : > { %v1404_v32 = vmul.f32 %v2639_v11, %v3274_v56  ;;  %v1405_v38 = vmul.f32 %v2639_v11, %v3278_v59  ;;  %v1416_v34 = vmul.f32 %v2639_v11, %v3301_v7  ;;  %v1417_v53 = vmul.f32 %v2639_v11, %v3303_v8  ;;  %v2338_v55 = vld [vmem:[#allocation9] sm:$0xff]  ;;  %v2352_v20 = vld [vmem:[#allocation11 + $0x30] sm:$0xff]  ;;  %v2351_v47 = vld [vmem:[#allocation11 + $0x28] sm:$0xff] }
 0x3ac   : > { %v1406_v56 = vmul.f32 %v2639_v11, %v3280_v60  ;;  %v1407_v59 = vmul.f32 %v2639_v11, %v3282_v61  ;;  %v1418_v7 = vmul.f32 %v2639_v11, %v3305_v9  ;;  %v1419_v8 = vmul.f32 %v2639_v11, %v3307_v10  ;;  %v2346_v52 = vld [vmem:[#allocation11] sm:$0xff]  ;;  %v3520_v15 = vld [vmem:[#allocation4 + $0x1] ss:$0 sm:$0xff]  ;;  %v3523_v36 = vld [vmem:[#allocation5 + $0x1] ss:$0 sm:$0xff] }
 0x3ad   : > { %1511 = vmatpush.bf16.msra.mxu0 %v2344_v35  ;;  %2443 = vmatpush.bf16.msra.mxu3 %v2344_v35  ;;  %v1422_v30 = vadd.f32 %v2640_v18, %v1404_v32  ;;  %v1423_v58 = vadd.f32 %v2640_v18, %v1405_v38  ;;  %v1434_v25 = vadd.f32 %v2640_v18, %v1416_v34 }
 0x3ae   : > { %v1435_v54 = vadd.f32 %v2640_v18, %v1417_v53  ;;  %v1424_v46 = vadd.f32 %v2640_v18, %v1406_v56  ;;  %v1425_v12 = vadd.f32 %v2640_v18, %v1407_v59  ;;  %v1436_v57 = vadd.f32 %v2640_v18, %v1418_v7 }
 0x3af   : > { %v1438_v31 = vpack.c.bf16 %v1423_v58, %v1422_v30  ;;  %v1437_v41 = vadd.f32 %v2640_v18, %v1419_v8  ;;  %v1412_v21 = vmul.f32 %v2639_v11, %v3293_v3  ;;  %v1413_v42 = vmul.f32 %v2639_v11, %v3295_v4 }
 0x3b0   : > { %v1444_v39 = vpack.c.bf16 %v1435_v54, %v1434_v25  ;;  %v1439_v28 = vpack.c.bf16 %v1425_v12, %v1424_v46  ;;  %v1408_v61 = vmul.f32 %v2639_v11, %v3284_v62  ;;  %v1409_v9 = vmul.f32 %v2639_v11, %v3287_v0  ;;  %v2353_v0 = vld [vmem:[#allocation11 + $0x38] sm:$0xff] }
 0x3b1   : > { %1512 = vmatpush.bf16.msra.mxu0 %v2343_v49  ;;  %2444 = vmatpush.bf16.msra.mxu3 %v2343_v49  ;;  %v1445_v14 = vpack.c.bf16 %v1437_v41, %v1436_v57  ;;  %v1430_v29 = vadd.f32 %v2640_v18, %v1412_v21  ;;  %v1431_v60 = vadd.f32 %v2640_v18, %v1413_v42 }
 0x3b2   : > { %v1426_v10 = vadd.f32 %v2640_v18, %v1408_v61  ;;  %v1427_v16 = vadd.f32 %v2640_v18, %v1409_v9  ;;  %v1414_v19 = vmul.f32 %v2639_v11, %v3297_v5  ;;  %v1415_v51 = vmul.f32 %v2639_v11, %v3299_v6  ;;  %1683 = vmatpush.bf16.msra.mxu1 %v2353_v0  ;;  %v2350_v5 = vld [vmem:[#allocation11 + $0x20] sm:$0xff]  ;;  %v2347_v6 = vld [vmem:[#allocation11 + $0x8] sm:$0xff] }
 0x3b3   : > { %v1442_v45 = vpack.c.bf16 %v1431_v60, %v1430_v29  ;;  %v1410_v3 = vmul.f32 %v2639_v11, %v3289_v1  ;;  %v1411_v4 = vmul.f32 %v2639_v11, %v3291_v2  ;;  %v2349_v1 = vld [vmem:[#allocation11 + $0x18] sm:$0xff]  ;;  %v2348_v2 = vld [vmem:[#allocation11 + $0x10] sm:$0xff] }
 0x3b4   : > { %v1440_v24 = vpack.c.bf16 %v1427_v16, %v1426_v10  ;;  %v1432_v27 = vadd.f32 %v2640_v18, %v1414_v19  ;;  %v1433_v44 = vadd.f32 %v2640_v18, %v1415_v51 }
 0x3b5   : > { %1513 = vmatpush.bf16.msra.mxu0 %v2342_v37  ;;  %2445 = vmatpush.bf16.msra.mxu3 %v2342_v37  ;;  %v1428_v33 = vadd.f32 %v2640_v18, %v1410_v3  ;;  %v1429_v62 = vadd.f32 %v2640_v18, %v1411_v4 }
 0x3b6   : > { %v1443_v22 = vpack.c.bf16 %v1433_v44, %v1432_v27  ;;  %1684 = vmatpush.bf16.msra.mxu1 %v2352_v20 }
 0x3b7   : > { %v1441_v43 = vpack.c.bf16 %v1429_v62, %v1428_v33 }
 0x3b9   : > { %1514 = vmatpush.bf16.msra.mxu0 %v2341_v13  ;;  %2446 = vmatpush.bf16.msra.mxu3 %v2341_v13 }
 0x3ba   : > { %1685 = vmatpush.bf16.msra.mxu1 %v2351_v47 }
 0x3bd   : > { %1515 = vmatpush.bf16.msra.mxu0 %v2340_v50  ;;  %2447 = vmatpush.bf16.msra.mxu3 %v2340_v50 }
 0x3be   : > { %1686 = vmatpush.bf16.msra.mxu1 %v2350_v5 }
 0x3c1   : > { %1516 = vmatpush.bf16.msra.mxu0 %v2339_v40  ;;  %2448 = vmatpush.bf16.msra.mxu3 %v2339_v40 }
 0x3c2   : > { %1687 = vmatpush.bf16.msra.mxu1 %v2349_v1 }
 0x3c5   : > { %1517 = vmatpush.bf16.msra.mxu0 %v2338_v55  ;;  %2449 = vmatpush.bf16.msra.mxu3 %v2338_v55 }
 0x3c6   : > { %1688 = vmatpush.bf16.msra.mxu1 %v2348_v2 }
 0x3c8   : > { %1518 = vmatmul.bf16.vlgmr.msra.gmra.mxu0 %v1438_v31  ;;  %1548 = vmatmul.bf16.vlgmr.msra.gmra.mxu3 %v1444_v39 }
 0x3c9   : > { %2450 = vmatpush.bf16.msrb.mxu3 %v2353_v0 }
 0x3ca   : > { %1689 = vmatpush.bf16.msra.mxu1 %v2347_v6 }
 0x3cd   : > { %2451 = vmatpush.bf16.msrb.mxu3 %v2352_v20  ;;  %v2361_v20 = vld [vmem:[#allocation12 + $0x38] sm:$0xff] }
 0x3ce   : > { %1690 = vmatpush.bf16.msra.mxu1 %v2346_v52  ;;  %1860 = vmatpush.bf16.msra.mxu2 %v2361_v20 }
 0x3d1   : > { %2452 = vmatpush.bf16.msrb.mxu3 %v2351_v47  ;;  %v2360_v47 = vld [vmem:[#allocation12 + $0x30] sm:$0xff] }
 0x3d2   : > { %1861 = vmatpush.bf16.msra.mxu2 %v2360_v47 }
 0x3d5   : > { %2453 = vmatpush.bf16.msrb.mxu3 %v2350_v5 }
 0x3d8   : > { %1523 = vmatmul.bf16.gmra.mxu0 %v1439_v28  ;;  %1553 = vmatmul.bf16.gmra.mxu3 %v1445_v14 }
 0x3d9   : > { %2454 = vmatpush.bf16.msrb.mxu3 %v2349_v1  ;;  %v2359_v1 = vld [vmem:[#allocation12 + $0x28] sm:$0xff] }
 0x3da   : > { %1862 = vmatpush.bf16.msra.mxu2 %v2359_v1 }
 0x3dd   : > { %2455 = vmatpush.bf16.msrb.mxu3 %v2348_v2 }
 0x3e1   : > { %2456 = vmatpush.bf16.msrb.mxu3 %v2347_v6 }
 0x3e5   : > { %2457 = vmatpush.bf16.msrb.mxu3 %v2346_v52 }
 0x3e8   : > { %1528 = vmatmul.bf16.gmra.mxu0 %v1440_v24 }
 0x3e9   : > { %2458 = vmatpush.bf16.msra.mxu3 %v2361_v20 }
 0x3ed   : > { %2459 = vmatpush.bf16.msra.mxu3 %v2360_v47 }
 0x3f1   : > { %2460 = vmatpush.bf16.msra.mxu3 %v2359_v1 }
 0x3f8   : > { %1533 = vmatmul.bf16.gmra.mxu0 %v1441_v43 }
 0x408   : > { %1538 = vmatmul.bf16.gmra.mxu0 %v1442_v45 }
 0x418   : > { %1543 = vmatmul.bf16.gmra.mxu0 %v1443_v22 }
 0x445   : > { %v1519_v17 = vpop.f32.mrf.mxu0 }
 0x446   : > { %v1561_v63 = vmul.f32 %v3520_v15, %v1519_v17 }
 0x448   : > { %v1579_v23 = vadd.f32 %v3523_v36, %v1561_v63  ;;  %v2358_v63 = vld [vmem:[#allocation12 + $0x20] sm:$0xff] }
 0x449   : > { %1863 = vmatpush.bf16.msra.mxu2 %v2358_v63  ;;  %2461 = vmatpush.bf16.msra.mxu3 %v2358_v63 }
 0x44a   : > { %v1595_v13 = vmax.f32 %v1579_v23, 0.0 }
 0x44b   : > { %v1549_v48 = vpop.f32.mrf.mxu3 }
 0x44c   : > { %v1573_v49 = vmul.f32 %v3520_v15, %v1549_v48 }
 0x44d   : > { %v1521_v26 = vpop.f32.mrf.mxu0 }
 0x44e   : > { %v1562_v35 = vmul.f32 %v3520_v15, %v1521_v26  ;;  %v1591_v50 = vadd.f32 %v3523_v36, %v1573_v49 }
 0x450   : > { %v1580_v37 = vadd.f32 %v3523_v36, %v1562_v35  ;;  %v1607_v53 = vmax.f32 %v1591_v50, 0.0 }
 0x452   : > { %v1596_v11 = vmax.f32 %v1580_v37, 0.0 }
 0x453   : > { %v1551_v32 = vpop.f32.mrf.mxu3 }
 0x454   : > { %v1611_v38 = vpack.c.bf16 %v1596_v11, %v1595_v13  ;;  %v1574_v18 = vmul.f32 %v3520_v15, %v1551_v32 }
 0x455   : > { %v1524_v34 = vpop.f32.mrf.mxu0 }
 0x456   : > { %1691 = vmatmul.bf16.vlgmr.msra.gmra.mxu1 %v1611_v38  ;;  %v1592_v40 = vadd.f32 %v3523_v36, %v1574_v18  ;;  %v1563_v58 = vmul.f32 %v3520_v15, %v1524_v34  ;;  %v2357_v34 = vld [vmem:[#allocation12 + $0x18] sm:$0xff] }
 0x457   : > { %1864 = vmatpush.bf16.msra.mxu2 %v2357_v34  ;;  %2462 = vmatpush.bf16.msra.mxu3 %v2357_v34 }
 0x458   : > { %v1608_v30 = vmax.f32 %v1592_v40, 0.0  ;;  %v1581_v31 = vadd.f32 %v3523_v36, %v1563_v58  ;;  %v2355_v40 = vld [vmem:[#allocation12 + $0x8] sm:$0xff] }
 0x45a   : > { %v1617_v25 = vpack.c.bf16 %v1608_v30, %v1607_v53  ;;  %v1597_v7 = vmax.f32 %v1581_v31, 0.0  ;;  %v2356_v53 = vld [vmem:[#allocation12 + $0x10] sm:$0xff]  ;;  %v2354_v30 = vld [vmem:[#allocation12] sm:$0xff] }
 0x45b   : > { %v1554_v54 = vpop.f32.mrf.mxu3  ;;  %1865 = vmatpush.bf16.msra.mxu2 %v2356_v53  ;;  %2463 = vmatpush.bf16.msra.mxu3 %v2356_v53 }
 0x45c   : > { %1721 = vmatmul.bf16.vlgmr.msrb.gmra.mxu3 %v1617_v25  ;;  %v1575_v56 = vmul.f32 %v3520_v15, %v1554_v54  ;;  %v3559_v25 = vld [vmem:[#allocation5 + $0x2] ss:$0 sm:$0xff] }
 0x45d   : > { %v1526_v55 = vpop.f32.mrf.mxu0 }
 0x45e   : > { %v1564_v39 = vmul.f32 %v3520_v15, %v1526_v55  ;;  %v1593_v46 = vadd.f32 %v3523_v36, %v1575_v56 }
 0x45f   : > { %1866 = vmatpush.bf16.msra.mxu2 %v2355_v40  ;;  %2464 = vmatpush.bf16.msra.mxu3 %v2355_v40 }
 0x460   : > { %v1582_v59 = vadd.f32 %v3523_v36, %v1564_v39  ;;  %v1609_v14 = vmax.f32 %v1593_v46, 0.0 }
 0x462   : > { %v1598_v8 = vmax.f32 %v1582_v59, 0.0 }
 0x463   : > { %v1556_v12 = vpop.f32.mrf.mxu3  ;;  %1867 = vmatpush.bf16.msra.mxu2 %v2354_v30  ;;  %2465 = vmatpush.bf16.msra.mxu3 %v2354_v30 }
 0x464   : > { %v1612_v57 = vpack.c.bf16 %v1598_v8, %v1597_v7  ;;  %v1576_v41 = vmul.f32 %v3520_v15, %v1556_v12 }
 0x465   : > { %v1529_v28 = vpop.f32.mrf.mxu0 }
 0x466   : > { %1696 = vmatmul.bf16.gmra.mxu1 %v1612_v57  ;;  %v1594_v21 = vadd.f32 %v3523_v36, %v1576_v41  ;;  %v1565_v29 = vmul.f32 %v3520_v15, %v1529_v28 }
 0x468   : > { %v1610_v42 = vmax.f32 %v1594_v21, 0.0  ;;  %v1583_v9 = vadd.f32 %v3523_v36, %v1565_v29 }
 0x46a   : > { %v1618_v60 = vpack.c.bf16 %v1610_v42, %v1609_v14  ;;  %v1599_v16 = vmax.f32 %v1583_v9, 0.0 }
 0x46c   : > { %1726 = vmatmul.bf16.gmra.mxu3 %v1618_v60 }
 0x46d   : > { %v1531_v61 = vpop.f32.mrf.mxu0 }
 0x46e   : > { %v1566_v45 = vmul.f32 %v3520_v15, %v1531_v61 }
 0x470   : > { %v1584_v10 = vadd.f32 %v3523_v36, %v1566_v45 }
 0x472   : > { %v1600_v24 = vmax.f32 %v1584_v10, 0.0 }
 0x474   : > { %v1613_v19 = vpack.c.bf16 %v1600_v24, %v1599_v16 }
 0x475   : > { %v1534_v51 = vpop.f32.mrf.mxu0 }
 0x476   : > { %1701 = vmatmul.bf16.gmra.mxu1 %v1613_v19  ;;  %v1567_v27 = vmul.f32 %v3520_v15, %v1534_v51 }
 0x478   : > { %v1585_v3 = vadd.f32 %v3523_v36, %v1567_v27 }
 0x47a   : > { %v1601_v33 = vmax.f32 %v1585_v3, 0.0 }
 0x47d   : > { %v1536_v44 = vpop.f32.mrf.mxu0 }
 0x47e   : > { %v1568_v4 = vmul.f32 %v3520_v15, %v1536_v44 }
 0x480   : > { %v1586_v22 = vadd.f32 %v3523_v36, %v1568_v4 }
 0x482   : > { %v1602_v62 = vmax.f32 %v1586_v22, 0.0 }
 0x484   : > { %v1614_v43 = vpack.c.bf16 %v1602_v62, %v1601_v33 }
 0x485   : > { %v1539_v0 = vpop.f32.mrf.mxu0 }
 0x486   : > { %1706 = vmatmul.bf16.gmra.mxu1 %v1614_v43  ;;  %v1569_v5 = vmul.f32 %v3520_v15, %v1539_v0 }
 0x488   : > { %v1587_v6 = vadd.f32 %v3523_v36, %v1569_v5 }
 0x48a   : > { %v1603_v48 = vmax.f32 %v1587_v6, 0.0 }
 0x48d   : > { %v1541_v2 = vpop.f32.mrf.mxu0 }
 0x48e   : > { %v1570_v52 = vmul.f32 %v3520_v15, %v1541_v2 }
 0x490   : > { %v1588_v17 = vadd.f32 %v3523_v36, %v1570_v52 }
 0x492   : > { %v1604_v26 = vmax.f32 %v1588_v17, 0.0 }
 0x494   : > { %v1615_v23 = vpack.c.bf16 %v1604_v26, %v1603_v48 }
 0x495   : > { %v1544_v35 = vpop.f32.mrf.mxu0 }
 0x496   : > { %1711 = vmatmul.bf16.gmra.mxu1 %v1615_v23  ;;  %v1571_v49 = vmul.f32 %v3520_v15, %v1544_v35 }
 0x498   : > { %v1589_v13 = vadd.f32 %v3523_v36, %v1571_v49 }
 0x49a   : > { %v1605_v32 = vmax.f32 %v1589_v13, 0.0 }
 0x49d   : > { %v1546_v37 = vpop.f32.mrf.mxu0 }
 0x49e   : > { %v1572_v11 = vmul.f32 %v3520_v15, %v1546_v37  ;;  %v3556_v15 = vld [vmem:[#allocation4 + $0x2] ss:$0 sm:$0xff] }
 0x4a0   : > { %v1590_v50 = vadd.f32 %v3523_v36, %v1572_v11 }
 0x4a2   : > { %v1606_v38 = vmax.f32 %v1590_v50, 0.0 }
 0x4a4   : > { %v1616_v18 = vpack.c.bf16 %v1606_v38, %v1605_v32 }
 0x4a6   : > { %1716 = vmatmul.bf16.gmra.mxu1 %v1616_v18 }
 0x4d3   : > { %v1692_v58 = vpop.f32.mrf.mxu1 }
 0x4d4   : > { %v1734_v36 = vmul.f32 %v3556_v15, %v1692_v58 }
 0x4d6   : > { %v1752_v55 = vadd.f32 %v3559_v25, %v1734_v36 }
 0x4d8   : > { %v1768_v59 = vmax.f32 %v1752_v55, 0.0 }
 0x4db   : > { %v1694_v54 = vpop.f32.mrf.mxu1 }
 0x4dc   : > { %v1735_v31 = vmul.f32 %v3556_v15, %v1694_v54 }
 0x4de   : > { %v1753_v39 = vadd.f32 %v3559_v25, %v1735_v31 }
 0x4df   : > { %v1722_v56 = vpop.f32.mrf.mxu3 }
 0x4e0   : > { %v1769_v7 = vmax.f32 %v1753_v39, 0.0  ;;  %v1746_v46 = vmul.f32 %v3556_v15, %v1722_v56 }
 0x4e2   : > { %v1784_v8 = vpack.c.bf16 %v1769_v7, %v1768_v59  ;;  %v1764_v57 = vadd.f32 %v3559_v25, %v1746_v46  ;;  %v2645_v46 = vld [vmem:[#allocation14] ss:$0 sm:$0xff] }
 0x4e3   : > { %v1697_v12 = vpop.f32.mrf.mxu1 }
 0x4e4   : > { %1868 = vmatmul.bf16.vlgmr.msra.gmra.mxu2 %v1784_v8  ;;  %v1736_v28 = vmul.f32 %v3556_v15, %v1697_v12  ;;  %v1780_v21 = vmax.f32 %v1764_v57, 0.0 }
 0x4e6   : > { %v1754_v60 = vadd.f32 %v3559_v25, %v1736_v28 }
 0x4e7   : > { %v1724_v41 = vpop.f32.mrf.mxu3 }
 0x4e8   : > { %v1747_v14 = vmul.f32 %v3556_v15, %v1724_v41  ;;  %v1770_v24 = vmax.f32 %v1754_v60, 0.0 }
 0x4ea   : > { %v1765_v42 = vadd.f32 %v3559_v25, %v1747_v14 }
 0x4eb   : > { %v1699_v29 = vpop.f32.mrf.mxu1 }
 0x4ec   : > { %v1737_v61 = vmul.f32 %v3556_v15, %v1699_v29  ;;  %v1781_v9 = vmax.f32 %v1765_v42, 0.0 }
 0x4ee   : > { %v1755_v45 = vadd.f32 %v3559_v25, %v1737_v61  ;;  %v1790_v10 = vpack.c.bf16 %v1781_v9, %v1780_v21 }
 0x4ef   : > { %v1727_v16 = vpop.f32.mrf.mxu3 }
 0x4f0   : > { %v1771_v19 = vmax.f32 %v1755_v45, 0.0  ;;  %1898 = vmatmul.bf16.vlgmr.msra.gmra.mxu3 %v1790_v10  ;;  %v1748_v27 = vmul.f32 %v3556_v15, %v1727_v16 }
 0x4f2   : > { %v1785_v51 = vpack.c.bf16 %v1771_v19, %v1770_v24  ;;  %v1766_v3 = vadd.f32 %v3559_v25, %v1748_v27 }
 0x4f3   : > { %v1702_v44 = vpop.f32.mrf.mxu1 }
 0x4f4   : > { %1873 = vmatmul.bf16.gmra.mxu2 %v1785_v51  ;;  %v1738_v22 = vmul.f32 %v3556_v15, %v1702_v44  ;;  %v1782_v62 = vmax.f32 %v1766_v3, 0.0 }
 0x4f6   : > { %v1756_v20 = vadd.f32 %v3559_v25, %v1738_v22 }
 0x4f7   : > { %v1729_v4 = vpop.f32.mrf.mxu3 }
 0x4f8   : > { %v1749_v33 = vmul.f32 %v3556_v15, %v1729_v4  ;;  %v1772_v6 = vmax.f32 %v1756_v20, 0.0 }
 0x4fa   : > { %v1767_v43 = vadd.f32 %v3559_v25, %v1749_v33 }
 0x4fb   : > { %v1704_v0 = vpop.f32.mrf.mxu1 }
 0x4fc   : > { %v1739_v47 = vmul.f32 %v3556_v15, %v1704_v0  ;;  %v1783_v5 = vmax.f32 %v1767_v43, 0.0 }
 0x4fe   : > { %v1757_v1 = vadd.f32 %v3559_v25, %v1739_v47  ;;  %v1791_v2 = vpack.c.bf16 %v1783_v5, %v1782_v62 }
 0x500   : > { %v1773_v52 = vmax.f32 %v1757_v1, 0.0  ;;  %1903 = vmatmul.bf16.gmra.mxu3 %v1791_v2 }
 0x502   : > { %v1786_v17 = vpack.c.bf16 %v1773_v52, %v1772_v6 }
 0x503   : > { %v1707_v63 = vpop.f32.mrf.mxu1 }
 0x504   : > { %1878 = vmatmul.bf16.gmra.mxu2 %v1786_v17  ;;  %v1740_v48 = vmul.f32 %v3556_v15, %v1707_v63 }
 0x506   : > { %v1758_v23 = vadd.f32 %v3559_v25, %v1740_v48 }
 0x508   : > { %v1774_v37 = vmax.f32 %v1758_v23, 0.0 }
 0x50b   : > { %v1709_v26 = vpop.f32.mrf.mxu1 }
 0x50c   : > { %v1741_v35 = vmul.f32 %v3556_v15, %v1709_v26 }
 0x50e   : > { %v1759_v49 = vadd.f32 %v3559_v25, %v1741_v35 }
 0x510   : > { %v1775_v13 = vmax.f32 %v1759_v49, 0.0 }
 0x512   : > { %v1787_v11 = vpack.c.bf16 %v1775_v13, %v1774_v37 }
 0x513   : > { %v1712_v50 = vpop.f32.mrf.mxu1 }
 0x514   : > { %1883 = vmatmul.bf16.gmra.mxu2 %v1787_v11  ;;  %v1742_v32 = vmul.f32 %v3556_v15, %v1712_v50 }
 0x516   : > { %v1760_v18 = vadd.f32 %v3559_v25, %v1742_v32 }
 0x518   : > { %v1776_v40 = vmax.f32 %v1760_v18, 0.0 }
 0x51b   : > { %v1714_v38 = vpop.f32.mrf.mxu1 }
 0x51c   : > { %v1743_v34 = vmul.f32 %v3556_v15, %v1714_v38 }
 0x51e   : > { %v1761_v53 = vadd.f32 %v3559_v25, %v1743_v34 }
 0x520   : > { %v1777_v30 = vmax.f32 %v1761_v53, 0.0 }
 0x522   : > { %v1788_v58 = vpack.c.bf16 %v1777_v30, %v1776_v40 }
 0x523   : > { %v1717_v36 = vpop.f32.mrf.mxu1 }
 0x524   : > { %1888 = vmatmul.bf16.gmra.mxu2 %v1788_v58  ;;  %v1744_v54 = vmul.f32 %v3556_v15, %v1717_v36 }
 0x526   : > { %v1762_v31 = vadd.f32 %v3559_v25, %v1744_v54 }
 0x528   : > { %v1778_v59 = vmax.f32 %v1762_v31, 0.0 }
 0x52b   : > { %v1719_v55 = vpop.f32.mrf.mxu1 }
 0x52c   : > { %v1745_v39 = vmul.f32 %v3556_v15, %v1719_v55 }
 0x52e   : > { %v1763_v56 = vadd.f32 %v3559_v25, %v1745_v39 }
 0x530   : > { %v1779_v7 = vmax.f32 %v1763_v56, 0.0 }
 0x532   : > { %v1789_v8 = vpack.c.bf16 %v1779_v7, %v1778_v59 }
 0x534   : > { %1893 = vmatmul.bf16.gmra.mxu2 %v1789_v8 }
 0x567   : > { %v1869_v12 = vpop.f32.mrf.mxu2 }
 0x568   : > { %v1870_v57 = vadd.f32 %v2645_v46, %v1869_v12 }
 0x56a   : > { %1909 = vst [vmem:[%s3310_s24] sm:$0xff] %v1870_v57 }
 0x56f   : > { %v1871_v41 = vpop.f32.mrf.mxu2 }
 0x570   : > { %v1872_v28 = vadd.f32 %v2645_v46, %v1871_v41 }
 0x572   : > { %1910 = vst [vmem:[%s3310_s24 + $0x8] sm:$0xff] %v1872_v28 }
 0x573   : > { %v1899_v14 = vpop.f32.mrf.mxu3 }
 0x574   : > { %v1900_v21 = vadd.f32 %v2645_v46, %v1899_v14 }
 0x576   : > { %1921 = vst [vmem:[%s3310_s24 + $0x60] sm:$0xff] %v1900_v21 }
 0x577   : > { %v1874_v15 = vpop.f32.mrf.mxu2 }
 0x578   : > { %v1875_v25 = vadd.f32 %v2645_v46, %v1874_v15 }
 0x57a   : > { %1911 = vst [vmem:[%s3310_s24 + $0x10] sm:$0xff] %v1875_v25 }
 0x57b   : > { %v1901_v42 = vpop.f32.mrf.mxu3 }
 0x57c   : > { %v1902_v29 = vadd.f32 %v2645_v46, %v1901_v42 }
 0x57e   : > { %1922 = vst [vmem:[%s3310_s24 + $0x68] sm:$0xff] %v1902_v29 }
 0x57f   : > { %v1876_v60 = vpop.f32.mrf.mxu2 }
 0x580   : > { %v1877_v61 = vadd.f32 %v2645_v46, %v1876_v60 }
 0x582   : > { %1912 = vst [vmem:[%s3310_s24 + $0x18] sm:$0xff] %v1877_v61 }
 0x583   : > { %v1904_v9 = vpop.f32.mrf.mxu3 }
 0x584   : > { %v1905_v45 = vadd.f32 %v2645_v46, %v1904_v9 }
 0x586   : > { %1923 = vst [vmem:[%s3310_s24 + $0x70] sm:$0xff] %v1905_v45 }
 0x587   : > { %v1879_v10 = vpop.f32.mrf.mxu2 }
 0x588   : > { %v1880_v16 = vadd.f32 %v2645_v46, %v1879_v10 }
 0x58a   : > { %1913 = vst [vmem:[%s3310_s24 + $0x20] sm:$0xff] %v1880_v16 }
 0x58b   : > { %v1906_v24 = vpop.f32.mrf.mxu3 }
 0x58c   : > { %v1907_v19 = vadd.f32 %v2645_v46, %v1906_v24 }
 0x58e   : > { %1924 = vst [vmem:[%s3310_s24 + $0x78] sm:$0xff] %v1907_v19 }
 0x58f   : > { %v1881_v51 = vpop.f32.mrf.mxu2 }
 0x590   : > { %v1882_v27 = vadd.f32 %v2645_v46, %v1881_v51 }
 0x592   : > { %1914 = vst [vmem:[%s3310_s24 + $0x28] sm:$0xff] %v1882_v27 }
 0x597   : > { %v1884_v44 = vpop.f32.mrf.mxu2 }
 0x598   : > { %v1885_v3 = vadd.f32 %v2645_v46, %v1884_v44 }
 0x59a   : > { %1915 = vst [vmem:[%s3310_s24 + $0x30] sm:$0xff] %v1885_v3 }
 0x59f   : > { %v1886_v4 = vpop.f32.mrf.mxu2 }
 0x5a0   : > { %v1887_v22 = vadd.f32 %v2645_v46, %v1886_v4 }
 0x5a2   : > { %1916 = vst [vmem:[%s3310_s24 + $0x38] sm:$0xff] %v1887_v22 }
 0x5a7   : > { %v1889_v33 = vpop.f32.mrf.mxu2 }
 0x5a8   : > { %v1890_v62 = vadd.f32 %v2645_v46, %v1889_v33 }
 0x5aa   : > { %1917 = vst [vmem:[%s3310_s24 + $0x40] sm:$0xff] %v1890_v62 }
 0x5af   : > { %v1891_v43 = vpop.f32.mrf.mxu2 }
 0x5b0   : > { %v1892_v0 = vadd.f32 %v2645_v46, %v1891_v43 }
 0x5b2   : > { %1918 = vst [vmem:[%s3310_s24 + $0x48] sm:$0xff] %v1892_v0 }
 0x5b7   : > { %v1894_v20 = vpop.f32.mrf.mxu2 }
 0x5b8   : > { %v1895_v47 = vadd.f32 %v2645_v46, %v1894_v20 }
 0x5ba   : > { %1919 = vst [vmem:[%s3310_s24 + $0x50] sm:$0xff] %v1895_v47 }
 0x5bf   : > { %v1896_v5 = vpop.f32.mrf.mxu2 }
 0x5c0   : > { %v1897_v1 = vadd.f32 %v2645_v46, %v1896_v5 }
 0x5c2   : > { %1920 = vst [vmem:[%s3310_s24 + $0x58] sm:$0xff] %v1897_v1 }
 0x5c3 PF: > { %s1940_s7 = sshll.u32 %s3310_s24, 4  ;;  %s3730_s30 = smov (!%p1341_p2, %s2944_s30), 0  ;;  %s1941_s7 = int_to_ptr.vmem [resolvable:$true] %s1940_s7 }
 0x5c4   : > { %s2362_s15 = sshll.u32 %s3730_s30, 7  ;;  %s3708_s19 = sld [smem:[#allocation33_spill]] }
 0x5c5   : > { %s1926_s17 = scalar_lea.sflag [#allocation8], %s391_s4 }
 0x5ca   : > { %s1939_s2 = scalar_lea.hbm %s3708_s19, %s2362_s15  ;;  %s2846_s1 = scalar_lea.hbm %s3708_s19, 384 }
 0x5cb   : > { %s1942_s6 = sshll.u32 %s1939_s2, 4  ;;  %s1943_s6 = int_to_ptr.hbm [resolvable:$true] %s1942_s6 }
 0x5cc   : > { %s2840_s14 = sshra.s32 %s1943_s6, 4  ;;  %s2841_s14 = int_to_ptr.hbm [resolvable:$true] %s2840_s14 }
 0x5cd   : > { %s2842_s13 = scalar_lea.hbm %s2841_s14, 128  ;;  %p2847_p4 = scmp.lt.s32.totalorder %s2841_s14, %s3708_s19 }
 0x5ce   : > { %p2843_p1 = scmp.ne.s32.totalorder %s2841_s14, %s2842_s13  ;;  %p2848_p5 = scmp.lt.s32.totalorder %s2846_s1, %s2842_s13 }
 0x5d0   : > { %p2844_p0 = pnand %p2843_p1, %p3081_p6  ;;  %p2849_p7 = por %p2848_p5, %p2847_p4 }
 0x5d2   : > { %p2845_p3 = pneg %p2844_p0 }
 0x5d4   : > { %p2850_p10 = pnand %p2849_p7, %p2845_p3 }
 0x5d6   : > { %2853 = shalt.err (!%p2850_p10)
}
 0x5d7   : > { %s2973_s4 = smov 128   ;;  %s2974_s3 = smov 8  }
 0x5d8   : > { %2488 = dma.vmem_to_hbm [thread:$0]  (%p3081_p6), %s1941_s7, 2048, %s1943_s6, %s1926_s17, %s2973_s4, %s2973_s4, %s2974_s3  }
 0x5d9 PF: > { %s3709_s21 = sld [smem:[#allocation23_spill]]  ;;  %p2525_p11 = scmp.ge.s32.totalorder %s2960_s11, 2 }
 0x5db   : > { %p2511_p12 = pnand %p2525_p11, %p3086_p8 }
 0x5dd   : > { %p2512_p2 = pneg %p2511_p12 }
 0x5df   : > { %s1957_s15 = sand.u32 1, %s3709_s21  }
 0x5e0   : > { %s1958_s27 = scalar_lea.sflag [#allocation8], %s1957_s15 }
 0x5e1   : > { %2915 = dma.done.wait (%p2512_p2), %s1958_s27, 2048  }
 0x5e2   : > { %2917 = vsyncadd (%p2512_p2), %s1958_s27, 4294965248  ;;  %s26_s11 = sadd.s32 1, %s2960_s11   ;;  %s3711_s20 = sld [smem:[#allocation26_spill]] }
 0x5e3   : > { %p23_p13 = scmp.ge.s32.totalorder %s26_s11, 14   ;;  %s3712_s7 = sld [smem:[#allocation27_spill]] }
 0x5e4   : > { %s3713_s24 = smov %s2924_s25  ;;  %s3714_s25 = smov %s2928_s26 }
 0x5e5   : > { %s3715_s26 = smov %s3176_s22  ;;  %s3716_s27 = smov %s2936_s28 }
 0x5e6   : > { %s3717_s28 = smov %s2940_s29  ;;  %s3718_s29 = smov %s3153_s23 }
 0x5e7   : > { %s3719_s30 = smov %s2952_s9  ;;  %s3720_s8 = smov %s2956_s10 }
 0x5e8   : > { %s3721_s9 = smov %s3711_s20  ;;  %25 = sbr.rel (!%p23_p13) target bundleno = 19 (0x13), region = 145 }
 0x5e9   : > { %s3722_s10 = smov %s3712_s7 }
 0x5ed   :  { %1964 = vsyncpa [#allocation7], 1 }
 0x5ee   :  { %1966 = vsyncpa [#allocation7 + $0x1], 1 }
 0x5ef   :  { %1967 = vsyncpa [#allocation10], 1 }
 0x5f0   :  { %1968 = vsyncpa [#allocation13], 1 }
 0x5f1   :  { %1969 = vsyncpa [#allocation16], 1 }
 0x5f2   :  { %1970 = vsyncpa [#allocation8], 1 }
 0x5f3   :  { %1972 = vsyncpa [#allocation8 + $0x1], 1 }

</bundles_post_ra>
